<compile_context>
chip_gen: v6e
topology: v6e:2x2x1
jax: 0.10.0
libtpu: 0.0.40
codegen_flags: <defaults>
</compile_context>

<pallas_src>
import math
from functools import partial

import jax
import jax.numpy as jnp
from jax import lax
from jax.experimental import pallas as pl
from jax.experimental.pallas import tpu as pltpu


# ----------------------------- config (small shapes) -----------------------------
INPUT_DIM = 16
HIDDEN_DIM = 32
LSTM_LAYERS = 2
N_HEADS = 4
TRANSFORMER_LAYERS = 2
OUTPUT_DIM = 4
BATCH = 2
SEQ = 8


def _wspec(a):
    """Full-array block, constant index map (weight stays VMEM-resident)."""
    nd = a.ndim
    return pl.BlockSpec(a.shape, lambda i, _nd=nd: (0,) * _nd)


def _layer_norm(x, w, b, eps=1e-5):
    mu = jnp.mean(x, axis=-1, keepdims=True)
    xc = x - mu
    var = jnp.mean(xc * xc, axis=-1, keepdims=True)
    return xc * lax.rsqrt(var + eps) * w + b


# ------------------------------- fused forward kernel -----------------------------
def fused_forward_kernel(
    x_ref,
    wih0_ref, whh0_ref, b0_ref,
    wih1_ref, whh1_ref, b1_ref,
    wqkv_ref, bqkv_ref, wo_ref, bo_ref,
    w1_ref, bf1_ref, w2_ref, bf2_ref,
    ln1w_ref, ln1b_ref, ln2w_ref, ln2b_ref,
    fcw_ref, fcb_ref,
    out_ref,
    hseq_ref,
    *, nh,
):
    """Whole LSTMTransformer forward for a (Bb, T, Din) batch block."""
    Bb, T, Din = x_ref.shape
    H = whh0_ref.shape[0]
    dh = H // nh
    scale = 1.0 / math.sqrt(dh)
    f32 = jnp.float32

    x2d = x_ref[...].reshape(Bb * T, Din)                      # (Bb*T, Din)

    # ---------------- LSTM stack (gate column order: i, f, o, g) ----------------
    def lstm_layer(x2d_in, wih_ref, whh_ref, b_ref):
        whh = whh_ref[...]
        # Input projection + combined bias hoisted out of the recurrence.
        xproj = (jnp.dot(x2d_in, wih_ref[...], preferred_element_type=f32)
                 + b_ref[...]).reshape(Bb, T, 4 * H)           # (Bb, T, 4H)
        h = jnp.zeros((Bb, H), f32)
        c = jnp.zeros((Bb, H), f32)
        for t in range(T):                                     # serial path: h @ W_hh only
            gates = xproj[:, t, :] + jnp.dot(h, whh, preferred_element_type=f32)
            sig = jax.nn.sigmoid(gates[:, :3 * H])             # i | f | o
            g_g = jnp.tanh(gates[:, 3 * H:])
            i_g = sig[:, 0:H]
            f_g = sig[:, H:2 * H]
            o_g = sig[:, 2 * H:3 * H]
            c = f_g * c + i_g * g_g
            h = o_g * jnp.tanh(c)
            hseq_ref[:, t, :] = h                              # plain vst, no concat

    lstm_layer(x2d, wih0_ref, whh0_ref, b0_ref)
    h1 = hseq_ref[...].reshape(Bb * T, H)
    lstm_layer(h1, wih1_ref, whh1_ref, b1_ref)
    xe = hseq_ref[...].reshape(Bb * T, H)                      # (Bb*T, H)

    # --------------- Transformer encoder stack (post-norm, ReLU FFN) ------------
    n_layers = wqkv_ref.shape[0]
    for l in range(n_layers):
        # Fused lane-dense QKV projection: one (Bb*T, H) @ (H, 3H) matmul.
        qkv = jnp.dot(xe, wqkv_ref[l], preferred_element_type=f32) + bqkv_ref[l]
        q = qkv[:, 0:H].reshape(Bb, T, H)
        k = qkv[:, H:2 * H].reshape(Bb, T, H)
        v = qkv[:, 2 * H:3 * H].reshape(Bb, T, H)
        wo_l = wo_ref[l]                                       # (H, H), lane-dense
        attn = None
        for hi in range(nh):                                   # heads split only for scores
            sl = slice(hi * dh, (hi + 1) * dh)
            qh = q[:, :, sl]
            kh = k[:, :, sl]
            vh = v[:, :, sl]                                   # (Bb, T, dh)
            s = jnp.einsum('btd,bsd->bts', qh, kh,
                           preferred_element_type=f32) * scale  # (Bb, T, T)
            s = s - jnp.max(s, axis=-1, keepdims=True)
            e = jnp.exp(s)
            p = e / jnp.sum(e, axis=-1, keepdims=True)          # exact softmax
            ctx = jnp.einsum('bts,bsd->btd', p, vh,
                             preferred_element_type=f32)        # (Bb, T, dh)
            # Head-concat folded into the output projection (accumulate contributions).
            contrib = jnp.dot(ctx.reshape(Bb * T, dh), wo_l[sl, :],
                              preferred_element_type=f32)       # (Bb*T, H)
            attn = contrib if attn is None else attn + contrib
        attn = attn + bo_ref[l]
        y = _layer_norm(xe + attn, ln1w_ref[l], ln1b_ref[l])
        ff = jnp.dot(y, w1_ref[l], preferred_element_type=f32) + bf1_ref[l]
        ff = jnp.maximum(ff, 0.0)
        ff = jnp.dot(ff, w2_ref[l], preferred_element_type=f32) + bf2_ref[l]
        xe = _layer_norm(y + ff, ln2w_ref[l], ln2b_ref[l])

    # ------------------------- FC on the last time step -------------------------
    last = xe.reshape(Bb, T, H)[:, T - 1, :]                   # (Bb, H)
    out = jnp.dot(last, fcw_ref[...], preferred_element_type=f32) + fcb_ref[...]
    out_ref[:, 0, :] = out.astype(out_ref.dtype)


# --------------------------------- parameter init ---------------------------------
def _reorder_gates(w):
    """Reorder PyTorch gate blocks (i, f, g, o) -> (i, f, o, g) along axis 0."""
    Hq = w.shape[0] // 4
    return jnp.concatenate([w[:2 * Hq], w[3 * Hq:], w[2 * Hq:3 * Hq]], axis=0)


def init_params(key):
    H = HIDDEN_DIM

    def nrm(k, shape, scale=0.1):
        return scale * jax.random.normal(k, shape, jnp.float32)

    params = {"lstm": []}
    for l in range(LSTM_LAYERS):
        din = INPUT_DIM if l == 0 else H
        key, k1, k2, k3, k4 = jax.random.split(key, 5)
        w_ih = nrm(k1, (4 * H, din))      # PyTorch weight_ih_l{l} (gate rows i,f,g,o)
        w_hh = nrm(k2, (4 * H, H))        # PyTorch weight_hh_l{l}
        b_ih = nrm(k3, (4 * H,))
        b_hh = nrm(k4, (4 * H,))
        params["lstm"].append({
            "wih_t": _reorder_gates(w_ih).T,                       # (din, 4H), i,f,o,g
            "whh_t": _reorder_gates(w_hh).T,                       # (H,   4H)
            "b": _reorder_gates(b_ih + b_hh).reshape(1, 4 * H),
        })

    enc_layers = []
    for _ in range(TRANSFORMER_LAYERS):
        key, k1, k2, k3, k4, k5, k6, k7, k8 = jax.random.split(key, 9)
        in_proj_w = nrm(k1, (3 * H, H))       # rows: q | k | v
        in_proj_b = nrm(k2, (3 * H,))
        out_proj_w = nrm(k3, (H, H))
        out_proj_b = nrm(k4, (H,))
        lin1_w = nrm(k5, (2 * H, H))
        lin1_b = nrm(k6, (2 * H,))
        lin2_w = nrm(k7, (H, 2 * H))
        lin2_b = nrm(k8, (H,))
        enc_layers.append({
            # Lane-dense fused QKV: x @ in_proj_w.T -> (.., 3H) columns [q | k | v],
            # head h's columns inside each H block are h*dh:(h+1)*dh.
            "wqkv": in_proj_w.T,                                   # (H, 3H)
            "bqkv": in_proj_b.reshape(1, 3 * H),
            "wo": out_proj_w.T,                                    # (H, H) lane-dense
            "bo": out_proj_b.reshape(1, H),
            "w1": lin1_w.T, "b1": lin1_b.reshape(1, 2 * H),
            "w2": lin2_w.T, "b2": lin2_b.reshape(1, H),
            "ln1w": jnp.ones((1, H), jnp.float32),
            "ln1b": jnp.zeros((1, H), jnp.float32),
            "ln2w": jnp.ones((1, H), jnp.float32),
            "ln2b": jnp.zeros((1, H), jnp.float32),
        })
    params["enc"] = {k: jnp.stack([lay[k] for lay in enc_layers], axis=0)
                     for k in enc_layers[0]}

    key, kf1, kf2 = jax.random.split(key, 3)
    fc_w = nrm(kf1, (OUTPUT_DIM, H))
    fc_b = nrm(kf2, (OUTPUT_DIM,))
    params["fc"] = {"w_t": fc_w.T, "b": fc_b.reshape(1, OUTPUT_DIM)}
    return params


# ----------------------------------- forward --------------------------------------
@partial(jax.jit, static_argnames=("batch_block",))
def lstm_transformer_forward(x, params, batch_block=None):
    """x: (B, T, input_dim) float32 -> (B, output_dim) float32.

    batch_block: batch elements per program. Default = B (single program: best on
    single-TC v5e/v6e). On v7x pass batch_block=B//2 to spread the 2-way 'parallel'
    grid across both TensorCores while keeping batched sublanes inside each core.
    """
    B, T, Din = x.shape
    bb = B if batch_block is None else batch_block
    assert B % bb == 0
    l0, l1 = params["lstm"]
    enc = params["enc"]
    fc = params["fc"]
    H = fc["w_t"].shape[0]
    O = fc["w_t"].shape[1]

    args = (
        x.astype(jnp.float32),
        l0["wih_t"], l0["whh_t"], l0["b"],
        l1["wih_t"], l1["whh_t"], l1["b"],
        enc["wqkv"], enc["bqkv"], enc["wo"], enc["bo"],
        enc["w1"], enc["b1"], enc["w2"], enc["b2"],
        enc["ln1w"], enc["ln1b"], enc["ln2w"], enc["ln2b"],
        fc["w_t"], fc["b"],
    )
    in_specs = ([pl.BlockSpec((bb, T, Din), lambda i: (i, 0, 0))]
                + [_wspec(a) for a in args[1:]])

    out = pl.pallas_call(
        partial(fused_forward_kernel, nh=N_HEADS),
        out_shape=jax.ShapeDtypeStruct((B, 1, O), jnp.float32),
        grid=(B // bb,),
        in_specs=in_specs,
        out_specs=pl.BlockSpec((bb, 1, O), lambda i: (i, 0, 0)),
        scratch_shapes=[pltpu.VMEM((bb, T, H), jnp.float32)],
        compiler_params=pltpu.CompilerParams(dimension_semantics=("parallel",)),
    )(*args)
    return out.reshape(B, O)


if __name__ == "__main__":
    key = jax.random.PRNGKey(0)
    key_x, key_p = jax.random.split(key)
    x = jax.random.normal(key_x, (BATCH, SEQ, INPUT_DIM), jnp.float32)
    params = init_params(key_p)

    out = lstm_transformer_forward(x, params)
    out = jax.block_until_ready(out)

    assert out.shape == (BATCH, OUTPUT_DIM), out.shape
    assert bool(jnp.all(jnp.isfinite(out)))
    print("KERNEL_OK")
</pallas_src>

<mosaic_0001>
module attributes {stable_mosaic.version = 11 : i64} {
  func.func @fused_forward_kernel(%arg0: i32, %arg1: memref<2x8x16xf32, #tpu.memory_space<vmem>>, %arg2: memref<16x128xf32, #tpu.memory_space<vmem>>, %arg3: memref<32x128xf32, #tpu.memory_space<vmem>>, %arg4: memref<1x128xf32, #tpu.memory_space<vmem>>, %arg5: memref<32x128xf32, #tpu.memory_space<vmem>>, %arg6: memref<32x128xf32, #tpu.memory_space<vmem>>, %arg7: memref<1x128xf32, #tpu.memory_space<vmem>>, %arg8: memref<2x32x96xf32, #tpu.memory_space<vmem>>, %arg9: memref<2x1x96xf32, #tpu.memory_space<vmem>>, %arg10: memref<2x32x32xf32, #tpu.memory_space<vmem>>, %arg11: memref<2x1x32xf32, #tpu.memory_space<vmem>>, %arg12: memref<2x32x64xf32, #tpu.memory_space<vmem>>, %arg13: memref<2x1x64xf32, #tpu.memory_space<vmem>>, %arg14: memref<2x64x32xf32, #tpu.memory_space<vmem>>, %arg15: memref<2x1x32xf32, #tpu.memory_space<vmem>>, %arg16: memref<2x1x32xf32, #tpu.memory_space<vmem>>, %arg17: memref<2x1x32xf32, #tpu.memory_space<vmem>>, %arg18: memref<2x1x32xf32, #tpu.memory_space<vmem>>, %arg19: memref<2x1x32xf32, #tpu.memory_space<vmem>>, %arg20: memref<32x4xf32, #tpu.memory_space<vmem>>, %arg21: memref<1x4xf32, #tpu.memory_space<vmem>>, %arg22: memref<2x1x4xf32, #tpu.memory_space<vmem>>, %arg23: memref<2x8x32xf32, #tpu.memory_space<vmem>>) attributes {dimension_semantics = [#tpu.dimension_semantics<parallel>], iteration_bounds = array<i64: 1>, scalar_prefetch = 0 : i64, scratch_operands = 1 : i64, tpu.core_type = #tpu.core_type<tc>, window_params = [{transform_indices = @transform_0, window_bounds = array<i64: 2, 8, 16>}, {pipeline_mode = #tpu.pipeline_mode<synchronous>, transform_indices = @transform_1, window_bounds = array<i64: 16, 128>}, {pipeline_mode = #tpu.pipeline_mode<synchronous>, transform_indices = @transform_2, window_bounds = array<i64: 32, 128>}, {pipeline_mode = #tpu.pipeline_mode<synchronous>, transform_indices = @transform_3, window_bounds = array<i64: 1, 128>}, {pipeline_mode = #tpu.pipeline_mode<synchronous>, transform_indices = @transform_4, window_bounds = array<i64: 32, 128>}, {pipeline_mode = #tpu.pipeline_mode<synchronous>, transform_indices = @transform_5, window_bounds = array<i64: 32, 128>}, {pipeline_mode = #tpu.pipeline_mode<synchronous>, transform_indices = @transform_6, window_bounds = array<i64: 1, 128>}, {pipeline_mode = #tpu.pipeline_mode<synchronous>, transform_indices = @transform_7, window_bounds = array<i64: 2, 32, 96>}, {pipeline_mode = #tpu.pipeline_mode<synchronous>, transform_indices = @transform_8, window_bounds = array<i64: 2, 1, 96>}, {pipeline_mode = #tpu.pipeline_mode<synchronous>, transform_indices = @transform_9, window_bounds = array<i64: 2, 32, 32>}, {pipeline_mode = #tpu.pipeline_mode<synchronous>, transform_indices = @transform_10, window_bounds = array<i64: 2, 1, 32>}, {pipeline_mode = #tpu.pipeline_mode<synchronous>, transform_indices = @transform_11, window_bounds = array<i64: 2, 32, 64>}, {pipeline_mode = #tpu.pipeline_mode<synchronous>, transform_indices = @transform_12, window_bounds = array<i64: 2, 1, 64>}, {pipeline_mode = #tpu.pipeline_mode<synchronous>, transform_indices = @transform_13, window_bounds = array<i64: 2, 64, 32>}, {pipeline_mode = #tpu.pipeline_mode<synchronous>, transform_indices = @transform_14, window_bounds = array<i64: 2, 1, 32>}, {pipeline_mode = #tpu.pipeline_mode<synchronous>, transform_indices = @transform_15, window_bounds = array<i64: 2, 1, 32>}, {pipeline_mode = #tpu.pipeline_mode<synchronous>, transform_indices = @transform_16, window_bounds = array<i64: 2, 1, 32>}, {pipeline_mode = #tpu.pipeline_mode<synchronous>, transform_indices = @transform_17, window_bounds = array<i64: 2, 1, 32>}, {pipeline_mode = #tpu.pipeline_mode<synchronous>, transform_indices = @transform_18, window_bounds = array<i64: 2, 1, 32>}, {pipeline_mode = #tpu.pipeline_mode<synchronous>, transform_indices = @transform_19, window_bounds = array<i64: 32, 4>}, {pipeline_mode = #tpu.pipeline_mode<synchronous>, transform_indices = @transform_20, window_bounds = array<i64: 1, 4>}, {transform_indices = @transform_21, window_bounds = array<i64: 2, 1, 4>}]} {
    %c0 = arith.constant 0 : index
    %c0_0 = arith.constant 0 : index
    %c0_1 = arith.constant 0 : index
    %0 = vector.load %arg1[%c0, %c0_0, %c0_1] : memref<2x8x16xf32, #tpu.memory_space<vmem>>, vector<2x8x16xf32>
    %1 = vector.shape_cast %0 : vector<2x8x16xf32> to vector<16x16xf32>
    %c0_2 = arith.constant 0 : index
    %c0_3 = arith.constant 0 : index
    %2 = vector.load %arg3[%c0_2, %c0_3] : memref<32x128xf32, #tpu.memory_space<vmem>>, vector<32x128xf32>
    %c0_4 = arith.constant 0 : index
    %c0_5 = arith.constant 0 : index
    %3 = vector.load %arg2[%c0_4, %c0_5] : memref<16x128xf32, #tpu.memory_space<vmem>>, vector<16x128xf32>
    %cst = arith.constant dense<0.000000e+00> : vector<16x128xf32>
    %4 = tpu.matmul %1, %3, %cst {dimension_numbers = #tpu.dot_dimension_numbers<[1], [0], [0], [1], [0, 0, 1, 1], [], []>} : vector<16x16xf32>, vector<16x128xf32>, vector<16x128xf32> -> vector<16x128xf32>
    %c0_6 = arith.constant 0 : index
    %c0_7 = arith.constant 0 : index
    %5 = vector.load %arg4[%c0_6, %c0_7] : memref<1x128xf32, #tpu.memory_space<vmem>>, vector<1x128xf32>
    %6 = vector.broadcast %5 : vector<1x128xf32> to vector<16x128xf32>
    %7 = arith.addf %4, %6 : vector<16x128xf32>
    %8 = vector.shape_cast %7 : vector<16x128xf32> to vector<2x8x128xf32>
    %cst_8 = arith.constant 0.000000e+00 : f32
    %9 = vector.broadcast %cst_8 : f32 to vector<2x32xf32>
    %cst_9 = arith.constant 0.000000e+00 : f32
    %10 = vector.broadcast %cst_9 : f32 to vector<2x32xf32>
    %11 = vector.extract_strided_slice %8 {offsets = [0, 0, 0], sizes = [2, 1, 128], strides = [1, 1, 1]} : vector<2x8x128xf32> to vector<2x1x128xf32>
    %12 = vector.shape_cast %11 : vector<2x1x128xf32> to vector<2x128xf32>
    %cst_10 = arith.constant dense<0.000000e+00> : vector<2x128xf32>
    %13 = tpu.matmul %9, %2, %cst_10 {dimension_numbers = #tpu.dot_dimension_numbers<[1], [0], [0], [1], [0, 0, 1, 1], [], []>} : vector<2x32xf32>, vector<32x128xf32>, vector<2x128xf32> -> vector<2x128xf32>
    %14 = arith.addf %12, %13 : vector<2x128xf32>
    %15 = vector.extract_strided_slice %14 {offsets = [0, 0], sizes = [2, 96], strides = [1, 1]} : vector<2x128xf32> to vector<2x96xf32>
    %16 = arith.negf %15 : vector<2x96xf32>
    %17 = math.exp %16 : vector<2x96xf32>
    %cst_11 = arith.constant 1.000000e+00 : f32
    %18 = vector.broadcast %cst_11 : f32 to vector<2x96xf32>
    %19 = arith.addf %18, %17 : vector<2x96xf32>
    %20 = arith.divf %18, %19 : vector<2x96xf32>
    %21 = vector.extract_strided_slice %14 {offsets = [0, 96], sizes = [2, 32], strides = [1, 1]} : vector<2x128xf32> to vector<2x32xf32>
    %22 = math.tanh %21 : vector<2x32xf32>
    %23 = vector.extract_strided_slice %20 {offsets = [0, 0], sizes = [2, 32], strides = [1, 1]} : vector<2x96xf32> to vector<2x32xf32>
    %24 = vector.extract_strided_slice %20 {offsets = [0, 32], sizes = [2, 32], strides = [1, 1]} : vector<2x96xf32> to vector<2x32xf32>
    %25 = vector.extract_strided_slice %20 {offsets = [0, 64], sizes = [2, 32], strides = [1, 1]} : vector<2x96xf32> to vector<2x32xf32>
    %26 = arith.mulf %24, %10 : vector<2x32xf32>
    %27 = arith.mulf %23, %22 : vector<2x32xf32>
    %28 = arith.addf %26, %27 : vector<2x32xf32>
    %29 = math.tanh %28 : vector<2x32xf32>
    %30 = arith.mulf %25, %29 : vector<2x32xf32>
    %c0_12 = arith.constant 0 : index
    %c0_13 = arith.constant 0 : index
    %c0_14 = arith.constant 0 : index
    %31 = vector.load %arg23[%c0_12, %c0_13, %c0_14] : memref<2x8x32xf32, #tpu.memory_space<vmem>>, vector<2x1x32xf32>
    %32 = vector.shape_cast %31 : vector<2x1x32xf32> to vector<2x32xf32>
    %33 = vector.shape_cast %30 : vector<2x32xf32> to vector<2x1x32xf32>
    tpu.vector_store %arg23[%c0_12, %c0_13, %c0_14], %33 {strides = array<i32>} : memref<2x8x32xf32, #tpu.memory_space<vmem>>, vector<2x1x32xf32>,
    %34 = vector.extract_strided_slice %8 {offsets = [0, 1, 0], sizes = [2, 1, 128], strides = [1, 1, 1]} : vector<2x8x128xf32> to vector<2x1x128xf32>
    %35 = vector.shape_cast %34 : vector<2x1x128xf32> to vector<2x128xf32>
    %cst_15 = arith.constant dense<0.000000e+00> : vector<2x128xf32>
    %36 = tpu.matmul %30, %2, %cst_15 {dimension_numbers = #tpu.dot_dimension_numbers<[1], [0], [0], [1], [0, 0, 1, 1], [], []>} : vector<2x32xf32>, vector<32x128xf32>, vector<2x128xf32> -> vector<2x128xf32>
    %37 = arith.addf %35, %36 : vector<2x128xf32>
    %38 = vector.extract_strided_slice %37 {offsets = [0, 0], sizes = [2, 96], strides = [1, 1]} : vector<2x128xf32> to vector<2x96xf32>
    %39 = arith.negf %38 : vector<2x96xf32>
    %40 = math.exp %39 : vector<2x96xf32>
    %cst_16 = arith.constant 1.000000e+00 : f32
    %41 = vector.broadcast %cst_16 : f32 to vector<2x96xf32>
    %42 = arith.addf %41, %40 : vector<2x96xf32>
    %43 = arith.divf %41, %42 : vector<2x96xf32>
    %44 = vector.extract_strided_slice %37 {offsets = [0, 96], sizes = [2, 32], strides = [1, 1]} : vector<2x128xf32> to vector<2x32xf32>
    %45 = math.tanh %44 : vector<2x32xf32>
    %46 = vector.extract_strided_slice %43 {offsets = [0, 0], sizes = [2, 32], strides = [1, 1]} : vector<2x96xf32> to vector<2x32xf32>
    %47 = vector.extract_strided_slice %43 {offsets = [0, 32], sizes = [2, 32], strides = [1, 1]} : vector<2x96xf32> to vector<2x32xf32>
    %48 = vector.extract_strided_slice %43 {offsets = [0, 64], sizes = [2, 32], strides = [1, 1]} : vector<2x96xf32> to vector<2x32xf32>
    %49 = arith.mulf %47, %28 : vector<2x32xf32>
    %50 = arith.mulf %46, %45 : vector<2x32xf32>
    %51 = arith.addf %49, %50 : vector<2x32xf32>
    %52 = math.tanh %51 : vector<2x32xf32>
    %53 = arith.mulf %48, %52 : vector<2x32xf32>
    %c0_17 = arith.constant 0 : index
    %c1 = arith.constant 1 : index
    %c0_18 = arith.constant 0 : index
    %54 = vector.load %arg23[%c0_17, %c1, %c0_18] : memref<2x8x32xf32, #tpu.memory_space<vmem>>, vector<2x1x32xf32>
    %55 = vector.shape_cast %54 : vector<2x1x32xf32> to vector<2x32xf32>
    %56 = vector.shape_cast %53 : vector<2x32xf32> to vector<2x1x32xf32>
    tpu.vector_store %arg23[%c0_17, %c1, %c0_18], %56 {strides = array<i32>} : memref<2x8x32xf32, #tpu.memory_space<vmem>>, vector<2x1x32xf32>,
    %57 = vector.extract_strided_slice %8 {offsets = [0, 2, 0], sizes = [2, 1, 128], strides = [1, 1, 1]} : vector<2x8x128xf32> to vector<2x1x128xf32>
    %58 = vector.shape_cast %57 : vector<2x1x128xf32> to vector<2x128xf32>
    %cst_19 = arith.constant dense<0.000000e+00> : vector<2x128xf32>
    %59 = tpu.matmul %53, %2, %cst_19 {dimension_numbers = #tpu.dot_dimension_numbers<[1], [0], [0], [1], [0, 0, 1, 1], [], []>} : vector<2x32xf32>, vector<32x128xf32>, vector<2x128xf32> -> vector<2x128xf32>
    %60 = arith.addf %58, %59 : vector<2x128xf32>
    %61 = vector.extract_strided_slice %60 {offsets = [0, 0], sizes = [2, 96], strides = [1, 1]} : vector<2x128xf32> to vector<2x96xf32>
    %62 = arith.negf %61 : vector<2x96xf32>
    %63 = math.exp %62 : vector<2x96xf32>
    %cst_20 = arith.constant 1.000000e+00 : f32
    %64 = vector.broadcast %cst_20 : f32 to vector<2x96xf32>
    %65 = arith.addf %64, %63 : vector<2x96xf32>
    %66 = arith.divf %64, %65 : vector<2x96xf32>
    %67 = vector.extract_strided_slice %60 {offsets = [0, 96], sizes = [2, 32], strides = [1, 1]} : vector<2x128xf32> to vector<2x32xf32>
    %68 = math.tanh %67 : vector<2x32xf32>
    %69 = vector.extract_strided_slice %66 {offsets = [0, 0], sizes = [2, 32], strides = [1, 1]} : vector<2x96xf32> to vector<2x32xf32>
    %70 = vector.extract_strided_slice %66 {offsets = [0, 32], sizes = [2, 32], strides = [1, 1]} : vector<2x96xf32> to vector<2x32xf32>
    %71 = vector.extract_strided_slice %66 {offsets = [0, 64], sizes = [2, 32], strides = [1, 1]} : vector<2x96xf32> to vector<2x32xf32>
    %72 = arith.mulf %70, %51 : vector<2x32xf32>
    %73 = arith.mulf %69, %68 : vector<2x32xf32>
    %74 = arith.addf %72, %73 : vector<2x32xf32>
    %75 = math.tanh %74 : vector<2x32xf32>
    %76 = arith.mulf %71, %75 : vector<2x32xf32>
    %c0_21 = arith.constant 0 : index
    %c2 = arith.constant 2 : index
    %c0_22 = arith.constant 0 : index
    %77 = vector.load %arg23[%c0_21, %c2, %c0_22] : memref<2x8x32xf32, #tpu.memory_space<vmem>>, vector<2x1x32xf32>
    %78 = vector.shape_cast %77 : vector<2x1x32xf32> to vector<2x32xf32>
    %79 = vector.shape_cast %76 : vector<2x32xf32> to vector<2x1x32xf32>
    tpu.vector_store %arg23[%c0_21, %c2, %c0_22], %79 {strides = array<i32>} : memref<2x8x32xf32, #tpu.memory_space<vmem>>, vector<2x1x32xf32>,
    %80 = vector.extract_strided_slice %8 {offsets = [0, 3, 0], sizes = [2, 1, 128], strides = [1, 1, 1]} : vector<2x8x128xf32> to vector<2x1x128xf32>
    %81 = vector.shape_cast %80 : vector<2x1x128xf32> to vector<2x128xf32>
    %cst_23 = arith.constant dense<0.000000e+00> : vector<2x128xf32>
    %82 = tpu.matmul %76, %2, %cst_23 {dimension_numbers = #tpu.dot_dimension_numbers<[1], [0], [0], [1], [0, 0, 1, 1], [], []>} : vector<2x32xf32>, vector<32x128xf32>, vector<2x128xf32> -> vector<2x128xf32>
    %83 = arith.addf %81, %82 : vector<2x128xf32>
    %84 = vector.extract_strided_slice %83 {offsets = [0, 0], sizes = [2, 96], strides = [1, 1]} : vector<2x128xf32> to vector<2x96xf32>
    %85 = arith.negf %84 : vector<2x96xf32>
    %86 = math.exp %85 : vector<2x96xf32>
    %cst_24 = arith.constant 1.000000e+00 : f32
    %87 = vector.broadcast %cst_24 : f32 to vector<2x96xf32>
    %88 = arith.addf %87, %86 : vector<2x96xf32>
    %89 = arith.divf %87, %88 : vector<2x96xf32>
    %90 = vector.extract_strided_slice %83 {offsets = [0, 96], sizes = [2, 32], strides = [1, 1]} : vector<2x128xf32> to vector<2x32xf32>
    %91 = math.tanh %90 : vector<2x32xf32>
    %92 = vector.extract_strided_slice %89 {offsets = [0, 0], sizes = [2, 32], strides = [1, 1]} : vector<2x96xf32> to vector<2x32xf32>
    %93 = vector.extract_strided_slice %89 {offsets = [0, 32], sizes = [2, 32], strides = [1, 1]} : vector<2x96xf32> to vector<2x32xf32>
    %94 = vector.extract_strided_slice %89 {offsets = [0, 64], sizes = [2, 32], strides = [1, 1]} : vector<2x96xf32> to vector<2x32xf32>
    %95 = arith.mulf %93, %74 : vector<2x32xf32>
    %96 = arith.mulf %92, %91 : vector<2x32xf32>
    %97 = arith.addf %95, %96 : vector<2x32xf32>
    %98 = math.tanh %97 : vector<2x32xf32>
    %99 = arith.mulf %94, %98 : vector<2x32xf32>
    %c0_25 = arith.constant 0 : index
    %c3 = arith.constant 3 : index
    %c0_26 = arith.constant 0 : index
    %100 = vector.load %arg23[%c0_25, %c3, %c0_26] : memref<2x8x32xf32, #tpu.memory_space<vmem>>, vector<2x1x32xf32>
    %101 = vector.shape_cast %100 : vector<2x1x32xf32> to vector<2x32xf32>
    %102 = vector.shape_cast %99 : vector<2x32xf32> to vector<2x1x32xf32>
    tpu.vector_store %arg23[%c0_25, %c3, %c0_26], %102 {strides = array<i32>} : memref<2x8x32xf32, #tpu.memory_space<vmem>>, vector<2x1x32xf32>,
    %103 = vector.extract_strided_slice %8 {offsets = [0, 4, 0], sizes = [2, 1, 128], strides = [1, 1, 1]} : vector<2x8x128xf32> to vector<2x1x128xf32>
    %104 = vector.shape_cast %103 : vector<2x1x128xf32> to vector<2x128xf32>
    %cst_27 = arith.constant dense<0.000000e+00> : vector<2x128xf32>
    %105 = tpu.matmul %99, %2, %cst_27 {dimension_numbers = #tpu.dot_dimension_numbers<[1], [0], [0], [1], [0, 0, 1, 1], [], []>} : vector<2x32xf32>, vector<32x128xf32>, vector<2x128xf32> -> vector<2x128xf32>
    %106 = arith.addf %104, %105 : vector<2x128xf32>
    %107 = vector.extract_strided_slice %106 {offsets = [0, 0], sizes = [2, 96], strides = [1, 1]} : vector<2x128xf32> to vector<2x96xf32>
    %108 = arith.negf %107 : vector<2x96xf32>
    %109 = math.exp %108 : vector<2x96xf32>
    %cst_28 = arith.constant 1.000000e+00 : f32
    %110 = vector.broadcast %cst_28 : f32 to vector<2x96xf32>
    %111 = arith.addf %110, %109 : vector<2x96xf32>
    %112 = arith.divf %110, %111 : vector<2x96xf32>
    %113 = vector.extract_strided_slice %106 {offsets = [0, 96], sizes = [2, 32], strides = [1, 1]} : vector<2x128xf32> to vector<2x32xf32>
    %114 = math.tanh %113 : vector<2x32xf32>
    %115 = vector.extract_strided_slice %112 {offsets = [0, 0], sizes = [2, 32], strides = [1, 1]} : vector<2x96xf32> to vector<2x32xf32>
    %116 = vector.extract_strided_slice %112 {offsets = [0, 32], sizes = [2, 32], strides = [1, 1]} : vector<2x96xf32> to vector<2x32xf32>
    %117 = vector.extract_strided_slice %112 {offsets = [0, 64], sizes = [2, 32], strides = [1, 1]} : vector<2x96xf32> to vector<2x32xf32>
    %118 = arith.mulf %116, %97 : vector<2x32xf32>
    %119 = arith.mulf %115, %114 : vector<2x32xf32>
    %120 = arith.addf %118, %119 : vector<2x32xf32>
    %121 = math.tanh %120 : vector<2x32xf32>
    %122 = arith.mulf %117, %121 : vector<2x32xf32>
    %c0_29 = arith.constant 0 : index
    %c4 = arith.constant 4 : index
    %c0_30 = arith.constant 0 : index
    %123 = vector.load %arg23[%c0_29, %c4, %c0_30] : memref<2x8x32xf32, #tpu.memory_space<vmem>>, vector<2x1x32xf32>
    %124 = vector.shape_cast %123 : vector<2x1x32xf32> to vector<2x32xf32>
    %125 = vector.shape_cast %122 : vector<2x32xf32> to vector<2x1x32xf32>
    tpu.vector_store %arg23[%c0_29, %c4, %c0_30], %125 {strides = array<i32>} : memref<2x8x32xf32, #tpu.memory_space<vmem>>, vector<2x1x32xf32>,
    %126 = vector.extract_strided_slice %8 {offsets = [0, 5, 0], sizes = [2, 1, 128], strides = [1, 1, 1]} : vector<2x8x128xf32> to vector<2x1x128xf32>
    %127 = vector.shape_cast %126 : vector<2x1x128xf32> to vector<2x128xf32>
    %cst_31 = arith.constant dense<0.000000e+00> : vector<2x128xf32>
    %128 = tpu.matmul %122, %2, %cst_31 {dimension_numbers = #tpu.dot_dimension_numbers<[1], [0], [0], [1], [0, 0, 1, 1], [], []>} : vector<2x32xf32>, vector<32x128xf32>, vector<2x128xf32> -> vector<2x128xf32>
    %129 = arith.addf %127, %128 : vector<2x128xf32>
    %130 = vector.extract_strided_slice %129 {offsets = [0, 0], sizes = [2, 96], strides = [1, 1]} : vector<2x128xf32> to vector<2x96xf32>
    %131 = arith.negf %130 : vector<2x96xf32>
    %132 = math.exp %131 : vector<2x96xf32>
    %cst_32 = arith.constant 1.000000e+00 : f32
    %133 = vector.broadcast %cst_32 : f32 to vector<2x96xf32>
    %134 = arith.addf %133, %132 : vector<2x96xf32>
    %135 = arith.divf %133, %134 : vector<2x96xf32>
    %136 = vector.extract_strided_slice %129 {offsets = [0, 96], sizes = [2, 32], strides = [1, 1]} : vector<2x128xf32> to vector<2x32xf32>
    %137 = math.tanh %136 : vector<2x32xf32>
    %138 = vector.extract_strided_slice %135 {offsets = [0, 0], sizes = [2, 32], strides = [1, 1]} : vector<2x96xf32> to vector<2x32xf32>
    %139 = vector.extract_strided_slice %135 {offsets = [0, 32], sizes = [2, 32], strides = [1, 1]} : vector<2x96xf32> to vector<2x32xf32>
    %140 = vector.extract_strided_slice %135 {offsets = [0, 64], sizes = [2, 32], strides = [1, 1]} : vector<2x96xf32> to vector<2x32xf32>
    %141 = arith.mulf %139, %120 : vector<2x32xf32>
    %142 = arith.mulf %138, %137 : vector<2x32xf32>
    %143 = arith.addf %141, %142 : vector<2x32xf32>
    %144 = math.tanh %143 : vector<2x32xf32>
    %145 = arith.mulf %140, %144 : vector<2x32xf32>
    %c0_33 = arith.constant 0 : index
    %c5 = arith.constant 5 : index
    %c0_34 = arith.constant 0 : index
    %146 = vector.load %arg23[%c0_33, %c5, %c0_34] : memref<2x8x32xf32, #tpu.memory_space<vmem>>, vector<2x1x32xf32>
    %147 = vector.shape_cast %146 : vector<2x1x32xf32> to vector<2x32xf32>
    %148 = vector.shape_cast %145 : vector<2x32xf32> to vector<2x1x32xf32>
    tpu.vector_store %arg23[%c0_33, %c5, %c0_34], %148 {strides = array<i32>} : memref<2x8x32xf32, #tpu.memory_space<vmem>>, vector<2x1x32xf32>,
    %149 = vector.extract_strided_slice %8 {offsets = [0, 6, 0], sizes = [2, 1, 128], strides = [1, 1, 1]} : vector<2x8x128xf32> to vector<2x1x128xf32>
    %150 = vector.shape_cast %149 : vector<2x1x128xf32> to vector<2x128xf32>
    %cst_35 = arith.constant dense<0.000000e+00> : vector<2x128xf32>
    %151 = tpu.matmul %145, %2, %cst_35 {dimension_numbers = #tpu.dot_dimension_numbers<[1], [0], [0], [1], [0, 0, 1, 1], [], []>} : vector<2x32xf32>, vector<32x128xf32>, vector<2x128xf32> -> vector<2x128xf32>
    %152 = arith.addf %150, %151 : vector<2x128xf32>
    %153 = vector.extract_strided_slice %152 {offsets = [0, 0], sizes = [2, 96], strides = [1, 1]} : vector<2x128xf32> to vector<2x96xf32>
    %154 = arith.negf %153 : vector<2x96xf32>
    %155 = math.exp %154 : vector<2x96xf32>
    %cst_36 = arith.constant 1.000000e+00 : f32
    %156 = vector.broadcast %cst_36 : f32 to vector<2x96xf32>
    %157 = arith.addf %156, %155 : vector<2x96xf32>
    %158 = arith.divf %156, %157 : vector<2x96xf32>
    %159 = vector.extract_strided_slice %152 {offsets = [0, 96], sizes = [2, 32], strides = [1, 1]} : vector<2x128xf32> to vector<2x32xf32>
    %160 = math.tanh %159 : vector<2x32xf32>
    %161 = vector.extract_strided_slice %158 {offsets = [0, 0], sizes = [2, 32], strides = [1, 1]} : vector<2x96xf32> to vector<2x32xf32>
    %162 = vector.extract_strided_slice %158 {offsets = [0, 32], sizes = [2, 32], strides = [1, 1]} : vector<2x96xf32> to vector<2x32xf32>
    %163 = vector.extract_strided_slice %158 {offsets = [0, 64], sizes = [2, 32], strides = [1, 1]} : vector<2x96xf32> to vector<2x32xf32>
    %164 = arith.mulf %162, %143 : vector<2x32xf32>
    %165 = arith.mulf %161, %160 : vector<2x32xf32>
    %166 = arith.addf %164, %165 : vector<2x32xf32>
    %167 = math.tanh %166 : vector<2x32xf32>
    %168 = arith.mulf %163, %167 : vector<2x32xf32>
    %c0_37 = arith.constant 0 : index
    %c6 = arith.constant 6 : index
    %c0_38 = arith.constant 0 : index
    %169 = vector.load %arg23[%c0_37, %c6, %c0_38] : memref<2x8x32xf32, #tpu.memory_space<vmem>>, vector<2x1x32xf32>
    %170 = vector.shape_cast %169 : vector<2x1x32xf32> to vector<2x32xf32>
    %171 = vector.shape_cast %168 : vector<2x32xf32> to vector<2x1x32xf32>
    tpu.vector_store %arg23[%c0_37, %c6, %c0_38], %171 {strides = array<i32>} : memref<2x8x32xf32, #tpu.memory_space<vmem>>, vector<2x1x32xf32>,
    %172 = vector.extract_strided_slice %8 {offsets = [0, 7, 0], sizes = [2, 1, 128], strides = [1, 1, 1]} : vector<2x8x128xf32> to vector<2x1x128xf32>
    %173 = vector.shape_cast %172 : vector<2x1x128xf32> to vector<2x128xf32>
    %cst_39 = arith.constant dense<0.000000e+00> : vector<2x128xf32>
    %174 = tpu.matmul %168, %2, %cst_39 {dimension_numbers = #tpu.dot_dimension_numbers<[1], [0], [0], [1], [0, 0, 1, 1], [], []>} : vector<2x32xf32>, vector<32x128xf32>, vector<2x128xf32> -> vector<2x128xf32>
    %175 = arith.addf %173, %174 : vector<2x128xf32>
    %176 = vector.extract_strided_slice %175 {offsets = [0, 0], sizes = [2, 96], strides = [1, 1]} : vector<2x128xf32> to vector<2x96xf32>
    %177 = arith.negf %176 : vector<2x96xf32>
    %178 = math.exp %177 : vector<2x96xf32>
    %cst_40 = arith.constant 1.000000e+00 : f32
    %179 = vector.broadcast %cst_40 : f32 to vector<2x96xf32>
    %180 = arith.addf %179, %178 : vector<2x96xf32>
    %181 = arith.divf %179, %180 : vector<2x96xf32>
    %182 = vector.extract_strided_slice %175 {offsets = [0, 96], sizes = [2, 32], strides = [1, 1]} : vector<2x128xf32> to vector<2x32xf32>
    %183 = math.tanh %182 : vector<2x32xf32>
    %184 = vector.extract_strided_slice %181 {offsets = [0, 0], sizes = [2, 32], strides = [1, 1]} : vector<2x96xf32> to vector<2x32xf32>
    %185 = vector.extract_strided_slice %181 {offsets = [0, 32], sizes = [2, 32], strides = [1, 1]} : vector<2x96xf32> to vector<2x32xf32>
    %186 = vector.extract_strided_slice %181 {offsets = [0, 64], sizes = [2, 32], strides = [1, 1]} : vector<2x96xf32> to vector<2x32xf32>
    %187 = arith.mulf %185, %166 : vector<2x32xf32>
    %188 = arith.mulf %184, %183 : vector<2x32xf32>
    %189 = arith.addf %187, %188 : vector<2x32xf32>
    %190 = math.tanh %189 : vector<2x32xf32>
    %191 = arith.mulf %186, %190 : vector<2x32xf32>
    %c0_41 = arith.constant 0 : index
    %c7 = arith.constant 7 : index
    %c0_42 = arith.constant 0 : index
    %192 = vector.load %arg23[%c0_41, %c7, %c0_42] : memref<2x8x32xf32, #tpu.memory_space<vmem>>, vector<2x1x32xf32>
    %193 = vector.shape_cast %192 : vector<2x1x32xf32> to vector<2x32xf32>
    %194 = vector.shape_cast %191 : vector<2x32xf32> to vector<2x1x32xf32>
    tpu.vector_store %arg23[%c0_41, %c7, %c0_42], %194 {strides = array<i32>} : memref<2x8x32xf32, #tpu.memory_space<vmem>>, vector<2x1x32xf32>,
    %c0_43 = arith.constant 0 : index
    %c0_44 = arith.constant 0 : index
    %c0_45 = arith.constant 0 : index
    %195 = vector.load %arg23[%c0_43, %c0_44, %c0_45] : memref<2x8x32xf32, #tpu.memory_space<vmem>>, vector<2x8x32xf32>
    %196 = vector.shape_cast %195 : vector<2x8x32xf32> to vector<16x32xf32>
    %c0_46 = arith.constant 0 : index
    %c0_47 = arith.constant 0 : index
    %197 = vector.load %arg6[%c0_46, %c0_47] : memref<32x128xf32, #tpu.memory_space<vmem>>, vector<32x128xf32>
    %c0_48 = arith.constant 0 : index
    %c0_49 = arith.constant 0 : index
    %198 = vector.load %arg5[%c0_48, %c0_49] : memref<32x128xf32, #tpu.memory_space<vmem>>, vector<32x128xf32>
    %cst_50 = arith.constant dense<0.000000e+00> : vector<16x128xf32>
    %199 = tpu.matmul %196, %198, %cst_50 {dimension_numbers = #tpu.dot_dimension_numbers<[1], [0], [0], [1], [0, 0, 1, 1], [], []>} : vector<16x32xf32>, vector<32x128xf32>, vector<16x128xf32> -> vector<16x128xf32>
    %c0_51 = arith.constant 0 : index
    %c0_52 = arith.constant 0 : index
    %200 = vector.load %arg7[%c0_51, %c0_52] : memref<1x128xf32, #tpu.memory_space<vmem>>, vector<1x128xf32>
    %201 = vector.broadcast %200 : vector<1x128xf32> to vector<16x128xf32>
    %202 = arith.addf %199, %201 : vector<16x128xf32>
    %203 = vector.shape_cast %202 : vector<16x128xf32> to vector<2x8x128xf32>
    %cst_53 = arith.constant 0.000000e+00 : f32
    %204 = vector.broadcast %cst_53 : f32 to vector<2x32xf32>
    %cst_54 = arith.constant 0.000000e+00 : f32
    %205 = vector.broadcast %cst_54 : f32 to vector<2x32xf32>
    %206 = vector.extract_strided_slice %203 {offsets = [0, 0, 0], sizes = [2, 1, 128], strides = [1, 1, 1]} : vector<2x8x128xf32> to vector<2x1x128xf32>
    %207 = vector.shape_cast %206 : vector<2x1x128xf32> to vector<2x128xf32>
    %cst_55 = arith.constant dense<0.000000e+00> : vector<2x128xf32>
    %208 = tpu.matmul %204, %197, %cst_55 {dimension_numbers = #tpu.dot_dimension_numbers<[1], [0], [0], [1], [0, 0, 1, 1], [], []>} : vector<2x32xf32>, vector<32x128xf32>, vector<2x128xf32> -> vector<2x128xf32>
    %209 = arith.addf %207, %208 : vector<2x128xf32>
    %210 = vector.extract_strided_slice %209 {offsets = [0, 0], sizes = [2, 96], strides = [1, 1]} : vector<2x128xf32> to vector<2x96xf32>
    %211 = arith.negf %210 : vector<2x96xf32>
    %212 = math.exp %211 : vector<2x96xf32>
    %cst_56 = arith.constant 1.000000e+00 : f32
    %213 = vector.broadcast %cst_56 : f32 to vector<2x96xf32>
    %214 = arith.addf %213, %212 : vector<2x96xf32>
    %215 = arith.divf %213, %214 : vector<2x96xf32>
    %216 = vector.extract_strided_slice %209 {offsets = [0, 96], sizes = [2, 32], strides = [1, 1]} : vector<2x128xf32> to vector<2x32xf32>
    %217 = math.tanh %216 : vector<2x32xf32>
    %218 = vector.extract_strided_slice %215 {offsets = [0, 0], sizes = [2, 32], strides = [1, 1]} : vector<2x96xf32> to vector<2x32xf32>
    %219 = vector.extract_strided_slice %215 {offsets = [0, 32], sizes = [2, 32], strides = [1, 1]} : vector<2x96xf32> to vector<2x32xf32>
    %220 = vector.extract_strided_slice %215 {offsets = [0, 64], sizes = [2, 32], strides = [1, 1]} : vector<2x96xf32> to vector<2x32xf32>
    %221 = arith.mulf %219, %205 : vector<2x32xf32>
    %222 = arith.mulf %218, %217 : vector<2x32xf32>
    %223 = arith.addf %221, %222 : vector<2x32xf32>
    %224 = math.tanh %223 : vector<2x32xf32>
    %225 = arith.mulf %220, %224 : vector<2x32xf32>
    %c0_57 = arith.constant 0 : index
    %c0_58 = arith.constant 0 : index
    %c0_59 = arith.constant 0 : index
    %226 = vector.load %arg23[%c0_57, %c0_58, %c0_59] : memref<2x8x32xf32, #tpu.memory_space<vmem>>, vector<2x1x32xf32>
    %227 = vector.shape_cast %226 : vector<2x1x32xf32> to vector<2x32xf32>
    %228 = vector.shape_cast %225 : vector<2x32xf32> to vector<2x1x32xf32>
    tpu.vector_store %arg23[%c0_57, %c0_58, %c0_59], %228 {strides = array<i32>} : memref<2x8x32xf32, #tpu.memory_space<vmem>>, vector<2x1x32xf32>,
    %229 = vector.extract_strided_slice %203 {offsets = [0, 1, 0], sizes = [2, 1, 128], strides = [1, 1, 1]} : vector<2x8x128xf32> to vector<2x1x128xf32>
    %230 = vector.shape_cast %229 : vector<2x1x128xf32> to vector<2x128xf32>
    %cst_60 = arith.constant dense<0.000000e+00> : vector<2x128xf32>
    %231 = tpu.matmul %225, %197, %cst_60 {dimension_numbers = #tpu.dot_dimension_numbers<[1], [0], [0], [1], [0, 0, 1, 1], [], []>} : vector<2x32xf32>, vector<32x128xf32>, vector<2x128xf32> -> vector<2x128xf32>
    %232 = arith.addf %230, %231 : vector<2x128xf32>
    %233 = vector.extract_strided_slice %232 {offsets = [0, 0], sizes = [2, 96], strides = [1, 1]} : vector<2x128xf32> to vector<2x96xf32>
    %234 = arith.negf %233 : vector<2x96xf32>
    %235 = math.exp %234 : vector<2x96xf32>
    %cst_61 = arith.constant 1.000000e+00 : f32
    %236 = vector.broadcast %cst_61 : f32 to vector<2x96xf32>
    %237 = arith.addf %236, %235 : vector<2x96xf32>
    %238 = arith.divf %236, %237 : vector<2x96xf32>
    %239 = vector.extract_strided_slice %232 {offsets = [0, 96], sizes = [2, 32], strides = [1, 1]} : vector<2x128xf32> to vector<2x32xf32>
    %240 = math.tanh %239 : vector<2x32xf32>
    %241 = vector.extract_strided_slice %238 {offsets = [0, 0], sizes = [2, 32], strides = [1, 1]} : vector<2x96xf32> to vector<2x32xf32>
    %242 = vector.extract_strided_slice %238 {offsets = [0, 32], sizes = [2, 32], strides = [1, 1]} : vector<2x96xf32> to vector<2x32xf32>
    %243 = vector.extract_strided_slice %238 {offsets = [0, 64], sizes = [2, 32], strides = [1, 1]} : vector<2x96xf32> to vector<2x32xf32>
    %244 = arith.mulf %242, %223 : vector<2x32xf32>
    %245 = arith.mulf %241, %240 : vector<2x32xf32>
    %246 = arith.addf %244, %245 : vector<2x32xf32>
    %247 = math.tanh %246 : vector<2x32xf32>
    %248 = arith.mulf %243, %247 : vector<2x32xf32>
    %c0_62 = arith.constant 0 : index
    %c1_63 = arith.constant 1 : index
    %c0_64 = arith.constant 0 : index
    %249 = vector.load %arg23[%c0_62, %c1_63, %c0_64] : memref<2x8x32xf32, #tpu.memory_space<vmem>>, vector<2x1x32xf32>
    %250 = vector.shape_cast %249 : vector<2x1x32xf32> to vector<2x32xf32>
    %251 = vector.shape_cast %248 : vector<2x32xf32> to vector<2x1x32xf32>
    tpu.vector_store %arg23[%c0_62, %c1_63, %c0_64], %251 {strides = array<i32>} : memref<2x8x32xf32, #tpu.memory_space<vmem>>, vector<2x1x32xf32>,
    %252 = vector.extract_strided_slice %203 {offsets = [0, 2, 0], sizes = [2, 1, 128], strides = [1, 1, 1]} : vector<2x8x128xf32> to vector<2x1x128xf32>
    %253 = vector.shape_cast %252 : vector<2x1x128xf32> to vector<2x128xf32>
    %cst_65 = arith.constant dense<0.000000e+00> : vector<2x128xf32>
    %254 = tpu.matmul %248, %197, %cst_65 {dimension_numbers = #tpu.dot_dimension_numbers<[1], [0], [0], [1], [0, 0, 1, 1], [], []>} : vector<2x32xf32>, vector<32x128xf32>, vector<2x128xf32> -> vector<2x128xf32>
    %255 = arith.addf %253, %254 : vector<2x128xf32>
    %256 = vector.extract_strided_slice %255 {offsets = [0, 0], sizes = [2, 96], strides = [1, 1]} : vector<2x128xf32> to vector<2x96xf32>
    %257 = arith.negf %256 : vector<2x96xf32>
    %258 = math.exp %257 : vector<2x96xf32>
    %cst_66 = arith.constant 1.000000e+00 : f32
    %259 = vector.broadcast %cst_66 : f32 to vector<2x96xf32>
    %260 = arith.addf %259, %258 : vector<2x96xf32>
    %261 = arith.divf %259, %260 : vector<2x96xf32>
    %262 = vector.extract_strided_slice %255 {offsets = [0, 96], sizes = [2, 32], strides = [1, 1]} : vector<2x128xf32> to vector<2x32xf32>
    %263 = math.tanh %262 : vector<2x32xf32>
    %264 = vector.extract_strided_slice %261 {offsets = [0, 0], sizes = [2, 32], strides = [1, 1]} : vector<2x96xf32> to vector<2x32xf32>
    %265 = vector.extract_strided_slice %261 {offsets = [0, 32], sizes = [2, 32], strides = [1, 1]} : vector<2x96xf32> to vector<2x32xf32>
    %266 = vector.extract_strided_slice %261 {offsets = [0, 64], sizes = [2, 32], strides = [1, 1]} : vector<2x96xf32> to vector<2x32xf32>
    %267 = arith.mulf %265, %246 : vector<2x32xf32>
    %268 = arith.mulf %264, %263 : vector<2x32xf32>
    %269 = arith.addf %267, %268 : vector<2x32xf32>
    %270 = math.tanh %269 : vector<2x32xf32>
    %271 = arith.mulf %266, %270 : vector<2x32xf32>
    %c0_67 = arith.constant 0 : index
    %c2_68 = arith.constant 2 : index
    %c0_69 = arith.constant 0 : index
    %272 = vector.load %arg23[%c0_67, %c2_68, %c0_69] : memref<2x8x32xf32, #tpu.memory_space<vmem>>, vector<2x1x32xf32>
    %273 = vector.shape_cast %272 : vector<2x1x32xf32> to vector<2x32xf32>
    %274 = vector.shape_cast %271 : vector<2x32xf32> to vector<2x1x32xf32>
    tpu.vector_store %arg23[%c0_67, %c2_68, %c0_69], %274 {strides = array<i32>} : memref<2x8x32xf32, #tpu.memory_space<vmem>>, vector<2x1x32xf32>,
    %275 = vector.extract_strided_slice %203 {offsets = [0, 3, 0], sizes = [2, 1, 128], strides = [1, 1, 1]} : vector<2x8x128xf32> to vector<2x1x128xf32>
    %276 = vector.shape_cast %275 : vector<2x1x128xf32> to vector<2x128xf32>
    %cst_70 = arith.constant dense<0.000000e+00> : vector<2x128xf32>
    %277 = tpu.matmul %271, %197, %cst_70 {dimension_numbers = #tpu.dot_dimension_numbers<[1], [0], [0], [1], [0, 0, 1, 1], [], []>} : vector<2x32xf32>, vector<32x128xf32>, vector<2x128xf32> -> vector<2x128xf32>
    %278 = arith.addf %276, %277 : vector<2x128xf32>
    %279 = vector.extract_strided_slice %278 {offsets = [0, 0], sizes = [2, 96], strides = [1, 1]} : vector<2x128xf32> to vector<2x96xf32>
    %280 = arith.negf %279 : vector<2x96xf32>
    %281 = math.exp %280 : vector<2x96xf32>
    %cst_71 = arith.constant 1.000000e+00 : f32
    %282 = vector.broadcast %cst_71 : f32 to vector<2x96xf32>
    %283 = arith.addf %282, %281 : vector<2x96xf32>
    %284 = arith.divf %282, %283 : vector<2x96xf32>
    %285 = vector.extract_strided_slice %278 {offsets = [0, 96], sizes = [2, 32], strides = [1, 1]} : vector<2x128xf32> to vector<2x32xf32>
    %286 = math.tanh %285 : vector<2x32xf32>
    %287 = vector.extract_strided_slice %284 {offsets = [0, 0], sizes = [2, 32], strides = [1, 1]} : vector<2x96xf32> to vector<2x32xf32>
    %288 = vector.extract_strided_slice %284 {offsets = [0, 32], sizes = [2, 32], strides = [1, 1]} : vector<2x96xf32> to vector<2x32xf32>
    %289 = vector.extract_strided_slice %284 {offsets = [0, 64], sizes = [2, 32], strides = [1, 1]} : vector<2x96xf32> to vector<2x32xf32>
    %290 = arith.mulf %288, %269 : vector<2x32xf32>
    %291 = arith.mulf %287, %286 : vector<2x32xf32>
    %292 = arith.addf %290, %291 : vector<2x32xf32>
    %293 = math.tanh %292 : vector<2x32xf32>
    %294 = arith.mulf %289, %293 : vector<2x32xf32>
    %c0_72 = arith.constant 0 : index
    %c3_73 = arith.constant 3 : index
    %c0_74 = arith.constant 0 : index
    %295 = vector.load %arg23[%c0_72, %c3_73, %c0_74] : memref<2x8x32xf32, #tpu.memory_space<vmem>>, vector<2x1x32xf32>
    %296 = vector.shape_cast %295 : vector<2x1x32xf32> to vector<2x32xf32>
    %297 = vector.shape_cast %294 : vector<2x32xf32> to vector<2x1x32xf32>
    tpu.vector_store %arg23[%c0_72, %c3_73, %c0_74], %297 {strides = array<i32>} : memref<2x8x32xf32, #tpu.memory_space<vmem>>, vector<2x1x32xf32>,
    %298 = vector.extract_strided_slice %203 {offsets = [0, 4, 0], sizes = [2, 1, 128], strides = [1, 1, 1]} : vector<2x8x128xf32> to vector<2x1x128xf32>
    %299 = vector.shape_cast %298 : vector<2x1x128xf32> to vector<2x128xf32>
    %cst_75 = arith.constant dense<0.000000e+00> : vector<2x128xf32>
    %300 = tpu.matmul %294, %197, %cst_75 {dimension_numbers = #tpu.dot_dimension_numbers<[1], [0], [0], [1], [0, 0, 1, 1], [], []>} : vector<2x32xf32>, vector<32x128xf32>, vector<2x128xf32> -> vector<2x128xf32>
    %301 = arith.addf %299, %300 : vector<2x128xf32>
    %302 = vector.extract_strided_slice %301 {offsets = [0, 0], sizes = [2, 96], strides = [1, 1]} : vector<2x128xf32> to vector<2x96xf32>
    %303 = arith.negf %302 : vector<2x96xf32>
    %304 = math.exp %303 : vector<2x96xf32>
    %cst_76 = arith.constant 1.000000e+00 : f32
    %305 = vector.broadcast %cst_76 : f32 to vector<2x96xf32>
    %306 = arith.addf %305, %304 : vector<2x96xf32>
    %307 = arith.divf %305, %306 : vector<2x96xf32>
    %308 = vector.extract_strided_slice %301 {offsets = [0, 96], sizes = [2, 32], strides = [1, 1]} : vector<2x128xf32> to vector<2x32xf32>
    %309 = math.tanh %308 : vector<2x32xf32>
    %310 = vector.extract_strided_slice %307 {offsets = [0, 0], sizes = [2, 32], strides = [1, 1]} : vector<2x96xf32> to vector<2x32xf32>
    %311 = vector.extract_strided_slice %307 {offsets = [0, 32], sizes = [2, 32], strides = [1, 1]} : vector<2x96xf32> to vector<2x32xf32>
    %312 = vector.extract_strided_slice %307 {offsets = [0, 64], sizes = [2, 32], strides = [1, 1]} : vector<2x96xf32> to vector<2x32xf32>
    %313 = arith.mulf %311, %292 : vector<2x32xf32>
    %314 = arith.mulf %310, %309 : vector<2x32xf32>
    %315 = arith.addf %313, %314 : vector<2x32xf32>
    %316 = math.tanh %315 : vector<2x32xf32>
    %317 = arith.mulf %312, %316 : vector<2x32xf32>
    %c0_77 = arith.constant 0 : index
    %c4_78 = arith.constant 4 : index
    %c0_79 = arith.constant 0 : index
    %318 = vector.load %arg23[%c0_77, %c4_78, %c0_79] : memref<2x8x32xf32, #tpu.memory_space<vmem>>, vector<2x1x32xf32>
    %319 = vector.shape_cast %318 : vector<2x1x32xf32> to vector<2x32xf32>
    %320 = vector.shape_cast %317 : vector<2x32xf32> to vector<2x1x32xf32>
    tpu.vector_store %arg23[%c0_77, %c4_78, %c0_79], %320 {strides = array<i32>} : memref<2x8x32xf32, #tpu.memory_space<vmem>>, vector<2x1x32xf32>,
    %321 = vector.extract_strided_slice %203 {offsets = [0, 5, 0], sizes = [2, 1, 128], strides = [1, 1, 1]} : vector<2x8x128xf32> to vector<2x1x128xf32>
    %322 = vector.shape_cast %321 : vector<2x1x128xf32> to vector<2x128xf32>
    %cst_80 = arith.constant dense<0.000000e+00> : vector<2x128xf32>
    %323 = tpu.matmul %317, %197, %cst_80 {dimension_numbers = #tpu.dot_dimension_numbers<[1], [0], [0], [1], [0, 0, 1, 1], [], []>} : vector<2x32xf32>, vector<32x128xf32>, vector<2x128xf32> -> vector<2x128xf32>
    %324 = arith.addf %322, %323 : vector<2x128xf32>
    %325 = vector.extract_strided_slice %324 {offsets = [0, 0], sizes = [2, 96], strides = [1, 1]} : vector<2x128xf32> to vector<2x96xf32>
    %326 = arith.negf %325 : vector<2x96xf32>
    %327 = math.exp %326 : vector<2x96xf32>
    %cst_81 = arith.constant 1.000000e+00 : f32
    %328 = vector.broadcast %cst_81 : f32 to vector<2x96xf32>
    %329 = arith.addf %328, %327 : vector<2x96xf32>
    %330 = arith.divf %328, %329 : vector<2x96xf32>
    %331 = vector.extract_strided_slice %324 {offsets = [0, 96], sizes = [2, 32], strides = [1, 1]} : vector<2x128xf32> to vector<2x32xf32>
    %332 = math.tanh %331 : vector<2x32xf32>
    %333 = vector.extract_strided_slice %330 {offsets = [0, 0], sizes = [2, 32], strides = [1, 1]} : vector<2x96xf32> to vector<2x32xf32>
    %334 = vector.extract_strided_slice %330 {offsets = [0, 32], sizes = [2, 32], strides = [1, 1]} : vector<2x96xf32> to vector<2x32xf32>
    %335 = vector.extract_strided_slice %330 {offsets = [0, 64], sizes = [2, 32], strides = [1, 1]} : vector<2x96xf32> to vector<2x32xf32>
    %336 = arith.mulf %334, %315 : vector<2x32xf32>
    %337 = arith.mulf %333, %332 : vector<2x32xf32>
    %338 = arith.addf %336, %337 : vector<2x32xf32>
    %339 = math.tanh %338 : vector<2x32xf32>
    %340 = arith.mulf %335, %339 : vector<2x32xf32>
    %c0_82 = arith.constant 0 : index
    %c5_83 = arith.constant 5 : index
    %c0_84 = arith.constant 0 : index
    %341 = vector.load %arg23[%c0_82, %c5_83, %c0_84] : memref<2x8x32xf32, #tpu.memory_space<vmem>>, vector<2x1x32xf32>
    %342 = vector.shape_cast %341 : vector<2x1x32xf32> to vector<2x32xf32>
    %343 = vector.shape_cast %340 : vector<2x32xf32> to vector<2x1x32xf32>
    tpu.vector_store %arg23[%c0_82, %c5_83, %c0_84], %343 {strides = array<i32>} : memref<2x8x32xf32, #tpu.memory_space<vmem>>, vector<2x1x32xf32>,
    %344 = vector.extract_strided_slice %203 {offsets = [0, 6, 0], sizes = [2, 1, 128], strides = [1, 1, 1]} : vector<2x8x128xf32> to vector<2x1x128xf32>
    %345 = vector.shape_cast %344 : vector<2x1x128xf32> to vector<2x128xf32>
    %cst_85 = arith.constant dense<0.000000e+00> : vector<2x128xf32>
    %346 = tpu.matmul %340, %197, %cst_85 {dimension_numbers = #tpu.dot_dimension_numbers<[1], [0], [0], [1], [0, 0, 1, 1], [], []>} : vector<2x32xf32>, vector<32x128xf32>, vector<2x128xf32> -> vector<2x128xf32>
    %347 = arith.addf %345, %346 : vector<2x128xf32>
    %348 = vector.extract_strided_slice %347 {offsets = [0, 0], sizes = [2, 96], strides = [1, 1]} : vector<2x128xf32> to vector<2x96xf32>
    %349 = arith.negf %348 : vector<2x96xf32>
    %350 = math.exp %349 : vector<2x96xf32>
    %cst_86 = arith.constant 1.000000e+00 : f32
    %351 = vector.broadcast %cst_86 : f32 to vector<2x96xf32>
    %352 = arith.addf %351, %350 : vector<2x96xf32>
    %353 = arith.divf %351, %352 : vector<2x96xf32>
    %354 = vector.extract_strided_slice %347 {offsets = [0, 96], sizes = [2, 32], strides = [1, 1]} : vector<2x128xf32> to vector<2x32xf32>
    %355 = math.tanh %354 : vector<2x32xf32>
    %356 = vector.extract_strided_slice %353 {offsets = [0, 0], sizes = [2, 32], strides = [1, 1]} : vector<2x96xf32> to vector<2x32xf32>
    %357 = vector.extract_strided_slice %353 {offsets = [0, 32], sizes = [2, 32], strides = [1, 1]} : vector<2x96xf32> to vector<2x32xf32>
    %358 = vector.extract_strided_slice %353 {offsets = [0, 64], sizes = [2, 32], strides = [1, 1]} : vector<2x96xf32> to vector<2x32xf32>
    %359 = arith.mulf %357, %338 : vector<2x32xf32>
    %360 = arith.mulf %356, %355 : vector<2x32xf32>
    %361 = arith.addf %359, %360 : vector<2x32xf32>
    %362 = math.tanh %361 : vector<2x32xf32>
    %363 = arith.mulf %358, %362 : vector<2x32xf32>
    %c0_87 = arith.constant 0 : index
    %c6_88 = arith.constant 6 : index
    %c0_89 = arith.constant 0 : index
    %364 = vector.load %arg23[%c0_87, %c6_88, %c0_89] : memref<2x8x32xf32, #tpu.memory_space<vmem>>, vector<2x1x32xf32>
    %365 = vector.shape_cast %364 : vector<2x1x32xf32> to vector<2x32xf32>
    %366 = vector.shape_cast %363 : vector<2x32xf32> to vector<2x1x32xf32>
    tpu.vector_store %arg23[%c0_87, %c6_88, %c0_89], %366 {strides = array<i32>} : memref<2x8x32xf32, #tpu.memory_space<vmem>>, vector<2x1x32xf32>,
    %367 = vector.extract_strided_slice %203 {offsets = [0, 7, 0], sizes = [2, 1, 128], strides = [1, 1, 1]} : vector<2x8x128xf32> to vector<2x1x128xf32>
    %368 = vector.shape_cast %367 : vector<2x1x128xf32> to vector<2x128xf32>
    %cst_90 = arith.constant dense<0.000000e+00> : vector<2x128xf32>
    %369 = tpu.matmul %363, %197, %cst_90 {dimension_numbers = #tpu.dot_dimension_numbers<[1], [0], [0], [1], [0, 0, 1, 1], [], []>} : vector<2x32xf32>, vector<32x128xf32>, vector<2x128xf32> -> vector<2x128xf32>
    %370 = arith.addf %368, %369 : vector<2x128xf32>
    %371 = vector.extract_strided_slice %370 {offsets = [0, 0], sizes = [2, 96], strides = [1, 1]} : vector<2x128xf32> to vector<2x96xf32>
    %372 = arith.negf %371 : vector<2x96xf32>
    %373 = math.exp %372 : vector<2x96xf32>
    %cst_91 = arith.constant 1.000000e+00 : f32
    %374 = vector.broadcast %cst_91 : f32 to vector<2x96xf32>
    %375 = arith.addf %374, %373 : vector<2x96xf32>
    %376 = arith.divf %374, %375 : vector<2x96xf32>
    %377 = vector.extract_strided_slice %370 {offsets = [0, 96], sizes = [2, 32], strides = [1, 1]} : vector<2x128xf32> to vector<2x32xf32>
    %378 = math.tanh %377 : vector<2x32xf32>
    %379 = vector.extract_strided_slice %376 {offsets = [0, 0], sizes = [2, 32], strides = [1, 1]} : vector<2x96xf32> to vector<2x32xf32>
    %380 = vector.extract_strided_slice %376 {offsets = [0, 32], sizes = [2, 32], strides = [1, 1]} : vector<2x96xf32> to vector<2x32xf32>
    %381 = vector.extract_strided_slice %376 {offsets = [0, 64], sizes = [2, 32], strides = [1, 1]} : vector<2x96xf32> to vector<2x32xf32>
    %382 = arith.mulf %380, %361 : vector<2x32xf32>
    %383 = arith.mulf %379, %378 : vector<2x32xf32>
    %384 = arith.addf %382, %383 : vector<2x32xf32>
    %385 = math.tanh %384 : vector<2x32xf32>
    %386 = arith.mulf %381, %385 : vector<2x32xf32>
    %c0_92 = arith.constant 0 : index
    %c7_93 = arith.constant 7 : index
    %c0_94 = arith.constant 0 : index
    %387 = vector.load %arg23[%c0_92, %c7_93, %c0_94] : memref<2x8x32xf32, #tpu.memory_space<vmem>>, vector<2x1x32xf32>
    %388 = vector.shape_cast %387 : vector<2x1x32xf32> to vector<2x32xf32>
    %389 = vector.shape_cast %386 : vector<2x32xf32> to vector<2x1x32xf32>
    tpu.vector_store %arg23[%c0_92, %c7_93, %c0_94], %389 {strides = array<i32>} : memref<2x8x32xf32, #tpu.memory_space<vmem>>, vector<2x1x32xf32>,
    %c0_95 = arith.constant 0 : index
    %c0_96 = arith.constant 0 : index
    %c0_97 = arith.constant 0 : index
    %390 = vector.load %arg23[%c0_95, %c0_96, %c0_97] : memref<2x8x32xf32, #tpu.memory_space<vmem>>, vector<2x8x32xf32>
    %391 = vector.shape_cast %390 : vector<2x8x32xf32> to vector<16x32xf32>
    %c0_98 = arith.constant 0 : index
    %c0_99 = arith.constant 0 : index
    %c0_100 = arith.constant 0 : index
    %392 = vector.load %arg8[%c0_98, %c0_99, %c0_100] : memref<2x32x96xf32, #tpu.memory_space<vmem>>, vector<1x32x96xf32>
    %393 = vector.shape_cast %392 : vector<1x32x96xf32> to vector<32x96xf32>
    %cst_101 = arith.constant dense<0.000000e+00> : vector<16x96xf32>
    %394 = tpu.matmul %391, %393, %cst_101 {dimension_numbers = #tpu.dot_dimension_numbers<[1], [0], [0], [1], [0, 0, 1, 1], [], []>} : vector<16x32xf32>, vector<32x96xf32>, vector<16x96xf32> -> vector<16x96xf32>
    %c0_102 = arith.constant 0 : index
    %c0_103 = arith.constant 0 : index
    %c0_104 = arith.constant 0 : index
    %395 = vector.load %arg9[%c0_102, %c0_103, %c0_104] : memref<2x1x96xf32, #tpu.memory_space<vmem>>, vector<1x1x96xf32>
    %396 = vector.shape_cast %395 : vector<1x1x96xf32> to vector<1x96xf32>
    %397 = vector.broadcast %396 : vector<1x96xf32> to vector<16x96xf32>
    %398 = arith.addf %394, %397 : vector<16x96xf32>
    %399 = vector.extract_strided_slice %398 {offsets = [0, 0], sizes = [16, 32], strides = [1, 1]} : vector<16x96xf32> to vector<16x32xf32>
    %400 = vector.shape_cast %399 : vector<16x32xf32> to vector<2x8x32xf32>
    %401 = vector.extract_strided_slice %398 {offsets = [0, 32], sizes = [16, 32], strides = [1, 1]} : vector<16x96xf32> to vector<16x32xf32>
    %402 = vector.shape_cast %401 : vector<16x32xf32> to vector<2x8x32xf32>
    %403 = vector.extract_strided_slice %398 {offsets = [0, 64], sizes = [16, 32], strides = [1, 1]} : vector<16x96xf32> to vector<16x32xf32>
    %404 = vector.shape_cast %403 : vector<16x32xf32> to vector<2x8x32xf32>
    %c0_105 = arith.constant 0 : index
    %c0_106 = arith.constant 0 : index
    %c0_107 = arith.constant 0 : index
    %405 = vector.load %arg10[%c0_105, %c0_106, %c0_107] : memref<2x32x32xf32, #tpu.memory_space<vmem>>, vector<1x32x32xf32>
    %406 = vector.shape_cast %405 : vector<1x32x32xf32> to vector<32x32xf32>
    %407 = vector.extract_strided_slice %400 {offsets = [0, 0, 0], sizes = [2, 8, 8], strides = [1, 1, 1]} : vector<2x8x32xf32> to vector<2x8x8xf32>
    %408 = vector.extract_strided_slice %402 {offsets = [0, 0, 0], sizes = [2, 8, 8], strides = [1, 1, 1]} : vector<2x8x32xf32> to vector<2x8x8xf32>
    %409 = vector.extract_strided_slice %404 {offsets = [0, 0, 0], sizes = [2, 8, 8], strides = [1, 1, 1]} : vector<2x8x32xf32> to vector<2x8x8xf32>
    "tpu.trace_start"() <{level = 10 : i32, message = "btd,bsd->bts"}> : () -> ()
    %cst_108 = arith.constant dense<0.000000e+00> : vector<2x8x8xf32>
    %410 = tpu.matmul %407, %408, %cst_108 {dimension_numbers = #tpu.dot_dimension_numbers<[2], [2], [1], [1], [0, 0, 0, 1, 1, 1], [0], [0]>} : vector<2x8x8xf32>, vector<2x8x8xf32>, vector<2x8x8xf32> -> vector<2x8x8xf32>
    "tpu.trace_stop"() : () -> ()
    %cst_109 = arith.constant 0.353553385 : f32
    %411 = vector.broadcast %cst_109 : f32 to vector<2x8x8xf32>
    %412 = arith.mulf %410, %411 : vector<2x8x8xf32>
    %cst_110 = arith.constant dense<0xFF800000> : vector<2x8xf32>
    %413 = vector.multi_reduction <maximumf>, %412, %cst_110 [2] : vector<2x8x8xf32> to vector<2x8xf32>
    %414 = vector.shape_cast %413 : vector<2x8xf32> to vector<2x8x1xf32>
    %415 = vector.broadcast %414 : vector<2x8x1xf32> to vector<2x8x8xf32>
    %416 = arith.subf %412, %415 : vector<2x8x8xf32>
    %417 = math.exp %416 : vector<2x8x8xf32>
    %cst_111 = arith.constant dense<0.000000e+00> : vector<2x8xf32>
    %418 = vector.multi_reduction <add>, %417, %cst_111 [2] : vector<2x8x8xf32> to vector<2x8xf32>
    %419 = vector.shape_cast %418 : vector<2x8xf32> to vector<2x8x1xf32>
    %420 = vector.broadcast %419 : vector<2x8x1xf32> to vector<2x8x8xf32>
    %421 = arith.divf %417, %420 : vector<2x8x8xf32>
    "tpu.trace_start"() <{level = 10 : i32, message = "bts,bsd->btd"}> : () -> ()
    %cst_112 = arith.constant dense<0.000000e+00> : vector<2x8x8xf32>
    %422 = tpu.matmul %421, %409, %cst_112 {dimension_numbers = #tpu.dot_dimension_numbers<[2], [1], [1], [2], [0, 0, 0, 1, 1, 2], [0], [0]>} : vector<2x8x8xf32>, vector<2x8x8xf32>, vector<2x8x8xf32> -> vector<2x8x8xf32>
    "tpu.trace_stop"() : () -> ()
    %423 = vector.shape_cast %422 : vector<2x8x8xf32> to vector<16x8xf32>
    %424 = vector.extract_strided_slice %406 {offsets = [0, 0], sizes = [8, 32], strides = [1, 1]} : vector<32x32xf32> to vector<8x32xf32>
    %cst_113 = arith.constant dense<0.000000e+00> : vector<16x32xf32>
    %425 = tpu.matmul %423, %424, %cst_113 {dimension_numbers = #tpu.dot_dimension_numbers<[1], [0], [0], [1], [0, 0, 1, 1], [], []>} : vector<16x8xf32>, vector<8x32xf32>, vector<16x32xf32> -> vector<16x32xf32>
    %426 = vector.extract_strided_slice %400 {offsets = [0, 0, 8], sizes = [2, 8, 8], strides = [1, 1, 1]} : vector<2x8x32xf32> to vector<2x8x8xf32>
    %427 = vector.extract_strided_slice %402 {offsets = [0, 0, 8], sizes = [2, 8, 8], strides = [1, 1, 1]} : vector<2x8x32xf32> to vector<2x8x8xf32>
    %428 = vector.extract_strided_slice %404 {offsets = [0, 0, 8], sizes = [2, 8, 8], strides = [1, 1, 1]} : vector<2x8x32xf32> to vector<2x8x8xf32>
    "tpu.trace_start"() <{level = 10 : i32, message = "btd,bsd->bts"}> : () -> ()
    %cst_114 = arith.constant dense<0.000000e+00> : vector<2x8x8xf32>
    %429 = tpu.matmul %426, %427, %cst_114 {dimension_numbers = #tpu.dot_dimension_numbers<[2], [2], [1], [1], [0, 0, 0, 1, 1, 1], [0], [0]>} : vector<2x8x8xf32>, vector<2x8x8xf32>, vector<2x8x8xf32> -> vector<2x8x8xf32>
    "tpu.trace_stop"() : () -> ()
    %cst_115 = arith.constant 0.353553385 : f32
    %430 = vector.broadcast %cst_115 : f32 to vector<2x8x8xf32>
    %431 = arith.mulf %429, %430 : vector<2x8x8xf32>
    %cst_116 = arith.constant dense<0xFF800000> : vector<2x8xf32>
    %432 = vector.multi_reduction <maximumf>, %431, %cst_116 [2] : vector<2x8x8xf32> to vector<2x8xf32>
    %433 = vector.shape_cast %432 : vector<2x8xf32> to vector<2x8x1xf32>
    %434 = vector.broadcast %433 : vector<2x8x1xf32> to vector<2x8x8xf32>
    %435 = arith.subf %431, %434 : vector<2x8x8xf32>
    %436 = math.exp %435 : vector<2x8x8xf32>
    %cst_117 = arith.constant dense<0.000000e+00> : vector<2x8xf32>
    %437 = vector.multi_reduction <add>, %436, %cst_117 [2] : vector<2x8x8xf32> to vector<2x8xf32>
    %438 = vector.shape_cast %437 : vector<2x8xf32> to vector<2x8x1xf32>
    %439 = vector.broadcast %438 : vector<2x8x1xf32> to vector<2x8x8xf32>
    %440 = arith.divf %436, %439 : vector<2x8x8xf32>
    "tpu.trace_start"() <{level = 10 : i32, message = "bts,bsd->btd"}> : () -> ()
    %cst_118 = arith.constant dense<0.000000e+00> : vector<2x8x8xf32>
    %441 = tpu.matmul %440, %428, %cst_118 {dimension_numbers = #tpu.dot_dimension_numbers<[2], [1], [1], [2], [0, 0, 0, 1, 1, 2], [0], [0]>} : vector<2x8x8xf32>, vector<2x8x8xf32>, vector<2x8x8xf32> -> vector<2x8x8xf32>
    "tpu.trace_stop"() : () -> ()
    %442 = vector.shape_cast %441 : vector<2x8x8xf32> to vector<16x8xf32>
    %443 = vector.extract_strided_slice %406 {offsets = [8, 0], sizes = [8, 32], strides = [1, 1]} : vector<32x32xf32> to vector<8x32xf32>
    %cst_119 = arith.constant dense<0.000000e+00> : vector<16x32xf32>
    %444 = tpu.matmul %442, %443, %cst_119 {dimension_numbers = #tpu.dot_dimension_numbers<[1], [0], [0], [1], [0, 0, 1, 1], [], []>} : vector<16x8xf32>, vector<8x32xf32>, vector<16x32xf32> -> vector<16x32xf32>
    %445 = arith.addf %425, %444 : vector<16x32xf32>
    %446 = vector.extract_strided_slice %400 {offsets = [0, 0, 16], sizes = [2, 8, 8], strides = [1, 1, 1]} : vector<2x8x32xf32> to vector<2x8x8xf32>
    %447 = vector.extract_strided_slice %402 {offsets = [0, 0, 16], sizes = [2, 8, 8], strides = [1, 1, 1]} : vector<2x8x32xf32> to vector<2x8x8xf32>
    %448 = vector.extract_strided_slice %404 {offsets = [0, 0, 16], sizes = [2, 8, 8], strides = [1, 1, 1]} : vector<2x8x32xf32> to vector<2x8x8xf32>
    "tpu.trace_start"() <{level = 10 : i32, message = "btd,bsd->bts"}> : () -> ()
    %cst_120 = arith.constant dense<0.000000e+00> : vector<2x8x8xf32>
    %449 = tpu.matmul %446, %447, %cst_120 {dimension_numbers = #tpu.dot_dimension_numbers<[2], [2], [1], [1], [0, 0, 0, 1, 1, 1], [0], [0]>} : vector<2x8x8xf32>, vector<2x8x8xf32>, vector<2x8x8xf32> -> vector<2x8x8xf32>
    "tpu.trace_stop"() : () -> ()
    %cst_121 = arith.constant 0.353553385 : f32
    %450 = vector.broadcast %cst_121 : f32 to vector<2x8x8xf32>
    %451 = arith.mulf %449, %450 : vector<2x8x8xf32>
    %cst_122 = arith.constant dense<0xFF800000> : vector<2x8xf32>
    %452 = vector.multi_reduction <maximumf>, %451, %cst_122 [2] : vector<2x8x8xf32> to vector<2x8xf32>
    %453 = vector.shape_cast %452 : vector<2x8xf32> to vector<2x8x1xf32>
    %454 = vector.broadcast %453 : vector<2x8x1xf32> to vector<2x8x8xf32>
    %455 = arith.subf %451, %454 : vector<2x8x8xf32>
    %456 = math.exp %455 : vector<2x8x8xf32>
    %cst_123 = arith.constant dense<0.000000e+00> : vector<2x8xf32>
    %457 = vector.multi_reduction <add>, %456, %cst_123 [2] : vector<2x8x8xf32> to vector<2x8xf32>
    %458 = vector.shape_cast %457 : vector<2x8xf32> to vector<2x8x1xf32>
    %459 = vector.broadcast %458 : vector<2x8x1xf32> to vector<2x8x8xf32>
    %460 = arith.divf %456, %459 : vector<2x8x8xf32>
    "tpu.trace_start"() <{level = 10 : i32, message = "bts,bsd->btd"}> : () -> ()
    %cst_124 = arith.constant dense<0.000000e+00> : vector<2x8x8xf32>
    %461 = tpu.matmul %460, %448, %cst_124 {dimension_numbers = #tpu.dot_dimension_numbers<[2], [1], [1], [2], [0, 0, 0, 1, 1, 2], [0], [0]>} : vector<2x8x8xf32>, vector<2x8x8xf32>, vector<2x8x8xf32> -> vector<2x8x8xf32>
    "tpu.trace_stop"() : () -> ()
    %462 = vector.shape_cast %461 : vector<2x8x8xf32> to vector<16x8xf32>
    %463 = vector.extract_strided_slice %406 {offsets = [16, 0], sizes = [8, 32], strides = [1, 1]} : vector<32x32xf32> to vector<8x32xf32>
    %cst_125 = arith.constant dense<0.000000e+00> : vector<16x32xf32>
    %464 = tpu.matmul %462, %463, %cst_125 {dimension_numbers = #tpu.dot_dimension_numbers<[1], [0], [0], [1], [0, 0, 1, 1], [], []>} : vector<16x8xf32>, vector<8x32xf32>, vector<16x32xf32> -> vector<16x32xf32>
    %465 = arith.addf %445, %464 : vector<16x32xf32>
    %466 = vector.extract_strided_slice %400 {offsets = [0, 0, 24], sizes = [2, 8, 8], strides = [1, 1, 1]} : vector<2x8x32xf32> to vector<2x8x8xf32>
    %467 = vector.extract_strided_slice %402 {offsets = [0, 0, 24], sizes = [2, 8, 8], strides = [1, 1, 1]} : vector<2x8x32xf32> to vector<2x8x8xf32>
    %468 = vector.extract_strided_slice %404 {offsets = [0, 0, 24], sizes = [2, 8, 8], strides = [1, 1, 1]} : vector<2x8x32xf32> to vector<2x8x8xf32>
    "tpu.trace_start"() <{level = 10 : i32, message = "btd,bsd->bts"}> : () -> ()
    %cst_126 = arith.constant dense<0.000000e+00> : vector<2x8x8xf32>
    %469 = tpu.matmul %466, %467, %cst_126 {dimension_numbers = #tpu.dot_dimension_numbers<[2], [2], [1], [1], [0, 0, 0, 1, 1, 1], [0], [0]>} : vector<2x8x8xf32>, vector<2x8x8xf32>, vector<2x8x8xf32> -> vector<2x8x8xf32>
    "tpu.trace_stop"() : () -> ()
    %cst_127 = arith.constant 0.353553385 : f32
    %470 = vector.broadcast %cst_127 : f32 to vector<2x8x8xf32>
    %471 = arith.mulf %469, %470 : vector<2x8x8xf32>
    %cst_128 = arith.constant dense<0xFF800000> : vector<2x8xf32>
    %472 = vector.multi_reduction <maximumf>, %471, %cst_128 [2] : vector<2x8x8xf32> to vector<2x8xf32>
    %473 = vector.shape_cast %472 : vector<2x8xf32> to vector<2x8x1xf32>
    %474 = vector.broadcast %473 : vector<2x8x1xf32> to vector<2x8x8xf32>
    %475 = arith.subf %471, %474 : vector<2x8x8xf32>
    %476 = math.exp %475 : vector<2x8x8xf32>
    %cst_129 = arith.constant dense<0.000000e+00> : vector<2x8xf32>
    %477 = vector.multi_reduction <add>, %476, %cst_129 [2] : vector<2x8x8xf32> to vector<2x8xf32>
    %478 = vector.shape_cast %477 : vector<2x8xf32> to vector<2x8x1xf32>
    %479 = vector.broadcast %478 : vector<2x8x1xf32> to vector<2x8x8xf32>
    %480 = arith.divf %476, %479 : vector<2x8x8xf32>
    "tpu.trace_start"() <{level = 10 : i32, message = "bts,bsd->btd"}> : () -> ()
    %cst_130 = arith.constant dense<0.000000e+00> : vector<2x8x8xf32>
    %481 = tpu.matmul %480, %468, %cst_130 {dimension_numbers = #tpu.dot_dimension_numbers<[2], [1], [1], [2], [0, 0, 0, 1, 1, 2], [0], [0]>} : vector<2x8x8xf32>, vector<2x8x8xf32>, vector<2x8x8xf32> -> vector<2x8x8xf32>
    "tpu.trace_stop"() : () -> ()
    %482 = vector.shape_cast %481 : vector<2x8x8xf32> to vector<16x8xf32>
    %483 = vector.extract_strided_slice %406 {offsets = [24, 0], sizes = [8, 32], strides = [1, 1]} : vector<32x32xf32> to vector<8x32xf32>
    %cst_131 = arith.constant dense<0.000000e+00> : vector<16x32xf32>
    %484 = tpu.matmul %482, %483, %cst_131 {dimension_numbers = #tpu.dot_dimension_numbers<[1], [0], [0], [1], [0, 0, 1, 1], [], []>} : vector<16x8xf32>, vector<8x32xf32>, vector<16x32xf32> -> vector<16x32xf32>
    %485 = arith.addf %465, %484 : vector<16x32xf32>
    %c0_132 = arith.constant 0 : index
    %c0_133 = arith.constant 0 : index
    %c0_134 = arith.constant 0 : index
    %486 = vector.load %arg11[%c0_132, %c0_133, %c0_134] : memref<2x1x32xf32, #tpu.memory_space<vmem>>, vector<1x1x32xf32>
    %487 = vector.shape_cast %486 : vector<1x1x32xf32> to vector<1x32xf32>
    %488 = vector.broadcast %487 : vector<1x32xf32> to vector<16x32xf32>
    %489 = arith.addf %485, %488 : vector<16x32xf32>
    %490 = arith.addf %391, %489 : vector<16x32xf32>
    %c0_135 = arith.constant 0 : index
    %c0_136 = arith.constant 0 : index
    %c0_137 = arith.constant 0 : index
    %491 = vector.load %arg16[%c0_135, %c0_136, %c0_137] : memref<2x1x32xf32, #tpu.memory_space<vmem>>, vector<1x1x32xf32>
    %492 = vector.shape_cast %491 : vector<1x1x32xf32> to vector<1x32xf32>
    %c0_138 = arith.constant 0 : index
    %c0_139 = arith.constant 0 : index
    %c0_140 = arith.constant 0 : index
    %493 = vector.load %arg17[%c0_138, %c0_139, %c0_140] : memref<2x1x32xf32, #tpu.memory_space<vmem>>, vector<1x1x32xf32>
    %494 = vector.shape_cast %493 : vector<1x1x32xf32> to vector<1x32xf32>
    %cst_141 = arith.constant dense<0.000000e+00> : vector<16xf32>
    %495 = vector.multi_reduction <add>, %490, %cst_141 [1] : vector<16x32xf32> to vector<16xf32>
    %496 = vector.shape_cast %495 : vector<16xf32> to vector<16x1xf32>
    %cst_142 = arith.constant 3.200000e+01 : f32
    %497 = vector.broadcast %cst_142 : f32 to vector<16x1xf32>
    %498 = arith.divf %496, %497 : vector<16x1xf32>
    %499 = vector.broadcast %498 : vector<16x1xf32> to vector<16x32xf32>
    %500 = arith.subf %490, %499 : vector<16x32xf32>
    %501 = arith.mulf %500, %500 : vector<16x32xf32>
    %cst_143 = arith.constant dense<0.000000e+00> : vector<16xf32>
    %502 = vector.multi_reduction <add>, %501, %cst_143 [1] : vector<16x32xf32> to vector<16xf32>
    %503 = vector.shape_cast %502 : vector<16xf32> to vector<16x1xf32>
    %cst_144 = arith.constant 3.200000e+01 : f32
    %504 = vector.broadcast %cst_144 : f32 to vector<16x1xf32>
    %505 = arith.divf %503, %504 : vector<16x1xf32>
    %cst_145 = arith.constant 9.99999974E-6 : f32
    %506 = vector.broadcast %cst_145 : f32 to vector<16x1xf32>
    %507 = arith.addf %505, %506 : vector<16x1xf32>
    %508 = math.rsqrt %507 : vector<16x1xf32>
    %509 = vector.broadcast %508 : vector<16x1xf32> to vector<16x32xf32>
    %510 = arith.mulf %500, %509 : vector<16x32xf32>
    %511 = vector.broadcast %492 : vector<1x32xf32> to vector<16x32xf32>
    %512 = arith.mulf %510, %511 : vector<16x32xf32>
    %513 = vector.broadcast %494 : vector<1x32xf32> to vector<16x32xf32>
    %514 = arith.addf %512, %513 : vector<16x32xf32>
    %c0_146 = arith.constant 0 : index
    %c0_147 = arith.constant 0 : index
    %c0_148 = arith.constant 0 : index
    %515 = vector.load %arg12[%c0_146, %c0_147, %c0_148] : memref<2x32x64xf32, #tpu.memory_space<vmem>>, vector<1x32x64xf32>
    %516 = vector.shape_cast %515 : vector<1x32x64xf32> to vector<32x64xf32>
    %cst_149 = arith.constant dense<0.000000e+00> : vector<16x64xf32>
    %517 = tpu.matmul %514, %516, %cst_149 {dimension_numbers = #tpu.dot_dimension_numbers<[1], [0], [0], [1], [0, 0, 1, 1], [], []>} : vector<16x32xf32>, vector<32x64xf32>, vector<16x64xf32> -> vector<16x64xf32>
    %c0_150 = arith.constant 0 : index
    %c0_151 = arith.constant 0 : index
    %c0_152 = arith.constant 0 : index
    %518 = vector.load %arg13[%c0_150, %c0_151, %c0_152] : memref<2x1x64xf32, #tpu.memory_space<vmem>>, vector<1x1x64xf32>
    %519 = vector.shape_cast %518 : vector<1x1x64xf32> to vector<1x64xf32>
    %520 = vector.broadcast %519 : vector<1x64xf32> to vector<16x64xf32>
    %521 = arith.addf %517, %520 : vector<16x64xf32>
    %cst_153 = arith.constant 0.000000e+00 : f32
    %522 = vector.broadcast %cst_153 : f32 to vector<16x64xf32>
    %523 = arith.maximumf %521, %522 : vector<16x64xf32>
    %c0_154 = arith.constant 0 : index
    %c0_155 = arith.constant 0 : index
    %c0_156 = arith.constant 0 : index
    %524 = vector.load %arg14[%c0_154, %c0_155, %c0_156] : memref<2x64x32xf32, #tpu.memory_space<vmem>>, vector<1x64x32xf32>
    %525 = vector.shape_cast %524 : vector<1x64x32xf32> to vector<64x32xf32>
    %cst_157 = arith.constant dense<0.000000e+00> : vector<16x32xf32>
    %526 = tpu.matmul %523, %525, %cst_157 {dimension_numbers = #tpu.dot_dimension_numbers<[1], [0], [0], [1], [0, 0, 1, 1], [], []>} : vector<16x64xf32>, vector<64x32xf32>, vector<16x32xf32> -> vector<16x32xf32>
    %c0_158 = arith.constant 0 : index
    %c0_159 = arith.constant 0 : index
    %c0_160 = arith.constant 0 : index
    %527 = vector.load %arg15[%c0_158, %c0_159, %c0_160] : memref<2x1x32xf32, #tpu.memory_space<vmem>>, vector<1x1x32xf32>
    %528 = vector.shape_cast %527 : vector<1x1x32xf32> to vector<1x32xf32>
    %529 = vector.broadcast %528 : vector<1x32xf32> to vector<16x32xf32>
    %530 = arith.addf %526, %529 : vector<16x32xf32>
    %531 = arith.addf %514, %530 : vector<16x32xf32>
    %c0_161 = arith.constant 0 : index
    %c0_162 = arith.constant 0 : index
    %c0_163 = arith.constant 0 : index
    %532 = vector.load %arg18[%c0_161, %c0_162, %c0_163] : memref<2x1x32xf32, #tpu.memory_space<vmem>>, vector<1x1x32xf32>
    %533 = vector.shape_cast %532 : vector<1x1x32xf32> to vector<1x32xf32>
    %c0_164 = arith.constant 0 : index
    %c0_165 = arith.constant 0 : index
    %c0_166 = arith.constant 0 : index
    %534 = vector.load %arg19[%c0_164, %c0_165, %c0_166] : memref<2x1x32xf32, #tpu.memory_space<vmem>>, vector<1x1x32xf32>
    %535 = vector.shape_cast %534 : vector<1x1x32xf32> to vector<1x32xf32>
    %cst_167 = arith.constant dense<0.000000e+00> : vector<16xf32>
    %536 = vector.multi_reduction <add>, %531, %cst_167 [1] : vector<16x32xf32> to vector<16xf32>
    %537 = vector.shape_cast %536 : vector<16xf32> to vector<16x1xf32>
    %cst_168 = arith.constant 3.200000e+01 : f32
    %538 = vector.broadcast %cst_168 : f32 to vector<16x1xf32>
    %539 = arith.divf %537, %538 : vector<16x1xf32>
    %540 = vector.broadcast %539 : vector<16x1xf32> to vector<16x32xf32>
    %541 = arith.subf %531, %540 : vector<16x32xf32>
    %542 = arith.mulf %541, %541 : vector<16x32xf32>
    %cst_169 = arith.constant dense<0.000000e+00> : vector<16xf32>
    %543 = vector.multi_reduction <add>, %542, %cst_169 [1] : vector<16x32xf32> to vector<16xf32>
    %544 = vector.shape_cast %543 : vector<16xf32> to vector<16x1xf32>
    %cst_170 = arith.constant 3.200000e+01 : f32
    %545 = vector.broadcast %cst_170 : f32 to vector<16x1xf32>
    %546 = arith.divf %544, %545 : vector<16x1xf32>
    %cst_171 = arith.constant 9.99999974E-6 : f32
    %547 = vector.broadcast %cst_171 : f32 to vector<16x1xf32>
    %548 = arith.addf %546, %547 : vector<16x1xf32>
    %549 = math.rsqrt %548 : vector<16x1xf32>
    %550 = vector.broadcast %549 : vector<16x1xf32> to vector<16x32xf32>
    %551 = arith.mulf %541, %550 : vector<16x32xf32>
    %552 = vector.broadcast %533 : vector<1x32xf32> to vector<16x32xf32>
    %553 = arith.mulf %551, %552 : vector<16x32xf32>
    %554 = vector.broadcast %535 : vector<1x32xf32> to vector<16x32xf32>
    %555 = arith.addf %553, %554 : vector<16x32xf32>
    %c1_172 = arith.constant 1 : index
    %c0_173 = arith.constant 0 : index
    %c0_174 = arith.constant 0 : index
    %556 = vector.load %arg8[%c1_172, %c0_173, %c0_174] : memref<2x32x96xf32, #tpu.memory_space<vmem>>, vector<1x32x96xf32>
    %557 = vector.shape_cast %556 : vector<1x32x96xf32> to vector<32x96xf32>
    %cst_175 = arith.constant dense<0.000000e+00> : vector<16x96xf32>
    %558 = tpu.matmul %555, %557, %cst_175 {dimension_numbers = #tpu.dot_dimension_numbers<[1], [0], [0], [1], [0, 0, 1, 1], [], []>} : vector<16x32xf32>, vector<32x96xf32>, vector<16x96xf32> -> vector<16x96xf32>
    %c1_176 = arith.constant 1 : index
    %c0_177 = arith.constant 0 : index
    %c0_178 = arith.constant 0 : index
    %559 = vector.load %arg9[%c1_176, %c0_177, %c0_178] : memref<2x1x96xf32, #tpu.memory_space<vmem>>, vector<1x1x96xf32>
    %560 = vector.shape_cast %559 : vector<1x1x96xf32> to vector<1x96xf32>
    %561 = vector.broadcast %560 : vector<1x96xf32> to vector<16x96xf32>
    %562 = arith.addf %558, %561 : vector<16x96xf32>
    %563 = vector.extract_strided_slice %562 {offsets = [0, 0], sizes = [16, 32], strides = [1, 1]} : vector<16x96xf32> to vector<16x32xf32>
    %564 = vector.shape_cast %563 : vector<16x32xf32> to vector<2x8x32xf32>
    %565 = vector.extract_strided_slice %562 {offsets = [0, 32], sizes = [16, 32], strides = [1, 1]} : vector<16x96xf32> to vector<16x32xf32>
    %566 = vector.shape_cast %565 : vector<16x32xf32> to vector<2x8x32xf32>
    %567 = vector.extract_strided_slice %562 {offsets = [0, 64], sizes = [16, 32], strides = [1, 1]} : vector<16x96xf32> to vector<16x32xf32>
    %568 = vector.shape_cast %567 : vector<16x32xf32> to vector<2x8x32xf32>
    %c1_179 = arith.constant 1 : index
    %c0_180 = arith.constant 0 : index
    %c0_181 = arith.constant 0 : index
    %569 = vector.load %arg10[%c1_179, %c0_180, %c0_181] : memref<2x32x32xf32, #tpu.memory_space<vmem>>, vector<1x32x32xf32>
    %570 = vector.shape_cast %569 : vector<1x32x32xf32> to vector<32x32xf32>
    %571 = vector.extract_strided_slice %564 {offsets = [0, 0, 0], sizes = [2, 8, 8], strides = [1, 1, 1]} : vector<2x8x32xf32> to vector<2x8x8xf32>
    %572 = vector.extract_strided_slice %566 {offsets = [0, 0, 0], sizes = [2, 8, 8], strides = [1, 1, 1]} : vector<2x8x32xf32> to vector<2x8x8xf32>
    %573 = vector.extract_strided_slice %568 {offsets = [0, 0, 0], sizes = [2, 8, 8], strides = [1, 1, 1]} : vector<2x8x32xf32> to vector<2x8x8xf32>
    "tpu.trace_start"() <{level = 10 : i32, message = "btd,bsd->bts"}> : () -> ()
    %cst_182 = arith.constant dense<0.000000e+00> : vector<2x8x8xf32>
    %574 = tpu.matmul %571, %572, %cst_182 {dimension_numbers = #tpu.dot_dimension_numbers<[2], [2], [1], [1], [0, 0, 0, 1, 1, 1], [0], [0]>} : vector<2x8x8xf32>, vector<2x8x8xf32>, vector<2x8x8xf32> -> vector<2x8x8xf32>
    "tpu.trace_stop"() : () -> ()
    %cst_183 = arith.constant 0.353553385 : f32
    %575 = vector.broadcast %cst_183 : f32 to vector<2x8x8xf32>
    %576 = arith.mulf %574, %575 : vector<2x8x8xf32>
    %cst_184 = arith.constant dense<0xFF800000> : vector<2x8xf32>
    %577 = vector.multi_reduction <maximumf>, %576, %cst_184 [2] : vector<2x8x8xf32> to vector<2x8xf32>
    %578 = vector.shape_cast %577 : vector<2x8xf32> to vector<2x8x1xf32>
    %579 = vector.broadcast %578 : vector<2x8x1xf32> to vector<2x8x8xf32>
    %580 = arith.subf %576, %579 : vector<2x8x8xf32>
    %581 = math.exp %580 : vector<2x8x8xf32>
    %cst_185 = arith.constant dense<0.000000e+00> : vector<2x8xf32>
    %582 = vector.multi_reduction <add>, %581, %cst_185 [2] : vector<2x8x8xf32> to vector<2x8xf32>
    %583 = vector.shape_cast %582 : vector<2x8xf32> to vector<2x8x1xf32>
    %584 = vector.broadcast %583 : vector<2x8x1xf32> to vector<2x8x8xf32>
    %585 = arith.divf %581, %584 : vector<2x8x8xf32>
    "tpu.trace_start"() <{level = 10 : i32, message = "bts,bsd->btd"}> : () -> ()
    %cst_186 = arith.constant dense<0.000000e+00> : vector<2x8x8xf32>
    %586 = tpu.matmul %585, %573, %cst_186 {dimension_numbers = #tpu.dot_dimension_numbers<[2], [1], [1], [2], [0, 0, 0, 1, 1, 2], [0], [0]>} : vector<2x8x8xf32>, vector<2x8x8xf32>, vector<2x8x8xf32> -> vector<2x8x8xf32>
    "tpu.trace_stop"() : () -> ()
    %587 = vector.shape_cast %586 : vector<2x8x8xf32> to vector<16x8xf32>
    %588 = vector.extract_strided_slice %570 {offsets = [0, 0], sizes = [8, 32], strides = [1, 1]} : vector<32x32xf32> to vector<8x32xf32>
    %cst_187 = arith.constant dense<0.000000e+00> : vector<16x32xf32>
    %589 = tpu.matmul %587, %588, %cst_187 {dimension_numbers = #tpu.dot_dimension_numbers<[1], [0], [0], [1], [0, 0, 1, 1], [], []>} : vector<16x8xf32>, vector<8x32xf32>, vector<16x32xf32> -> vector<16x32xf32>
    %590 = vector.extract_strided_slice %564 {offsets = [0, 0, 8], sizes = [2, 8, 8], strides = [1, 1, 1]} : vector<2x8x32xf32> to vector<2x8x8xf32>
    %591 = vector.extract_strided_slice %566 {offsets = [0, 0, 8], sizes = [2, 8, 8], strides = [1, 1, 1]} : vector<2x8x32xf32> to vector<2x8x8xf32>
    %592 = vector.extract_strided_slice %568 {offsets = [0, 0, 8], sizes = [2, 8, 8], strides = [1, 1, 1]} : vector<2x8x32xf32> to vector<2x8x8xf32>
    "tpu.trace_start"() <{level = 10 : i32, message = "btd,bsd->bts"}> : () -> ()
    %cst_188 = arith.constant dense<0.000000e+00> : vector<2x8x8xf32>
    %593 = tpu.matmul %590, %591, %cst_188 {dimension_numbers = #tpu.dot_dimension_numbers<[2], [2], [1], [1], [0, 0, 0, 1, 1, 1], [0], [0]>} : vector<2x8x8xf32>, vector<2x8x8xf32>, vector<2x8x8xf32> -> vector<2x8x8xf32>
    "tpu.trace_stop"() : () -> ()
    %cst_189 = arith.constant 0.353553385 : f32
    %594 = vector.broadcast %cst_189 : f32 to vector<2x8x8xf32>
    %595 = arith.mulf %593, %594 : vector<2x8x8xf32>
    %cst_190 = arith.constant dense<0xFF800000> : vector<2x8xf32>
    %596 = vector.multi_reduction <maximumf>, %595, %cst_190 [2] : vector<2x8x8xf32> to vector<2x8xf32>
    %597 = vector.shape_cast %596 : vector<2x8xf32> to vector<2x8x1xf32>
    %598 = vector.broadcast %597 : vector<2x8x1xf32> to vector<2x8x8xf32>
    %599 = arith.subf %595, %598 : vector<2x8x8xf32>
    %600 = math.exp %599 : vector<2x8x8xf32>
    %cst_191 = arith.constant dense<0.000000e+00> : vector<2x8xf32>
    %601 = vector.multi_reduction <add>, %600, %cst_191 [2] : vector<2x8x8xf32> to vector<2x8xf32>
    %602 = vector.shape_cast %601 : vector<2x8xf32> to vector<2x8x1xf32>
    %603 = vector.broadcast %602 : vector<2x8x1xf32> to vector<2x8x8xf32>
    %604 = arith.divf %600, %603 : vector<2x8x8xf32>
    "tpu.trace_start"() <{level = 10 : i32, message = "bts,bsd->btd"}> : () -> ()
    %cst_192 = arith.constant dense<0.000000e+00> : vector<2x8x8xf32>
    %605 = tpu.matmul %604, %592, %cst_192 {dimension_numbers = #tpu.dot_dimension_numbers<[2], [1], [1], [2], [0, 0, 0, 1, 1, 2], [0], [0]>} : vector<2x8x8xf32>, vector<2x8x8xf32>, vector<2x8x8xf32> -> vector<2x8x8xf32>
    "tpu.trace_stop"() : () -> ()
    %606 = vector.shape_cast %605 : vector<2x8x8xf32> to vector<16x8xf32>
    %607 = vector.extract_strided_slice %570 {offsets = [8, 0], sizes = [8, 32], strides = [1, 1]} : vector<32x32xf32> to vector<8x32xf32>
    %cst_193 = arith.constant dense<0.000000e+00> : vector<16x32xf32>
    %608 = tpu.matmul %606, %607, %cst_193 {dimension_numbers = #tpu.dot_dimension_numbers<[1], [0], [0], [1], [0, 0, 1, 1], [], []>} : vector<16x8xf32>, vector<8x32xf32>, vector<16x32xf32> -> vector<16x32xf32>
    %609 = arith.addf %589, %608 : vector<16x32xf32>
    %610 = vector.extract_strided_slice %564 {offsets = [0, 0, 16], sizes = [2, 8, 8], strides = [1, 1, 1]} : vector<2x8x32xf32> to vector<2x8x8xf32>
    %611 = vector.extract_strided_slice %566 {offsets = [0, 0, 16], sizes = [2, 8, 8], strides = [1, 1, 1]} : vector<2x8x32xf32> to vector<2x8x8xf32>
    %612 = vector.extract_strided_slice %568 {offsets = [0, 0, 16], sizes = [2, 8, 8], strides = [1, 1, 1]} : vector<2x8x32xf32> to vector<2x8x8xf32>
    "tpu.trace_start"() <{level = 10 : i32, message = "btd,bsd->bts"}> : () -> ()
    %cst_194 = arith.constant dense<0.000000e+00> : vector<2x8x8xf32>
    %613 = tpu.matmul %610, %611, %cst_194 {dimension_numbers = #tpu.dot_dimension_numbers<[2], [2], [1], [1], [0, 0, 0, 1, 1, 1], [0], [0]>} : vector<2x8x8xf32>, vector<2x8x8xf32>, vector<2x8x8xf32> -> vector<2x8x8xf32>
    "tpu.trace_stop"() : () -> ()
    %cst_195 = arith.constant 0.353553385 : f32
    %614 = vector.broadcast %cst_195 : f32 to vector<2x8x8xf32>
    %615 = arith.mulf %613, %614 : vector<2x8x8xf32>
    %cst_196 = arith.constant dense<0xFF800000> : vector<2x8xf32>
    %616 = vector.multi_reduction <maximumf>, %615, %cst_196 [2] : vector<2x8x8xf32> to vector<2x8xf32>
    %617 = vector.shape_cast %616 : vector<2x8xf32> to vector<2x8x1xf32>
    %618 = vector.broadcast %617 : vector<2x8x1xf32> to vector<2x8x8xf32>
    %619 = arith.subf %615, %618 : vector<2x8x8xf32>
    %620 = math.exp %619 : vector<2x8x8xf32>
    %cst_197 = arith.constant dense<0.000000e+00> : vector<2x8xf32>
    %621 = vector.multi_reduction <add>, %620, %cst_197 [2] : vector<2x8x8xf32> to vector<2x8xf32>
    %622 = vector.shape_cast %621 : vector<2x8xf32> to vector<2x8x1xf32>
    %623 = vector.broadcast %622 : vector<2x8x1xf32> to vector<2x8x8xf32>
    %624 = arith.divf %620, %623 : vector<2x8x8xf32>
    "tpu.trace_start"() <{level = 10 : i32, message = "bts,bsd->btd"}> : () -> ()
    %cst_198 = arith.constant dense<0.000000e+00> : vector<2x8x8xf32>
    %625 = tpu.matmul %624, %612, %cst_198 {dimension_numbers = #tpu.dot_dimension_numbers<[2], [1], [1], [2], [0, 0, 0, 1, 1, 2], [0], [0]>} : vector<2x8x8xf32>, vector<2x8x8xf32>, vector<2x8x8xf32> -> vector<2x8x8xf32>
    "tpu.trace_stop"() : () -> ()
    %626 = vector.shape_cast %625 : vector<2x8x8xf32> to vector<16x8xf32>
    %627 = vector.extract_strided_slice %570 {offsets = [16, 0], sizes = [8, 32], strides = [1, 1]} : vector<32x32xf32> to vector<8x32xf32>
    %cst_199 = arith.constant dense<0.000000e+00> : vector<16x32xf32>
    %628 = tpu.matmul %626, %627, %cst_199 {dimension_numbers = #tpu.dot_dimension_numbers<[1], [0], [0], [1], [0, 0, 1, 1], [], []>} : vector<16x8xf32>, vector<8x32xf32>, vector<16x32xf32> -> vector<16x32xf32>
    %629 = arith.addf %609, %628 : vector<16x32xf32>
    %630 = vector.extract_strided_slice %564 {offsets = [0, 0, 24], sizes = [2, 8, 8], strides = [1, 1, 1]} : vector<2x8x32xf32> to vector<2x8x8xf32>
    %631 = vector.extract_strided_slice %566 {offsets = [0, 0, 24], sizes = [2, 8, 8], strides = [1, 1, 1]} : vector<2x8x32xf32> to vector<2x8x8xf32>
    %632 = vector.extract_strided_slice %568 {offsets = [0, 0, 24], sizes = [2, 8, 8], strides = [1, 1, 1]} : vector<2x8x32xf32> to vector<2x8x8xf32>
    "tpu.trace_start"() <{level = 10 : i32, message = "btd,bsd->bts"}> : () -> ()
    %cst_200 = arith.constant dense<0.000000e+00> : vector<2x8x8xf32>
    %633 = tpu.matmul %630, %631, %cst_200 {dimension_numbers = #tpu.dot_dimension_numbers<[2], [2], [1], [1], [0, 0, 0, 1, 1, 1], [0], [0]>} : vector<2x8x8xf32>, vector<2x8x8xf32>, vector<2x8x8xf32> -> vector<2x8x8xf32>
    "tpu.trace_stop"() : () -> ()
    %cst_201 = arith.constant 0.353553385 : f32
    %634 = vector.broadcast %cst_201 : f32 to vector<2x8x8xf32>
    %635 = arith.mulf %633, %634 : vector<2x8x8xf32>
    %cst_202 = arith.constant dense<0xFF800000> : vector<2x8xf32>
    %636 = vector.multi_reduction <maximumf>, %635, %cst_202 [2] : vector<2x8x8xf32> to vector<2x8xf32>
    %637 = vector.shape_cast %636 : vector<2x8xf32> to vector<2x8x1xf32>
    %638 = vector.broadcast %637 : vector<2x8x1xf32> to vector<2x8x8xf32>
    %639 = arith.subf %635, %638 : vector<2x8x8xf32>
    %640 = math.exp %639 : vector<2x8x8xf32>
    %cst_203 = arith.constant dense<0.000000e+00> : vector<2x8xf32>
    %641 = vector.multi_reduction <add>, %640, %cst_203 [2] : vector<2x8x8xf32> to vector<2x8xf32>
    %642 = vector.shape_cast %641 : vector<2x8xf32> to vector<2x8x1xf32>
    %643 = vector.broadcast %642 : vector<2x8x1xf32> to vector<2x8x8xf32>
    %644 = arith.divf %640, %643 : vector<2x8x8xf32>
    "tpu.trace_start"() <{level = 10 : i32, message = "bts,bsd->btd"}> : () -> ()
    %cst_204 = arith.constant dense<0.000000e+00> : vector<2x8x8xf32>
    %645 = tpu.matmul %644, %632, %cst_204 {dimension_numbers = #tpu.dot_dimension_numbers<[2], [1], [1], [2], [0, 0, 0, 1, 1, 2], [0], [0]>} : vector<2x8x8xf32>, vector<2x8x8xf32>, vector<2x8x8xf32> -> vector<2x8x8xf32>
    "tpu.trace_stop"() : () -> ()
    %646 = vector.shape_cast %645 : vector<2x8x8xf32> to vector<16x8xf32>
    %647 = vector.extract_strided_slice %570 {offsets = [24, 0], sizes = [8, 32], strides = [1, 1]} : vector<32x32xf32> to vector<8x32xf32>
    %cst_205 = arith.constant dense<0.000000e+00> : vector<16x32xf32>
    %648 = tpu.matmul %646, %647, %cst_205 {dimension_numbers = #tpu.dot_dimension_numbers<[1], [0], [0], [1], [0, 0, 1, 1], [], []>} : vector<16x8xf32>, vector<8x32xf32>, vector<16x32xf32> -> vector<16x32xf32>
    %649 = arith.addf %629, %648 : vector<16x32xf32>
    %c1_206 = arith.constant 1 : index
    %c0_207 = arith.constant 0 : index
    %c0_208 = arith.constant 0 : index
    %650 = vector.load %arg11[%c1_206, %c0_207, %c0_208] : memref<2x1x32xf32, #tpu.memory_space<vmem>>, vector<1x1x32xf32>
    %651 = vector.shape_cast %650 : vector<1x1x32xf32> to vector<1x32xf32>
    %652 = vector.broadcast %651 : vector<1x32xf32> to vector<16x32xf32>
    %653 = arith.addf %649, %652 : vector<16x32xf32>
    %654 = arith.addf %555, %653 : vector<16x32xf32>
    %c1_209 = arith.constant 1 : index
    %c0_210 = arith.constant 0 : index
    %c0_211 = arith.constant 0 : index
    %655 = vector.load %arg16[%c1_209, %c0_210, %c0_211] : memref<2x1x32xf32, #tpu.memory_space<vmem>>, vector<1x1x32xf32>
    %656 = vector.shape_cast %655 : vector<1x1x32xf32> to vector<1x32xf32>
    %c1_212 = arith.constant 1 : index
    %c0_213 = arith.constant 0 : index
    %c0_214 = arith.constant 0 : index
    %657 = vector.load %arg17[%c1_212, %c0_213, %c0_214] : memref<2x1x32xf32, #tpu.memory_space<vmem>>, vector<1x1x32xf32>
    %658 = vector.shape_cast %657 : vector<1x1x32xf32> to vector<1x32xf32>
    %cst_215 = arith.constant dense<0.000000e+00> : vector<16xf32>
    %659 = vector.multi_reduction <add>, %654, %cst_215 [1] : vector<16x32xf32> to vector<16xf32>
    %660 = vector.shape_cast %659 : vector<16xf32> to vector<16x1xf32>
    %cst_216 = arith.constant 3.200000e+01 : f32
    %661 = vector.broadcast %cst_216 : f32 to vector<16x1xf32>
    %662 = arith.divf %660, %661 : vector<16x1xf32>
    %663 = vector.broadcast %662 : vector<16x1xf32> to vector<16x32xf32>
    %664 = arith.subf %654, %663 : vector<16x32xf32>
    %665 = arith.mulf %664, %664 : vector<16x32xf32>
    %cst_217 = arith.constant dense<0.000000e+00> : vector<16xf32>
    %666 = vector.multi_reduction <add>, %665, %cst_217 [1] : vector<16x32xf32> to vector<16xf32>
    %667 = vector.shape_cast %666 : vector<16xf32> to vector<16x1xf32>
    %cst_218 = arith.constant 3.200000e+01 : f32
    %668 = vector.broadcast %cst_218 : f32 to vector<16x1xf32>
    %669 = arith.divf %667, %668 : vector<16x1xf32>
    %cst_219 = arith.constant 9.99999974E-6 : f32
    %670 = vector.broadcast %cst_219 : f32 to vector<16x1xf32>
    %671 = arith.addf %669, %670 : vector<16x1xf32>
    %672 = math.rsqrt %671 : vector<16x1xf32>
    %673 = vector.broadcast %672 : vector<16x1xf32> to vector<16x32xf32>
    %674 = arith.mulf %664, %673 : vector<16x32xf32>
    %675 = vector.broadcast %656 : vector<1x32xf32> to vector<16x32xf32>
    %676 = arith.mulf %674, %675 : vector<16x32xf32>
    %677 = vector.broadcast %658 : vector<1x32xf32> to vector<16x32xf32>
    %678 = arith.addf %676, %677 : vector<16x32xf32>
    %c1_220 = arith.constant 1 : index
    %c0_221 = arith.constant 0 : index
    %c0_222 = arith.constant 0 : index
    %679 = vector.load %arg12[%c1_220, %c0_221, %c0_222] : memref<2x32x64xf32, #tpu.memory_space<vmem>>, vector<1x32x64xf32>
    %680 = vector.shape_cast %679 : vector<1x32x64xf32> to vector<32x64xf32>
    %cst_223 = arith.constant dense<0.000000e+00> : vector<16x64xf32>
    %681 = tpu.matmul %678, %680, %cst_223 {dimension_numbers = #tpu.dot_dimension_numbers<[1], [0], [0], [1], [0, 0, 1, 1], [], []>} : vector<16x32xf32>, vector<32x64xf32>, vector<16x64xf32> -> vector<16x64xf32>
    %c1_224 = arith.constant 1 : index
    %c0_225 = arith.constant 0 : index
    %c0_226 = arith.constant 0 : index
    %682 = vector.load %arg13[%c1_224, %c0_225, %c0_226] : memref<2x1x64xf32, #tpu.memory_space<vmem>>, vector<1x1x64xf32>
    %683 = vector.shape_cast %682 : vector<1x1x64xf32> to vector<1x64xf32>
    %684 = vector.broadcast %683 : vector<1x64xf32> to vector<16x64xf32>
    %685 = arith.addf %681, %684 : vector<16x64xf32>
    %cst_227 = arith.constant 0.000000e+00 : f32
    %686 = vector.broadcast %cst_227 : f32 to vector<16x64xf32>
    %687 = arith.maximumf %685, %686 : vector<16x64xf32>
    %c1_228 = arith.constant 1 : index
    %c0_229 = arith.constant 0 : index
    %c0_230 = arith.constant 0 : index
    %688 = vector.load %arg14[%c1_228, %c0_229, %c0_230] : memref<2x64x32xf32, #tpu.memory_space<vmem>>, vector<1x64x32xf32>
    %689 = vector.shape_cast %688 : vector<1x64x32xf32> to vector<64x32xf32>
    %cst_231 = arith.constant dense<0.000000e+00> : vector<16x32xf32>
    %690 = tpu.matmul %687, %689, %cst_231 {dimension_numbers = #tpu.dot_dimension_numbers<[1], [0], [0], [1], [0, 0, 1, 1], [], []>} : vector<16x64xf32>, vector<64x32xf32>, vector<16x32xf32> -> vector<16x32xf32>
    %c1_232 = arith.constant 1 : index
    %c0_233 = arith.constant 0 : index
    %c0_234 = arith.constant 0 : index
    %691 = vector.load %arg15[%c1_232, %c0_233, %c0_234] : memref<2x1x32xf32, #tpu.memory_space<vmem>>, vector<1x1x32xf32>
    %692 = vector.shape_cast %691 : vector<1x1x32xf32> to vector<1x32xf32>
    %693 = vector.broadcast %692 : vector<1x32xf32> to vector<16x32xf32>
    %694 = arith.addf %690, %693 : vector<16x32xf32>
    %695 = arith.addf %678, %694 : vector<16x32xf32>
    %c1_235 = arith.constant 1 : index
    %c0_236 = arith.constant 0 : index
    %c0_237 = arith.constant 0 : index
    %696 = vector.load %arg18[%c1_235, %c0_236, %c0_237] : memref<2x1x32xf32, #tpu.memory_space<vmem>>, vector<1x1x32xf32>
    %697 = vector.shape_cast %696 : vector<1x1x32xf32> to vector<1x32xf32>
    %c1_238 = arith.constant 1 : index
    %c0_239 = arith.constant 0 : index
    %c0_240 = arith.constant 0 : index
    %698 = vector.load %arg19[%c1_238, %c0_239, %c0_240] : memref<2x1x32xf32, #tpu.memory_space<vmem>>, vector<1x1x32xf32>
    %699 = vector.shape_cast %698 : vector<1x1x32xf32> to vector<1x32xf32>
    %cst_241 = arith.constant dense<0.000000e+00> : vector<16xf32>
    %700 = vector.multi_reduction <add>, %695, %cst_241 [1] : vector<16x32xf32> to vector<16xf32>
    %701 = vector.shape_cast %700 : vector<16xf32> to vector<16x1xf32>
    %cst_242 = arith.constant 3.200000e+01 : f32
    %702 = vector.broadcast %cst_242 : f32 to vector<16x1xf32>
    %703 = arith.divf %701, %702 : vector<16x1xf32>
    %704 = vector.broadcast %703 : vector<16x1xf32> to vector<16x32xf32>
    %705 = arith.subf %695, %704 : vector<16x32xf32>
    %706 = arith.mulf %705, %705 : vector<16x32xf32>
    %cst_243 = arith.constant dense<0.000000e+00> : vector<16xf32>
    %707 = vector.multi_reduction <add>, %706, %cst_243 [1] : vector<16x32xf32> to vector<16xf32>
    %708 = vector.shape_cast %707 : vector<16xf32> to vector<16x1xf32>
    %cst_244 = arith.constant 3.200000e+01 : f32
    %709 = vector.broadcast %cst_244 : f32 to vector<16x1xf32>
    %710 = arith.divf %708, %709 : vector<16x1xf32>
    %cst_245 = arith.constant 9.99999974E-6 : f32
    %711 = vector.broadcast %cst_245 : f32 to vector<16x1xf32>
    %712 = arith.addf %710, %711 : vector<16x1xf32>
    %713 = math.rsqrt %712 : vector<16x1xf32>
    %714 = vector.broadcast %713 : vector<16x1xf32> to vector<16x32xf32>
    %715 = arith.mulf %705, %714 : vector<16x32xf32>
    %716 = vector.broadcast %697 : vector<1x32xf32> to vector<16x32xf32>
    %717 = arith.mulf %715, %716 : vector<16x32xf32>
    %718 = vector.broadcast %699 : vector<1x32xf32> to vector<16x32xf32>
    %719 = arith.addf %717, %718 : vector<16x32xf32>
    %720 = vector.shape_cast %719 : vector<16x32xf32> to vector<2x8x32xf32>
    %721 = vector.extract_strided_slice %720 {offsets = [0, 7, 0], sizes = [2, 1, 32], strides = [1, 1, 1]} : vector<2x8x32xf32> to vector<2x1x32xf32>
    %722 = vector.shape_cast %721 : vector<2x1x32xf32> to vector<2x32xf32>
    %c0_246 = arith.constant 0 : index
    %c0_247 = arith.constant 0 : index
    %723 = vector.load %arg20[%c0_246, %c0_247] : memref<32x4xf32, #tpu.memory_space<vmem>>, vector<32x4xf32>
    %cst_248 = arith.constant dense<0.000000e+00> : vector<2x4xf32>
    %724 = tpu.matmul %722, %723, %cst_248 {dimension_numbers = #tpu.dot_dimension_numbers<[1], [0], [0], [1], [0, 0, 1, 1], [], []>} : vector<2x32xf32>, vector<32x4xf32>, vector<2x4xf32> -> vector<2x4xf32>
    %c0_249 = arith.constant 0 : index
    %c0_250 = arith.constant 0 : index
    %725 = vector.load %arg21[%c0_249, %c0_250] : memref<1x4xf32, #tpu.memory_space<vmem>>, vector<1x4xf32>
    %726 = vector.broadcast %725 : vector<1x4xf32> to vector<2x4xf32>
    %727 = arith.addf %724, %726 : vector<2x4xf32>
    %c0_251 = arith.constant 0 : index
    %c0_252 = arith.constant 0 : index
    %c0_253 = arith.constant 0 : index
    %728 = vector.load %arg22[%c0_251, %c0_252, %c0_253] : memref<2x1x4xf32, #tpu.memory_space<vmem>>, vector<2x1x4xf32>
    %729 = vector.shape_cast %728 : vector<2x1x4xf32> to vector<2x4xf32>
    %730 = vector.shape_cast %727 : vector<2x4xf32> to vector<2x1x4xf32>
    tpu.vector_store %arg22[%c0_251, %c0_252, %c0_253], %730 {strides = array<i32>} : memref<2x1x4xf32, #tpu.memory_space<vmem>>, vector<2x1x4xf32>,
    return
  }
  func.func @transform_0(%arg0: i32) -> (i32, i32, i32) {
    %c0_i32 = arith.constant 0 : i32
    %c0_i32_0 = arith.constant 0 : i32
    %c0_i32_1 = arith.constant 0 : i32
    return %arg0, %c0_i32, %c0_i32_0 : i32, i32, i32
  }
  func.func @transform_1(%arg0: i32) -> (i32, i32) {
    %c0_i32 = arith.constant 0 : i32
    %c0_i32_0 = arith.constant 0 : i32
    %c0_i32_1 = arith.constant 0 : i32
    return %c0_i32, %c0_i32_0 : i32, i32
  }
  func.func @transform_2(%arg0: i32) -> (i32, i32) {
    %c0_i32 = arith.constant 0 : i32
    %c0_i32_0 = arith.constant 0 : i32
    %c0_i32_1 = arith.constant 0 : i32
    return %c0_i32, %c0_i32_0 : i32, i32
  }
  func.func @transform_3(%arg0: i32) -> (i32, i32) {
    %c0_i32 = arith.constant 0 : i32
    %c0_i32_0 = arith.constant 0 : i32
    %c0_i32_1 = arith.constant 0 : i32
    return %c0_i32, %c0_i32_0 : i32, i32
  }
  func.func @transform_4(%arg0: i32) -> (i32, i32) {
    %c0_i32 = arith.constant 0 : i32
    %c0_i32_0 = arith.constant 0 : i32
    %c0_i32_1 = arith.constant 0 : i32
    return %c0_i32, %c0_i32_0 : i32, i32
  }
  func.func @transform_5(%arg0: i32) -> (i32, i32) {
    %c0_i32 = arith.constant 0 : i32
    %c0_i32_0 = arith.constant 0 : i32
    %c0_i32_1 = arith.constant 0 : i32
    return %c0_i32, %c0_i32_0 : i32, i32
  }
  func.func @transform_6(%arg0: i32) -> (i32, i32) {
    %c0_i32 = arith.constant 0 : i32
    %c0_i32_0 = arith.constant 0 : i32
    %c0_i32_1 = arith.constant 0 : i32
    return %c0_i32, %c0_i32_0 : i32, i32
  }
  func.func @transform_7(%arg0: i32) -> (i32, i32, i32) {
    %c0_i32 = arith.constant 0 : i32
    %c0_i32_0 = arith.constant 0 : i32
    %c0_i32_1 = arith.constant 0 : i32
    %c0_i32_2 = arith.constant 0 : i32
    return %c0_i32, %c0_i32_0, %c0_i32_1 : i32, i32, i32
  }
  func.func @transform_8(%arg0: i32) -> (i32, i32, i32) {
    %c0_i32 = arith.constant 0 : i32
    %c0_i32_0 = arith.constant 0 : i32
    %c0_i32_1 = arith.constant 0 : i32
    %c0_i32_2 = arith.constant 0 : i32
    return %c0_i32, %c0_i32_0, %c0_i32_1 : i32, i32, i32
  }
  func.func @transform_9(%arg0: i32) -> (i32, i32, i32) {
    %c0_i32 = arith.constant 0 : i32
    %c0_i32_0 = arith.constant 0 : i32
    %c0_i32_1 = arith.constant 0 : i32
    %c0_i32_2 = arith.constant 0 : i32
    return %c0_i32, %c0_i32_0, %c0_i32_1 : i32, i32, i32
  }
  func.func @transform_10(%arg0: i32) -> (i32, i32, i32) {
    %c0_i32 = arith.constant 0 : i32
    %c0_i32_0 = arith.constant 0 : i32
    %c0_i32_1 = arith.constant 0 : i32
    %c0_i32_2 = arith.constant 0 : i32
    return %c0_i32, %c0_i32_0, %c0_i32_1 : i32, i32, i32
  }
  func.func @transform_11(%arg0: i32) -> (i32, i32, i32) {
    %c0_i32 = arith.constant 0 : i32
    %c0_i32_0 = arith.constant 0 : i32
    %c0_i32_1 = arith.constant 0 : i32
    %c0_i32_2 = arith.constant 0 : i32
    return %c0_i32, %c0_i32_0, %c0_i32_1 : i32, i32, i32
  }
  func.func @transform_12(%arg0: i32) -> (i32, i32, i32) {
    %c0_i32 = arith.constant 0 : i32
    %c0_i32_0 = arith.constant 0 : i32
    %c0_i32_1 = arith.constant 0 : i32
    %c0_i32_2 = arith.constant 0 : i32
    return %c0_i32, %c0_i32_0, %c0_i32_1 : i32, i32, i32
  }
  func.func @transform_13(%arg0: i32) -> (i32, i32, i32) {
    %c0_i32 = arith.constant 0 : i32
    %c0_i32_0 = arith.constant 0 : i32
    %c0_i32_1 = arith.constant 0 : i32
    %c0_i32_2 = arith.constant 0 : i32
    return %c0_i32, %c0_i32_0, %c0_i32_1 : i32, i32, i32
  }
  func.func @transform_14(%arg0: i32) -> (i32, i32, i32) {
    %c0_i32 = arith.constant 0 : i32
    %c0_i32_0 = arith.constant 0 : i32
    %c0_i32_1 = arith.constant 0 : i32
    %c0_i32_2 = arith.constant 0 : i32
    return %c0_i32, %c0_i32_0, %c0_i32_1 : i32, i32, i32
  }
  func.func @transform_15(%arg0: i32) -> (i32, i32, i32) {
    %c0_i32 = arith.constant 0 : i32
    %c0_i32_0 = arith.constant 0 : i32
    %c0_i32_1 = arith.constant 0 : i32
    %c0_i32_2 = arith.constant 0 : i32
    return %c0_i32, %c0_i32_0, %c0_i32_1 : i32, i32, i32
  }
  func.func @transform_16(%arg0: i32) -> (i32, i32, i32) {
    %c0_i32 = arith.constant 0 : i32
    %c0_i32_0 = arith.constant 0 : i32
    %c0_i32_1 = arith.constant 0 : i32
    %c0_i32_2 = arith.constant 0 : i32
    return %c0_i32, %c0_i32_0, %c0_i32_1 : i32, i32, i32
  }
  func.func @transform_17(%arg0: i32) -> (i32, i32, i32) {
    %c0_i32 = arith.constant 0 : i32
    %c0_i32_0 = arith.constant 0 : i32
    %c0_i32_1 = arith.constant 0 : i32
    %c0_i32_2 = arith.constant 0 : i32
    return %c0_i32, %c0_i32_0, %c0_i32_1 : i32, i32, i32
  }
  func.func @transform_18(%arg0: i32) -> (i32, i32, i32) {
    %c0_i32 = arith.constant 0 : i32
    %c0_i32_0 = arith.constant 0 : i32
    %c0_i32_1 = arith.constant 0 : i32
    %c0_i32_2 = arith.constant 0 : i32
    return %c0_i32, %c0_i32_0, %c0_i32_1 : i32, i32, i32
  }
  func.func @transform_19(%arg0: i32) -> (i32, i32) {
    %c0_i32 = arith.constant 0 : i32
    %c0_i32_0 = arith.constant 0 : i32
    %c0_i32_1 = arith.constant 0 : i32
    return %c0_i32, %c0_i32_0 : i32, i32
  }
  func.func @transform_20(%arg0: i32) -> (i32, i32) {
    %c0_i32 = arith.constant 0 : i32
    %c0_i32_0 = arith.constant 0 : i32
    %c0_i32_1 = arith.constant 0 : i32
    return %c0_i32, %c0_i32_0 : i32, i32
  }
  func.func @transform_21(%arg0: i32) -> (i32, i32, i32) {
    %c0_i32 = arith.constant 0 : i32
    %c0_i32_0 = arith.constant 0 : i32
    %c0_i32_1 = arith.constant 0 : i32
    return %arg0, %c0_i32, %c0_i32_0 : i32, i32, i32
  }
}

</mosaic_0001>

<bundles_post_ra>
// kernel: lstm_transformer_forward.1
= control target key start
LH: loop header
LB: loop body
LE: loop exit
PB: predicated region body
PF: predicated region fallthrough
CT: control target
= control target key end

     0   :  { %s9812_s0 = inlined_call_operand.hbm [shape: f32[2,8,16], index: 0, kind: input, shape index: {}]   ;;  %s9813_s1 = inlined_call_operand.hbm [shape: f32[16,128], index: 1, kind: input, shape index: {}]   ;;  %s9814_s2 = inlined_call_operand.vmem [shape: f32[32,128], index: 2, kind: input, shape index: {}]   ;;  %s9815_s3 = inlined_call_operand.vmem [shape: f32[1,128], index: 3, kind: input, shape index: {}]   ;;  %s9816_s4 = inlined_call_operand.vmem [shape: f32[32,128], index: 4, kind: input, shape index: {}]   ;;  %s9817_s5 = inlined_call_operand.hbm [shape: f32[32,128], index: 5, kind: input, shape index: {}]   ;;  %s9818_s6 = inlined_call_operand.vmem [shape: f32[1,128], index: 6, kind: input, shape index: {}]   ;;  %s9819_s7 = inlined_call_operand.vmem [shape: f32[2,32,96], index: 7, kind: input, shape index: {}]   ;;  %s9820_s8 = inlined_call_operand.hbm [shape: f32[2,1,96], index: 8, kind: input, shape index: {}]   ;;  %s9821_s9 = inlined_call_operand.vmem [shape: f32[2,32,32], index: 9, kind: input, shape index: {}]   ;;  %s9822_s10 = inlined_call_operand.hbm [shape: f32[2,1,32], index: 10, kind: input, shape index: {}]   ;;  %s9823_s11 = inlined_call_operand.vmem [shape: f32[2,32,64], index: 11, kind: input, shape index: {}]   ;;  %s9824_s12 = inlined_call_operand.hbm [shape: f32[2,1,64], index: 12, kind: input, shape index: {}]   ;;  %s9825_s13 = inlined_call_operand.vmem [shape: f32[2,64,32], index: 13, kind: input, shape index: {}]   ;;  %s9826_s14 = inlined_call_operand.hbm [shape: f32[2,1,32], index: 14, kind: input, shape index: {}]   ;;  %s9827_s15 = inlined_call_operand.hbm [shape: f32[2,1,32], index: 15, kind: input, shape index: {}]   ;;  %s9828_s16 = inlined_call_operand.hbm [shape: f32[2,1,32], index: 16, kind: input, shape index: {}]   ;;  %s9829_s17 = inlined_call_operand.hbm [shape: f32[2,1,32], index: 17, kind: input, shape index: {}]   ;;  %s9830_s18 = inlined_call_operand.hbm [shape: f32[2,1,32], index: 18, kind: input, shape index: {}]   ;;  %s9831_s19 = inlined_call_operand.vmem [shape: f32[32,4], index: 19, kind: input, shape index: {}]   ;;  %s9832_s20 = inlined_call_operand.hbm [shape: f32[1,4], index: 20, kind: input, shape index: {}]   ;;  %s9833_s21 = inlined_call_operand.hbm [shape: f32[2,1,4], index: 21, kind: output, shape index: {}]  }
   0x1   :  { %9836 = sst [smem:[#allocation32_spill]] %s9812_s0 }
   0x2   :  { %9837 = sst [smem:[#allocation33_spill]] %s9813_s1 }
   0x3   :  { %9838 = sst [smem:[#allocation34_spill]] %s9814_s2 }
   0x4   :  { %9839 = sst [smem:[#allocation35_spill]] %s9815_s3 }
   0x5   :  { %9840 = sst [smem:[#allocation36_spill]] %s9816_s4 }
   0x6   :  { %9841 = sst [smem:[#allocation37_spill]] %s9817_s5 }
   0x7   :  { %26 = vsyncpa [#allocation4], 0 }
   0x8   :  { %27 = vsyncpa [#allocation7], 0 }
   0x9   :  { %28 = vsyncpa [#allocation10], 0 }
   0xa   :  { %29 = vsyncpa [#allocation13], 0 }
   0xb   :  { %30 = vsyncpa [#allocation16], 0 }
   0xc   :  { %31 = vsyncpa [#allocation19], 0 }
   0xd   :  { %32 = vsyncpa [#allocation22], 0 }
   0xe   :  { %33 = vsyncpa [#allocation5], 0  ;;  %s8534_s2 = smov [#allocation6]   ;;  %s8535_s26 = smov [#allocation9]  }
   0xf   :  { %s51_s25 = sshll.u32 %s8534_s2, 4  ;;  %s85_s27 = sshll.u32 %s8535_s26, 4  ;;  %s52_s25 = int_to_ptr.vmem [resolvable:$true] %s51_s25  ;;  %s86_s27 = int_to_ptr.vmem [resolvable:$true] %s85_s27 }
  0x10   :  { %s8266_s3 = scalar_lea.vmem %s52_s25, 256  ;;  %p8271_p1 = scmp.lt.s32.totalorder %s52_s25, %s52_s25 }
  0x11   :  { %p8267_p0 = scmp.ne.s32.totalorder %s52_s25, %s8266_s3  ;;  %p8272_p2 = scmp.lt.s32.totalorder %s8266_s3, %s8266_s3 }
  0x13   :  { %p8273_p3 = por %p8272_p2, %p8271_p1 }
  0x15   :  { %p8274_p4 = pnand %p8273_p3, %p8267_p0 }
  0x17   :  { %8277 = shalt.err (!%p8274_p4)
}
  0x18   :  { %s8536_s28 = smov 128   ;;  %s8537_s29 = smov 8  }
  0x19   :  { %s9842_s30 = sld [smem:[#allocation33_spill]]  ;;  %s8286_s5 = scalar_lea.vmem %s86_s27, 32 }
  0x1a   :  { %p8287_p5 = scmp.ne.s32.totalorder %s86_s27, %s8286_s5  ;;  %p8291_p6 = scmp.lt.s32.totalorder %s86_s27, %s86_s27 }
  0x1b   :  { %p8292_p7 = scmp.lt.s32.totalorder %s8286_s5, %s8286_s5 }
  0x1d   :  { %p8293_p8 = por %p8292_p7, %p8291_p6 }
  0x1f   :  { %57 = dma.hbm_to_vmem [thread:$0]  %s9842_s30, 256, %s52_s25, [#allocation7], %s8536_s28, %s8536_s28, %s8537_s29  }
  0x20   :  { %p8294_p9 = pnand %p8293_p8, %p8287_p5 }
  0x22   :  { %8297 = shalt.err (!%p8294_p9)
}
  0x23   :  { %s8538_s22 = smov 16   ;;  %s8539_s23 = smov 1  }
  0x24   :  { %91 = dma.hbm_to_vmem [thread:$0]  %s9820_s8, 32, %s86_s27, [#allocation10], %s8538_s22, %s8538_s22, %s8539_s23  }
  0x25   :  { %s8540_s2 = smov [#allocation12]   ;;  %s8541_s3 = smov [#allocation15]  }
  0x26   :  { %s113_s26 = sshll.u32 %s8540_s2, 4  ;;  %s139_s25 = sshll.u32 %s8541_s3, 4  ;;  %s114_s26 = int_to_ptr.vmem [resolvable:$true] %s113_s26  ;;  %s140_s25 = int_to_ptr.vmem [resolvable:$true] %s139_s25 }
  0x27   :  { %s8306_s0 = scalar_lea.vmem %s114_s26, 32  ;;  %p8311_p11 = scmp.lt.s32.totalorder %s114_s26, %s114_s26 }
  0x28   :  { %p8307_p10 = scmp.ne.s32.totalorder %s114_s26, %s8306_s0  ;;  %p8312_p12 = scmp.lt.s32.totalorder %s8306_s0, %s8306_s0 }
  0x2a   :  { %p8313_p13 = por %p8312_p12, %p8311_p11 }
  0x2c   :  { %p8314_p0 = pnand %p8313_p13, %p8307_p10 }
  0x2e   :  { %8317 = shalt.err (!%p8314_p0)
}
  0x2f   :  { %119 = dma.hbm_to_vmem [thread:$0]  %s9824_s12, 32, %s114_s26, [#allocation13], %s8538_s22, %s8538_s22, %s8539_s23  }
  0x30   :  { %s8326_s8 = scalar_lea.vmem %s140_s25, 32  ;;  %p8331_p2 = scmp.lt.s32.totalorder %s140_s25, %s140_s25 }
  0x31   :  { %p8327_p1 = scmp.ne.s32.totalorder %s140_s25, %s8326_s8  ;;  %p8332_p3 = scmp.lt.s32.totalorder %s8326_s8, %s8326_s8 }
  0x33   :  { %p8333_p4 = por %p8332_p3, %p8331_p2 }
  0x35   :  { %p8334_p5 = pnand %p8333_p4, %p8327_p1 }
  0x37   :  { %8337 = shalt.err (!%p8334_p5)
}
  0x38   :  { %145 = dma.hbm_to_vmem [thread:$0]  %s9827_s15, 32, %s140_s25, [#allocation16], %s8538_s22, %s8538_s22, %s8539_s23  }
  0x39   :  { %s8542_s1 = smov [#allocation18]   ;;  %s8543_s2 = smov [#allocation3]  }
  0x3a   :  { %s163_s24 = sshll.u32 %s8542_s1, 4  ;;  %s39_s3 = sshll.u32 %s8543_s2, 4  ;;  %s164_s24 = int_to_ptr.vmem [resolvable:$true] %s163_s24  ;;  %s40_s3 = int_to_ptr.vmem [resolvable:$true] %s39_s3 }
  0x3b   :  { %s8346_s12 = scalar_lea.vmem %s164_s24, 32  ;;  %p8351_p7 = scmp.lt.s32.totalorder %s164_s24, %s164_s24 }
  0x3c   :  { %p8347_p6 = scmp.ne.s32.totalorder %s164_s24, %s8346_s12  ;;  %p8352_p8 = scmp.lt.s32.totalorder %s8346_s12, %s8346_s12 }
  0x3e   :  { %p8353_p9 = por %p8352_p8, %p8351_p7 }
  0x40   :  { %p8354_p10 = pnand %p8353_p9, %p8347_p6 }
  0x42   :  { %8357 = shalt.err (!%p8354_p10)
}
  0x43   :  { %169 = dma.hbm_to_vmem [thread:$0]  %s9829_s17, 32, %s164_s24, [#allocation19], %s8538_s22, %s8538_s22, %s8539_s23  }
  0x44   :  { %s8366_s15 = scalar_lea.vmem %s40_s3, 256  ;;  %p8371_p12 = scmp.lt.s32.totalorder %s40_s3, %s40_s3 }
  0x45   :  { %p8367_p11 = scmp.ne.s32.totalorder %s40_s3, %s8366_s15  ;;  %p8372_p13 = scmp.lt.s32.totalorder %s8366_s15, %s8366_s15 }
  0x47   :  { %p8373_p0 = por %p8372_p13, %p8371_p12 }
  0x49   :  { %p8374_p1 = pnand %p8373_p0, %p8367_p11 }
  0x4b   :  { %8377 = shalt.err (!%p8374_p1)
}
  0x4c   :  { %s9843_s30 = sld [smem:[#allocation32_spill]]  ;;  %s8544_s8 = smov [#allocation8]  }
  0x4d   :  { %s69_s27 = sshll.u32 %s8544_s8, 4  ;;  %s8545_s5 = smov [#allocation11]   ;;  %s70_s27 = int_to_ptr.vmem [resolvable:$true] %s69_s27 }
  0x4e   :  { %s99_s1 = sshll.u32 %s8545_s5, 4  ;;  %s8386_s17 = scalar_lea.vmem %s70_s27, 512  ;;  %s100_s1 = int_to_ptr.vmem [resolvable:$true] %s99_s1 }
  0x4f   :  { %p8387_p2 = scmp.ne.s32.totalorder %s70_s27, %s8386_s17  ;;  %p8391_p3 = scmp.lt.s32.totalorder %s70_s27, %s70_s27 }
  0x50   :  { %p8392_p4 = scmp.lt.s32.totalorder %s8386_s17, %s8386_s17 }
  0x52   :  { %45 = dma.hbm_to_vmem [thread:$0]  %s9843_s30, 256, %s40_s3, [#allocation4], %s8536_s28, %s8536_s28, %s8537_s29  }
  0x53   :  { %p8393_p5 = por %p8392_p4, %p8391_p3 }
  0x55   :  { %p8394_p6 = pnand %p8393_p5, %p8387_p2 }
  0x57   :  { %8397 = shalt.err (!%p8394_p6)
}
  0x58   :  { %s9844_s12 = sld [smem:[#allocation37_spill]]  ;;  %s8406_s3 = scalar_lea.vmem %s100_s1, 32 }
  0x59   :  { %p8407_p7 = scmp.ne.s32.totalorder %s100_s1, %s8406_s3  ;;  %p8411_p8 = scmp.lt.s32.totalorder %s100_s1, %s100_s1 }
  0x5a   :  { %p8412_p9 = scmp.lt.s32.totalorder %s8406_s3, %s8406_s3 }
  0x5c   :  { %p8413_p10 = por %p8412_p9, %p8411_p8 }
  0x5e   :  { %75 = dma.hbm_to_vmem [thread:$0]  %s9844_s12, 512, %s70_s27, [#allocation7], %s8536_s28, %s8536_s28, %s8537_s29  }
  0x5f   :  { %p8414_p11 = pnand %p8413_p10, %p8407_p7 }
  0x61   :  { %8417 = shalt.err (!%p8414_p11)
}
  0x62   :  { %105 = dma.hbm_to_vmem [thread:$0]  %s9822_s10, 32, %s100_s1, [#allocation10], %s8538_s22, %s8538_s22, %s8539_s23  }
  0x63   :  { %s8546_s15 = smov [#allocation14]   ;;  %s8547_s4 = smov [#allocation17]  }
  0x64   :  { %s127_s25 = sshll.u32 %s8546_s15, 4  ;;  %s151_s30 = sshll.u32 %s8547_s4, 4  ;;  %s128_s25 = int_to_ptr.vmem [resolvable:$true] %s127_s25  ;;  %s152_s30 = int_to_ptr.vmem [resolvable:$true] %s151_s30 }
  0x65   :  { %s8426_s28 = scalar_lea.vmem %s128_s25, 32  ;;  %p8431_p13 = scmp.lt.s32.totalorder %s128_s25, %s128_s25 }
  0x66   :  { %p8427_p12 = scmp.ne.s32.totalorder %s128_s25, %s8426_s28  ;;  %p8432_p0 = scmp.lt.s32.totalorder %s8426_s28, %s8426_s28 }
  0x68   :  { %p8433_p1 = por %p8432_p0, %p8431_p13 }
  0x6a   :  { %p8434_p2 = pnand %p8433_p1, %p8427_p12 }
  0x6c   :  { %8437 = shalt.err (!%p8434_p2)
}
  0x6d   :  { %133 = dma.hbm_to_vmem [thread:$0]  %s9826_s14, 32, %s128_s25, [#allocation13], %s8538_s22, %s8538_s22, %s8539_s23  }
  0x6e   :  { %s8446_s10 = scalar_lea.vmem %s152_s30, 32  ;;  %p8451_p4 = scmp.lt.s32.totalorder %s152_s30, %s152_s30 }
  0x6f   :  { %p8447_p3 = scmp.ne.s32.totalorder %s152_s30, %s8446_s10  ;;  %p8452_p5 = scmp.lt.s32.totalorder %s8446_s10, %s8446_s10 }
  0x71   :  { %p8453_p6 = por %p8452_p5, %p8451_p4 }
  0x73   :  { %p8454_p7 = pnand %p8453_p6, %p8447_p3 }
  0x75   :  { %8457 = shalt.err (!%p8454_p7)
}
  0x76   :  { %157 = dma.hbm_to_vmem [thread:$0]  %s9828_s16, 32, %s152_s30, [#allocation16], %s8538_s22, %s8538_s22, %s8539_s23  }
  0x77   :  { %s8548_s1 = smov [#allocation20]   ;;  %s8549_s24 = smov [#allocation21]  }
  0x78   :  { %s175_s17 = sshll.u32 %s8548_s1, 4  ;;  %s190_s2 = sshll.u32 %s8549_s24, 4  ;;  %s176_s17 = int_to_ptr.vmem [resolvable:$true] %s175_s17  ;;  %s191_s2 = int_to_ptr.vmem [resolvable:$true] %s190_s2 }
  0x79   :  { %s8466_s14 = scalar_lea.vmem %s176_s17, 32  ;;  %p8471_p9 = scmp.lt.s32.totalorder %s176_s17, %s176_s17 }
  0x7a   :  { %p8467_p8 = scmp.ne.s32.totalorder %s176_s17, %s8466_s14  ;;  %p8472_p10 = scmp.lt.s32.totalorder %s8466_s14, %s8466_s14 }
  0x7c   :  { %p8473_p11 = por %p8472_p10, %p8471_p9 }
  0x7e   :  { %p8474_p12 = pnand %p8473_p11, %p8467_p8 }
  0x80   :  { %8477 = shalt.err (!%p8474_p12)
}
  0x81   :  { %181 = dma.hbm_to_vmem [thread:$0]  %s9830_s18, 32, %s176_s17, [#allocation19], %s8538_s22, %s8538_s22, %s8539_s23  }
  0x82   :  { %s8486_s16 = scalar_lea.vmem %s191_s2, 16  ;;  %s8490_s26 = scalar_lea.vmem %s191_s2, 32 }
  0x83   :  { %p8487_p13 = scmp.ne.s32.totalorder %s191_s2, %s8486_s16  ;;  %p8491_p0 = scmp.lt.s32.totalorder %s191_s2, %s191_s2 }
  0x84   :  { %p8492_p1 = scmp.lt.s32.totalorder %s8490_s26, %s8486_s16 }
  0x86   :  { %p8493_p2 = por %p8492_p1, %p8491_p0 }
  0x88   :  { %p8494_p3 = pnand %p8493_p2, %p8487_p13 }
  0x8a   :  { %8497 = shalt.err (!%p8494_p3)
}
  0x8b   :  { %193 = dma.hbm_to_vmem [thread:$0]  %s9832_s20, 16, %s191_s2, [#allocation22]  }
  0x8c   :  { %8518 = dma.done.wait [#allocation4], 256  }
  0x8d   :  { %8519 = vsyncadd [#allocation4], 4294967040 }
  0x8e   :  { %8520 = dma.done.wait [#allocation7], 768  }
  0x8f   :  { %8521 = vsyncadd [#allocation7], 4294966528 }
  0x90   :  { %8522 = dma.done.wait [#allocation10], 64  }
  0x91   :  { %8523 = vsyncadd [#allocation10], 4294967232 }
  0x92   :  { %8524 = dma.done.wait [#allocation13], 64  }
  0x93   :  { %8525 = vsyncadd [#allocation13], 4294967232 }
  0x94   :  { %8526 = dma.done.wait [#allocation16], 64  }
  0x95   :  { %8527 = vsyncadd [#allocation16], 4294967232 }
  0x96   :  { %8528 = dma.done.wait [#allocation19], 64  }
  0x97   :  { %8529 = vsyncadd [#allocation19], 4294967232 }
  0x98   :  { %8530 = dma.done.wait [#allocation22], 16  }
  0x99   :  { %8531 = vsyncadd [#allocation22], 4294967280  ;;  %v8550_v0 = vmov 0.0   ;;  %vm8551_vm0 = vmmov 0   ;;  %v237_v1 = vld [vmem:[#allocation6 + $0x8] sm:$0xff]  ;;  %s9845_s25 = sld [smem:[#allocation34_spill]] }
  0x9a   :  { %7410 = vmatprep.subr.mxu1 %v8550_v0  ;;  %7418 = vmatprep.mubr.msk.f32.mxu1 %vm8551_vm0, %v8550_v0  ;;  %v236_v3 = vld [vmem:[#allocation6] sm:$0xff]  ;;  %v230_v5 = vld [vmem:[#allocation3] sm:$0xff]  ;;  %vm245_vm1 = vcmask 130048   ;;  %v231_v6 = vld [vmem:[#allocation3 + $0x8] sm:$0xff]  ;;  %s9846_s1 = sld [smem:[#allocation35_spill]]  ;;  %s8552_s17 = smov 32  }
  0x9b   :  { %7403 = vmatprep.subr.mxu0 %v237_v1  ;;  %7407 = vmatprep.mubr.msk.f32.mxu0 %vm245_vm1, %v230_v5  ;;  %vm467_vm2 = vcmask 1041409   ;;  %s8553_s24 = smov 64   ;;  %vm327_vm3 = vcmask 261120   ;;  %s9847_s12 = sld [smem:[#allocation36_spill]]  ;;  %vm463_vm4 = vcmask 253952   ;;  %vm611_vm5 = vcmask 254977  }
  0x9c   :  { %7404 = vmatpush3.msra.mxu0 %v237_v1  ;;  %vm759_vm6 = vcmask 256002   ;;  %vm908_vm7 = vcmask 257027   ;;  %vm1057_vm8 = vcmask 258052   ;;  %vm1206_vm9 = vcmask 259077   ;;  %s8554_s5 = smov 96   ;;  %s8557_s2 = smov 56  }
  0x9d   :  { %7405 = vmatprep.subr.mxu0 %v236_v3  ;;  %vm1355_vm10 = vcmask 260102   ;;  %vm1504_vm11 = vcmask 261127   ;;  %vm2873_vm12 = vcmask 64512   ;;  %s8558_s14 = smov 80   ;;  %s8560_s15 = smov 48   ;;  %vm4690_vm13 = vcmask 523264  }
  0x9e   :  { %7406 = vmatpush3.msra.mxu0 %v236_v3  ;;  %s8561_s18 = smov 72   ;;  %s8562_s20 = smov 104   ;;  %vm6984_vm14 = vcmask 24576  }
  0x9f   :  { %v8751_v2 = vld [vmem:[%s9845_s25 + $0x18] sm:$0xff]  ;;  %v8757_v4 = vld [vmem:[%s9845_s25 + $0x10] sm:$0xff]  ;;  %v8764_v7 = vld [vmem:[%s9845_s25 + $0x8] sm:$0xff]  ;;  %7408 = vmatmul.mubr.msk.f32.vlgmr.msra.gmra.mxu0 %vm245_vm1, %v231_v6  ;;  %7421 = vmatprep.subr.mxu0 %v8550_v0  ;;  %s8563_s4 = smov 40  }
  0xa0   :  { %7411 = vmatpush3.msra.mxu1 %v8751_v2  ;;  %v8770_v8 = vld [vmem:[%s9845_s25] sm:$0xff]  ;;  %7422 = vmatpush3.msra.mxu0 %v8751_v2 }
  0xa1   :  { %7412 = vmatprep.subr.mxu1 %v8550_v0  ;;  %7423 = vmatprep.subr.mxu0 %v8550_v0  ;;  %v7010_v10 = vld [vmem:[%s9846_s1] ss:$0 sm:$0xff]  ;;  %s8555_s1 = smov 88  }
  0xa2   :  { %7413 = vmatpush3.msra.mxu1 %v8757_v4  ;;  %7424 = vmatpush3.msra.mxu0 %v8757_v4 }
  0xa3   :  { %7414 = vmatprep.subr.mxu1 %v8550_v0  ;;  %7425 = vmatprep.subr.mxu0 %v8550_v0 }
  0xa4   :  { %7415 = vmatpush3.msra.mxu1 %v8764_v7  ;;  %7429 = vmatprep.mubr.msk.f32.mxu0 %vm8551_vm0, %v8550_v0 }
  0xa5   :  { %7416 = vmatprep.subr.mxu1 %v8550_v0  ;;  %7426 = vmatpush3.msra.mxu0 %v8764_v7 }
  0xa6   :  { %7417 = vmatpush3.msra.mxu1 %v8770_v8  ;;  %7427 = vmatprep.subr.mxu0 %v8550_v0 }
  0xa7   :  { %7419 = vmatmul.mubr.f32.vlgmr.msra.gmra.mxu1 %v8550_v0  ;;  %7432 = vmatprep.subr.mxu1 %v8550_v0 }
  0xa8   :  { %7433 = vmatpush3.msra.mxu1 %v8751_v2  ;;  %7428 = vmatpush3.msra.mxu0 %v8770_v8 }
  0xa9   :  { %7434 = vmatprep.subr.mxu1 %v8550_v0  ;;  %7440 = vmatprep.mubr.msk.f32.mxu1 %vm8551_vm0, %v8550_v0 }
  0xaa   :  { %7435 = vmatpush3.msra.mxu1 %v8757_v4  ;;  %7443 = vmatprep.subr.mxu0 %v8550_v0 }
  0xab   :  { %7436 = vmatprep.subr.mxu1 %v8550_v0 }
  0xac   :  { %7437 = vmatpush3.msra.mxu1 %v8764_v7 }
  0xad   :  { %7438 = vmatprep.subr.mxu1 %v8550_v0 }
  0xae   :  { %7439 = vmatpush3.msra.mxu1 %v8770_v8 }
  0xaf   :  { %7454 = vmatprep.subr.mxu1 %v8550_v0 }
 0x15f   :  { %v7409_v9 = vpop.f32.mrf.mxu0 }
 0x160   :  { %v8801_v11 = vadd.f32 %v7409_v9, %v7010_v10 }
 0x161   :  { %v318_v12 = vpop.f32.mrf.mxu0 }
 0x162   :  { %v8803_v15 = vadd.f32 %v7010_v10, %v318_v12 }
 0x167   :  { %v397_v13 = vpop.f32.mrf.mxu1 }
 0x168   :  { %v402_v14 = vrot.slane %v397_v13, 1  ;;  %v405_v18 = vadd.f32 %v397_v13, %v8803_v15 }
 0x169   :  { %v7420_v16 = vpop.f32.mrf.mxu1 }
 0x16a   :  { %v406_v17 = vadd.f32 %v402_v14, %v8801_v11  ;;  %v7013_v22 = vmul.f32 -1.442695, %v405_v18 }
 0x16c   :  { %7922 = vtanh.f32 %v406_v17  ;;  %v7014_v21 = vmul.f32 -1.442695, %v406_v17 }
 0x16d   :  { %7924 = vtanh.f32 %v405_v18 }
 0x16e   :  { %7926 = vpow2.f32 %v7014_v21 }
 0x16f   :  { %7928 = vpow2.f32 %v7013_v22 }
 0x179   :  { %v7923_v19 = vpop.eup %7922 }
 0x17a   :  { %427 = vrot.lane.b32.xlu0 %v7923_v19, %s8552_s17  ;;  %v7925_v20 = vpop.eup %7924 }
 0x17b   :  { %v7927_v23 = vpop.eup %7926 }
 0x17c   :  { %v414_v24 = vadd.f32 1.0, %v7927_v23  ;;  %v7929_v25 = vpop.eup %7928 }
 0x17d   :  { %v413_v26 = vadd.f32 1.0, %v7929_v25 }
 0x17e   :  { %425 = vrot.lane.b32.xlu0 %v7925_v20, %s8552_s17  ;;  %7930 = vrcp.f32 %v414_v24 }
 0x17f   :  { %7932 = vrcp.f32 %v413_v26 }
 0x18b   :  { %v7931_v27 = vpop.eup %7930 }
 0x18c   :  { %v7933_v30 = vpop.eup %7932  ;;  %v422_v33 = vmul.f32 0.0, %v7931_v27 }
 0x18d   :  { %v421_v36 = vmul.f32 0.0, %v7933_v30 }
 0x1ec   :  { %v428_v28 = vpop.permute.xlu0 %427 }
 0x1ed   :  { %v432_v29 = vmul.f32 %v7931_v27, %v428_v28 }
 0x1ef   :  { %437 = vrot.lane.b32.xlu1 %v432_v29, %s8552_s17 }
 0x1f0   :  { %v426_v31 = vpop.permute.xlu0 %425 }
 0x1f1   :  { %v431_v32 = vmul.f32 %v7933_v30, %v426_v31 }
 0x1f3   :  { %435 = vrot.lane.b32.xlu1 %v431_v32, %s8552_s17 }
 0x261   :  { %v438_v34 = vpop.permute.xlu1 %437 }
 0x262   :  { %v442_v35 = vadd.f32 %v438_v34, %v422_v33 }
 0x264   :  { %7934 = vtanh.f32 %v442_v35  ;;  %v566_v6 = vrot.slane %v442_v35, 7 }
 0x265   :  { %v436_v37 = vpop.permute.xlu1 %435 }
 0x266   :  { %v441_v38 = vadd.f32 %v436_v37, %v421_v36 }
 0x268   :  { %7936 = vtanh.f32 %v441_v38  ;;  %v565_v10 = vrot.slane %v441_v38, 7 }
 0x271   :  { %v7935_v39 = vpop.eup %7934 }
 0x272   :  { %449 = vrot.lane.b32.xlu0 %v7935_v39, %s8552_s17 }
 0x275   :  { %v7937_v40 = vpop.eup %7936 }
 0x276   :  { %447 = vrot.lane.b32.xlu1 %v7937_v40, %s8552_s17 }
 0x2e4   :  { %v450_v41 = vpop.permute.xlu0 %449 }
 0x2e5   :  { %v8813_v42 = vmul.f32 %v7931_v27, %v450_v41 }
 0x2e7   :  { %v466_v44 = vrot.slane %v8813_v42, 7 }
 0x2e8   :  { %v448_v43 = vpop.permute.xlu1 %447 }
 0x2e9   :  { %v8816_v45 = vmul.f32 %v7933_v30, %v448_v43 }
 0x2eb   :  { %v468_v46 = vsel %vm467_vm2, %v466_v44, %v8816_v45 }
 0x2ec   :  { %469 = vrot.lane.b32.xlu0 %v468_v46, %s8553_s24 }
 0x35e   :  { %v470_v47 = vpop.permute.xlu0 %469 }
 0x35f   :  { %7430 = vmatmul.mubr.msk.f32.vlgmr.msra.gmra.mxu0 %vm327_vm3, %v470_v47 }
 0x360   :  { %7444 = vmatpush3.msra.mxu0 %v8751_v2  ;;  %7451 = vmatprep.mubr.msk.f32.mxu0 %vm8551_vm0, %v8550_v0 }
 0x361   :  { %7445 = vmatprep.subr.mxu0 %v8550_v0 }
 0x362   :  { %7446 = vmatpush3.msra.mxu0 %v8757_v4 }
 0x363   :  { %7447 = vmatprep.subr.mxu0 %v8550_v0 }
 0x364   :  { %7448 = vmatpush3.msra.mxu0 %v8764_v7 }
 0x365   :  { %7449 = vmatprep.subr.mxu0 %v8550_v0 }
 0x366   :  { %7450 = vmatpush3.msra.mxu0 %v8770_v8 }
 0x367   :  { %7465 = vmatprep.subr.mxu0 %v8550_v0 }
 0x41f   :  { %v539_v48 = vpop.f32.mrf.mxu0 }
 0x420   :  { %v544_v49 = vrot.slane %v539_v48, 7  ;;  %v548_v50 = vadd.f32 %v539_v48, %v8801_v11 }
 0x421   :  { %v7431_v51 = vpop.f32.mrf.mxu0 }
 0x422   :  { %v547_v52 = vadd.f32 %v544_v49, %v8803_v15  ;;  %7938 = vtanh.f32 %v548_v50  ;;  %v7017_v55 = vmul.f32 -1.442695, %v548_v50 }
 0x424   :  { %7940 = vtanh.f32 %v547_v52  ;;  %v7016_v56 = vmul.f32 -1.442695, %v547_v52 }
 0x425   :  { %7942 = vpow2.f32 %v7017_v55 }
 0x426   :  { %7944 = vpow2.f32 %v7016_v56 }
 0x42f   :  { %v7939_v53 = vpop.eup %7938 }
 0x430   :  { %575 = vrot.lane.b32.xlu0 %v7939_v53, %s8552_s17 }
 0x431   :  { %v7941_v54 = vpop.eup %7940 }
 0x432   :  { %573 = vrot.lane.b32.xlu1 %v7941_v54, %s8552_s17  ;;  %v7943_v57 = vpop.eup %7942 }
 0x433   :  { %v7945_v58 = vpop.eup %7944  ;;  %v556_v59 = vadd.f32 1.0, %v7943_v57 }
 0x434   :  { %v555_v60 = vadd.f32 1.0, %v7945_v58 }
 0x435   :  { %7946 = vrcp.f32 %v556_v59 }
 0x436   :  { %7948 = vrcp.f32 %v555_v60 }
 0x442   :  { %v7947_v61 = vpop.eup %7946 }
 0x443   :  { %v7949_v1 = vpop.eup %7948  ;;  %v570_v9 = vmul.f32 %v7947_v61, %v566_v6 }
 0x444   :  { %v569_v14 = vmul.f32 %v7949_v1, %v565_v10 }
 0x4a2   :  { %v576_v62 = vpop.permute.xlu0 %575 }
 0x4a3   :  { %v580_v63 = vmul.f32 %v7947_v61, %v576_v62 }
 0x4a4   :  { %v574_v3 = vpop.permute.xlu1 %573 }
 0x4a5   :  { %585 = vrot.lane.b32.xlu0 %v580_v63, %s8552_s17  ;;  %v579_v5 = vmul.f32 %v7949_v1, %v574_v3 }
 0x4a7   :  { %583 = vrot.lane.b32.xlu1 %v579_v5, %s8552_s17 }
 0x517   :  { %v586_v12 = vpop.permute.xlu0 %585 }
 0x518   :  { %v590_v13 = vadd.f32 %v586_v12, %v570_v9 }
 0x519   :  { %v584_v16 = vpop.permute.xlu1 %583 }
 0x51a   :  { %7950 = vtanh.f32 %v590_v13  ;;  %v589_v17 = vadd.f32 %v584_v16, %v569_v14  ;;  %v714_v50 = vrot.slane %v590_v13, 7 }
 0x51c   :  { %7952 = vtanh.f32 %v589_v17  ;;  %v713_v49 = vrot.slane %v589_v17, 7 }
 0x527   :  { %v7951_v18 = vpop.eup %7950 }
 0x528   :  { %597 = vrot.lane.b32.xlu0 %v7951_v18, %s8552_s17 }
 0x529   :  { %v7953_v19 = vpop.eup %7952 }
 0x52a   :  { %595 = vrot.lane.b32.xlu1 %v7953_v19, %s8552_s17 }
 0x59a   :  { %v598_v20 = vpop.permute.xlu0 %597 }
 0x59b   :  { %v8842_v23 = vmul.f32 %v7947_v61, %v598_v20 }
 0x59c   :  { %v596_v21 = vpop.permute.xlu1 %595 }
 0x59d   :  { %v8840_v22 = vmul.f32 %v7949_v1, %v596_v21 }
 0x59f   :  { %v614_v24 = vrot.slane %v8840_v22, 1 }
 0x5a1   :  { %v615_v25 = vsel %vm467_vm2, %v8842_v23, %v614_v24 }
 0x5a2   :  { %616 = vrot.lane.b32.xlu1 %v615_v25, %s8553_s24 }
 0x614   :  { %v617_v26 = vpop.permute.xlu1 %616 }
 0x615   :  { %7441 = vmatmul.mubr.msk.f32.vlgmr.msra.gmra.mxu1 %vm327_vm3, %v617_v26 }
 0x616   :  { %7455 = vmatpush3.msra.mxu1 %v8751_v2  ;;  %7462 = vmatprep.mubr.msk.f32.mxu1 %vm8551_vm0, %v8550_v0 }
 0x617   :  { %7456 = vmatprep.subr.mxu1 %v8550_v0 }
 0x618   :  { %7457 = vmatpush3.msra.mxu1 %v8757_v4 }
 0x619   :  { %7458 = vmatprep.subr.mxu1 %v8550_v0 }
 0x61a   :  { %7459 = vmatpush3.msra.mxu1 %v8764_v7 }
 0x61b   :  { %7460 = vmatprep.subr.mxu1 %v8550_v0 }
 0x61c   :  { %7461 = vmatpush3.msra.mxu1 %v8770_v8 }
 0x61d   :  { %7476 = vmatprep.subr.mxu1 %v8550_v0 }
 0x6d5   :  { %v686_v27 = vpop.f32.mrf.mxu1 }
 0x6d6   :  { %v691_v28 = vrot.slane %v686_v27, 6  ;;  %v692_v29 = vrot.slane %v686_v27, 7 }
 0x6d7   :  { %v7442_v30 = vpop.f32.mrf.mxu1 }
 0x6d8   :  { %v695_v31 = vadd.f32 %v691_v28, %v8803_v15  ;;  %v696_v32 = vadd.f32 %v692_v29, %v8801_v11 }
 0x6da   :  { %7954 = vtanh.f32 %v695_v31  ;;  %v7019_v35 = vmul.f32 -1.442695, %v695_v31  ;;  %v7020_v36 = vmul.f32 -1.442695, %v696_v32 }
 0x6db   :  { %7956 = vtanh.f32 %v696_v32 }
 0x6dc   :  { %7958 = vpow2.f32 %v7019_v35 }
 0x6dd   :  { %7960 = vpow2.f32 %v7020_v36 }
 0x6e7   :  { %v7955_v33 = vpop.eup %7954 }
 0x6e8   :  { %v7957_v34 = vpop.eup %7956  ;;  %721 = vrot.lane.b32.xlu0 %v7955_v33, %s8552_s17 }
 0x6e9   :  { %723 = vrot.lane.b32.xlu1 %v7957_v34, %s8552_s17  ;;  %v7959_v37 = vpop.eup %7958 }
 0x6ea   :  { %v7961_v38 = vpop.eup %7960  ;;  %v703_v39 = vadd.f32 1.0, %v7959_v37 }
 0x6eb   :  { %v704_v40 = vadd.f32 1.0, %v7961_v38 }
 0x6ec   :  { %7962 = vrcp.f32 %v703_v39 }
 0x6ed   :  { %7964 = vrcp.f32 %v704_v40 }
 0x6f9   :  { %v7963_v41 = vpop.eup %7962 }
 0x6fa   :  { %v7965_v44 = vpop.eup %7964  ;;  %v717_v51 = vmul.f32 %v7963_v41, %v713_v49 }
 0x6fb   :  { %v718_v52 = vmul.f32 %v7965_v44, %v714_v50 }
 0x75a   :  { %v722_v43 = vpop.permute.xlu0 %721 }
 0x75b   :  { %v724_v46 = vpop.permute.xlu1 %723  ;;  %v727_v47 = vmul.f32 %v7963_v41, %v722_v43 }
 0x75c   :  { %v728_v48 = vmul.f32 %v7965_v44, %v724_v46 }
 0x75d   :  { %731 = vrot.lane.b32.xlu0 %v727_v47, %s8552_s17 }
 0x75e   :  { %733 = vrot.lane.b32.xlu1 %v728_v48, %s8552_s17 }
 0x7cf   :  { %v732_v53 = vpop.permute.xlu0 %731 }
 0x7d0   :  { %v734_v54 = vpop.permute.xlu1 %733  ;;  %v737_v55 = vadd.f32 %v732_v53, %v717_v51 }
 0x7d1   :  { %v738_v56 = vadd.f32 %v734_v54, %v718_v52 }
 0x7d2   :  { %7966 = vtanh.f32 %v737_v55  ;;  %v862_v32 = vrot.slane %v737_v55, 7 }
 0x7d3   :  { %7968 = vtanh.f32 %v738_v56  ;;  %v863_v33 = vrot.slane %v738_v56, 7 }
 0x7df   :  { %v7967_v57 = vpop.eup %7966 }
 0x7e0   :  { %v7969_v58 = vpop.eup %7968  ;;  %743 = vrot.lane.b32.xlu0 %v7967_v57, %s8552_s17 }
 0x7e1   :  { %745 = vrot.lane.b32.xlu1 %v7969_v58, %s8552_s17 }
 0x852   :  { %v744_v59 = vpop.permute.xlu0 %743 }
 0x853   :  { %v746_v60 = vpop.permute.xlu1 %745  ;;  %v8867_v61 = vmul.f32 %v7963_v41, %v744_v59 }
 0x854   :  { %v8869_v62 = vmul.f32 %v7965_v44, %v746_v60 }
 0x855   :  { %v762_v63 = vrot.slane %v8867_v61, 2 }
 0x856   :  { %v763_v1 = vrot.slane %v8869_v62, 1 }
 0x858   :  { %v764_v3 = vsel %vm467_vm2, %v763_v1, %v762_v63 }
 0x859   :  { %765 = vrot.lane.b32.xlu0 %v764_v3, %s8553_s24 }
 0x8cb   :  { %v766_v5 = vpop.permute.xlu0 %765 }
 0x8cc   :  { %7452 = vmatmul.mubr.msk.f32.vlgmr.msra.gmra.mxu0 %vm327_vm3, %v766_v5 }
 0x8cd   :  { %7466 = vmatpush3.msra.mxu0 %v8751_v2  ;;  %7473 = vmatprep.mubr.msk.f32.mxu0 %vm8551_vm0, %v8550_v0 }
 0x8ce   :  { %7467 = vmatprep.subr.mxu0 %v8550_v0 }
 0x8cf   :  { %7468 = vmatpush3.msra.mxu0 %v8757_v4 }
 0x8d0   :  { %7469 = vmatprep.subr.mxu0 %v8550_v0 }
 0x8d1   :  { %7470 = vmatpush3.msra.mxu0 %v8764_v7 }
 0x8d2   :  { %7471 = vmatprep.subr.mxu0 %v8550_v0 }
 0x8d3   :  { %7472 = vmatpush3.msra.mxu0 %v8770_v8 }
 0x8d4   :  { %7487 = vmatprep.subr.mxu0 %v8550_v0 }
 0x98c   :  { %v835_v6 = vpop.f32.mrf.mxu0 }
 0x98d   :  { %v840_v9 = vrot.slane %v835_v6, 5  ;;  %v841_v10 = vrot.slane %v835_v6, 6 }
 0x98e   :  { %v7453_v12 = vpop.f32.mrf.mxu0 }
 0x98f   :  { %v844_v13 = vadd.f32 %v840_v9, %v8803_v15  ;;  %v845_v14 = vadd.f32 %v841_v10, %v8801_v11 }
 0x991   :  { %7970 = vtanh.f32 %v844_v13  ;;  %v7022_v18 = vmul.f32 -1.442695, %v844_v13  ;;  %v7023_v19 = vmul.f32 -1.442695, %v845_v14 }
 0x992   :  { %7972 = vtanh.f32 %v845_v14 }
 0x993   :  { %7974 = vpow2.f32 %v7022_v18 }
 0x994   :  { %7976 = vpow2.f32 %v7023_v19 }
 0x99e   :  { %v7971_v16 = vpop.eup %7970 }
 0x99f   :  { %v7973_v17 = vpop.eup %7972  ;;  %870 = vrot.lane.b32.xlu1 %v7971_v16, %s8552_s17 }
 0x9a0   :  { %872 = vrot.lane.b32.xlu0 %v7973_v17, %s8552_s17  ;;  %v7975_v20 = vpop.eup %7974 }
 0x9a1   :  { %v7977_v21 = vpop.eup %7976  ;;  %v852_v24 = vadd.f32 1.0, %v7975_v20 }
 0x9a2   :  { %v853_v25 = vadd.f32 1.0, %v7977_v21 }
 0x9a3   :  { %7978 = vrcp.f32 %v852_v24 }
 0x9a4   :  { %7980 = vrcp.f32 %v853_v25 }
 0x9b0   :  { %v7979_v26 = vpop.eup %7978 }
 0x9b1   :  { %v7981_v28 = vpop.eup %7980  ;;  %v866_v34 = vmul.f32 %v7979_v26, %v862_v32 }
 0x9b2   :  { %v867_v35 = vmul.f32 %v7981_v28, %v863_v33 }
 0xa11   :  { %v871_v27 = vpop.permute.xlu1 %870 }
 0xa12   :  { %v873_v29 = vpop.permute.xlu0 %872  ;;  %v876_v30 = vmul.f32 %v7979_v26, %v871_v27 }
 0xa13   :  { %v877_v31 = vmul.f32 %v7981_v28, %v873_v29 }
 0xa14   :  { %880 = vrot.lane.b32.xlu1 %v876_v30, %s8552_s17 }
 0xa15   :  { %882 = vrot.lane.b32.xlu0 %v877_v31, %s8552_s17 }
 0xa86   :  { %v881_v36 = vpop.permute.xlu1 %880 }
 0xa87   :  { %v883_v37 = vpop.permute.xlu0 %882  ;;  %v886_v38 = vadd.f32 %v881_v36, %v866_v34 }
 0xa88   :  { %v887_v39 = vadd.f32 %v883_v37, %v867_v35 }
 0xa89   :  { %7982 = vtanh.f32 %v886_v38  ;;  %v1011_v17 = vrot.slane %v886_v38, 7 }
 0xa8a   :  { %7984 = vtanh.f32 %v887_v39  ;;  %v1012_v18 = vrot.slane %v887_v39, 7 }
 0xa96   :  { %v7983_v40 = vpop.eup %7982 }
 0xa97   :  { %v7985_v41 = vpop.eup %7984  ;;  %892 = vrot.lane.b32.xlu1 %v7983_v40, %s8552_s17 }
 0xa98   :  { %894 = vrot.lane.b32.xlu0 %v7985_v41, %s8552_s17 }
 0xb09   :  { %v893_v43 = vpop.permute.xlu1 %892 }
 0xb0a   :  { %v895_v44 = vpop.permute.xlu0 %894  ;;  %v8894_v46 = vmul.f32 %v7979_v26, %v893_v43 }
 0xb0b   :  { %v8896_v47 = vmul.f32 %v7981_v28, %v895_v44 }
 0xb0c   :  { %v911_v48 = vrot.slane %v8894_v46, 3 }
 0xb0d   :  { %v912_v49 = vrot.slane %v8896_v47, 2 }
 0xb0f   :  { %v913_v50 = vsel %vm467_vm2, %v912_v49, %v911_v48 }
 0xb10   :  { %914 = vrot.lane.b32.xlu1 %v913_v50, %s8553_s24 }
 0xb82   :  { %v915_v51 = vpop.permute.xlu1 %914 }
 0xb83   :  { %7463 = vmatmul.mubr.msk.f32.vlgmr.msra.gmra.mxu1 %vm327_vm3, %v915_v51 }
 0xb84   :  { %7477 = vmatpush3.msra.mxu1 %v8751_v2  ;;  %7484 = vmatprep.mubr.msk.f32.mxu1 %vm8551_vm0, %v8550_v0 }
 0xb85   :  { %7478 = vmatprep.subr.mxu1 %v8550_v0 }
 0xb86   :  { %7479 = vmatpush3.msra.mxu1 %v8757_v4 }
 0xb87   :  { %7480 = vmatprep.subr.mxu1 %v8550_v0 }
 0xb88   :  { %7481 = vmatpush3.msra.mxu1 %v8764_v7 }
 0xb89   :  { %7482 = vmatprep.subr.mxu1 %v8550_v0 }
 0xb8a   :  { %7483 = vmatpush3.msra.mxu1 %v8770_v8 }
 0xc43   :  { %v984_v52 = vpop.f32.mrf.mxu1 }
 0xc44   :  { %v989_v53 = vrot.slane %v984_v52, 4  ;;  %v990_v54 = vrot.slane %v984_v52, 5 }
 0xc45   :  { %v7464_v55 = vpop.f32.mrf.mxu1 }
 0xc46   :  { %v993_v56 = vadd.f32 %v989_v53, %v8803_v15  ;;  %v994_v57 = vadd.f32 %v990_v54, %v8801_v11 }
 0xc48   :  { %7986 = vtanh.f32 %v993_v56  ;;  %v7025_v60 = vmul.f32 -1.442695, %v993_v56  ;;  %v7026_v63 = vmul.f32 -1.442695, %v994_v57 }
 0xc49   :  { %7988 = vtanh.f32 %v994_v57 }
 0xc4a   :  { %7990 = vpow2.f32 %v7025_v60 }
 0xc4b   :  { %7992 = vpow2.f32 %v7026_v63 }
 0xc55   :  { %v7987_v58 = vpop.eup %7986 }
 0xc56   :  { %v7989_v59 = vpop.eup %7988  ;;  %1019 = vrot.lane.b32.xlu0 %v7987_v58, %s8552_s17 }
 0xc57   :  { %1021 = vrot.lane.b32.xlu1 %v7989_v59, %s8552_s17  ;;  %v7991_v1 = vpop.eup %7990 }
 0xc58   :  { %v7993_v3 = vpop.eup %7992  ;;  %v1001_v5 = vadd.f32 1.0, %v7991_v1 }
 0xc59   :  { %v1002_v6 = vadd.f32 1.0, %v7993_v3 }
 0xc5a   :  { %7994 = vrcp.f32 %v1001_v5 }
 0xc5b   :  { %7996 = vrcp.f32 %v1002_v6 }
 0xc67   :  { %v7995_v9 = vpop.eup %7994 }
 0xc68   :  { %v7997_v12 = vpop.eup %7996  ;;  %v1015_v19 = vmul.f32 %v7995_v9, %v1011_v17 }
 0xc69   :  { %v1016_v20 = vmul.f32 %v7997_v12, %v1012_v18 }
 0xcc8   :  { %v1020_v10 = vpop.permute.xlu0 %1019 }
 0xcc9   :  { %v1022_v13 = vpop.permute.xlu1 %1021  ;;  %v1025_v14 = vmul.f32 %v7995_v9, %v1020_v10 }
 0xcca   :  { %v1026_v16 = vmul.f32 %v7997_v12, %v1022_v13 }
 0xccb   :  { %1029 = vrot.lane.b32.xlu0 %v1025_v14, %s8552_s17 }
 0xccc   :  { %1031 = vrot.lane.b32.xlu1 %v1026_v16, %s8552_s17 }
 0xd3d   :  { %v1030_v21 = vpop.permute.xlu0 %1029 }
 0xd3e   :  { %v1032_v24 = vpop.permute.xlu1 %1031  ;;  %v1035_v25 = vadd.f32 %v1030_v21, %v1015_v19 }
 0xd3f   :  { %v1036_v26 = vadd.f32 %v1032_v24, %v1016_v20 }
 0xd40   :  { %7998 = vtanh.f32 %v1035_v25  ;;  %v1160_v57 = vrot.slane %v1035_v25, 7 }
 0xd41   :  { %8000 = vtanh.f32 %v1036_v26  ;;  %v1161_v58 = vrot.slane %v1036_v26, 7 }
 0xd4d   :  { %v7999_v27 = vpop.eup %7998 }
 0xd4e   :  { %v8001_v28 = vpop.eup %8000  ;;  %1041 = vrot.lane.b32.xlu0 %v7999_v27, %s8552_s17 }
 0xd4f   :  { %1043 = vrot.lane.b32.xlu1 %v8001_v28, %s8552_s17 }
 0xdc0   :  { %v1042_v29 = vpop.permute.xlu0 %1041 }
 0xdc1   :  { %v1044_v30 = vpop.permute.xlu1 %1043  ;;  %v8920_v31 = vmul.f32 %v7995_v9, %v1042_v29 }
 0xdc2   :  { %v8922_v32 = vmul.f32 %v7997_v12, %v1044_v30 }
 0xdc3   :  { %v1060_v33 = vrot.slane %v8920_v31, 4 }
 0xdc4   :  { %v1061_v34 = vrot.slane %v8922_v32, 3 }
 0xdc6   :  { %v1062_v35 = vsel %vm467_vm2, %v1061_v34, %v1060_v33 }
 0xdc7   :  { %1063 = vrot.lane.b32.xlu0 %v1062_v35, %s8553_s24 }
 0xe39   :  { %v1064_v36 = vpop.permute.xlu0 %1063 }
 0xe3a   :  { %7474 = vmatmul.mubr.msk.f32.vlgmr.msra.gmra.mxu0 %vm327_vm3, %v1064_v36 }
 0xe3b   :  { %7488 = vmatpush3.msra.mxu0 %v8751_v2  ;;  %7495 = vmatprep.mubr.msk.f32.mxu0 %vm8551_vm0, %v8550_v0 }
 0xe3c   :  { %7489 = vmatprep.subr.mxu0 %v8550_v0 }
 0xe3d   :  { %7490 = vmatpush3.msra.mxu0 %v8757_v4 }
 0xe3e   :  { %7491 = vmatprep.subr.mxu0 %v8550_v0 }
 0xe3f   :  { %7492 = vmatpush3.msra.mxu0 %v8764_v7 }
 0xe40   :  { %7493 = vmatprep.subr.mxu0 %v8550_v0 }
 0xe41   :  { %7494 = vmatpush3.msra.mxu0 %v8770_v8 }
 0xe42   :  { %7509 = vmatprep.subr.mxu0 %v8550_v0 }
 0xefa   :  { %v1133_v37 = vpop.f32.mrf.mxu0 }
 0xefb   :  { %v1138_v38 = vrot.slane %v1133_v37, 3  ;;  %v1139_v2 = vrot.slane %v1133_v37, 4 }
 0xefc   :  { %v7475_v39 = vpop.f32.mrf.mxu0 }
 0xefd   :  { %v1142_v40 = vadd.f32 %v1138_v38, %v8803_v15  ;;  %v1143_v41 = vadd.f32 %v1139_v2, %v8801_v11 }
 0xeff   :  { %8002 = vtanh.f32 %v1142_v40  ;;  %v7028_v7 = vmul.f32 -1.442695, %v1142_v40  ;;  %v7029_v8 = vmul.f32 -1.442695, %v1143_v41 }
 0xf00   :  { %8004 = vtanh.f32 %v1143_v41 }
 0xf01   :  { %8006 = vpow2.f32 %v7028_v7 }
 0xf02   :  { %8008 = vpow2.f32 %v7029_v8 }
 0xf0c   :  { %v8003_v4 = vpop.eup %8002 }
 0xf0d   :  { %v8005_v43 = vpop.eup %8004  ;;  %1168 = vrot.lane.b32.xlu1 %v8003_v4, %s8552_s17 }
 0xf0e   :  { %1170 = vrot.lane.b32.xlu0 %v8005_v43, %s8552_s17  ;;  %v8007_v44 = vpop.eup %8006 }
 0xf0f   :  { %v8009_v48 = vpop.eup %8008  ;;  %v1150_v49 = vadd.f32 1.0, %v8007_v44 }
 0xf10   :  { %v1151_v50 = vadd.f32 1.0, %v8009_v48 }
 0xf11   :  { %8010 = vrcp.f32 %v1150_v49 }
 0xf12   :  { %8012 = vrcp.f32 %v1151_v50 }
 0xf1e   :  { %v8011_v51 = vpop.eup %8010 }
 0xf1f   :  { %v8013_v53 = vpop.eup %8012  ;;  %v1164_v59 = vmul.f32 %v8011_v51, %v1160_v57 }
 0xf20   :  { %v1165_v60 = vmul.f32 %v8013_v53, %v1161_v58 }
 0xf7f   :  { %v1169_v52 = vpop.permute.xlu1 %1168 }
 0xf80   :  { %v1171_v54 = vpop.permute.xlu0 %1170  ;;  %v1174_v55 = vmul.f32 %v8011_v51, %v1169_v52 }
 0xf81   :  { %v1175_v56 = vmul.f32 %v8013_v53, %v1171_v54 }
 0xf82   :  { %1178 = vrot.lane.b32.xlu1 %v1174_v55, %s8552_s17 }
 0xf83   :  { %1180 = vrot.lane.b32.xlu0 %v1175_v56, %s8552_s17 }
 0xff4   :  { %v1179_v63 = vpop.permute.xlu1 %1178 }
 0xff5   :  { %v1181_v1 = vpop.permute.xlu0 %1180  ;;  %v1184_v3 = vadd.f32 %v1179_v63, %v1164_v59 }
 0xff6   :  { %v1185_v5 = vadd.f32 %v1181_v1, %v1165_v60 }
 0xff7   :  { %8014 = vtanh.f32 %v1184_v3  ;;  %v1309_v43 = vrot.slane %v1184_v3, 7 }
 0xff8   :  { %8016 = vtanh.f32 %v1185_v5  ;;  %v1310_v7 = vrot.slane %v1185_v5, 7 }
0x1004   :  { %v8015_v6 = vpop.eup %8014 }
0x1005   :  { %v8017_v9 = vpop.eup %8016  ;;  %1190 = vrot.lane.b32.xlu1 %v8015_v6, %s8552_s17 }
0x1006   :  { %1192 = vrot.lane.b32.xlu0 %v8017_v9, %s8552_s17 }
0x1077   :  { %v1191_v10 = vpop.permute.xlu1 %1190 }
0x1078   :  { %v1193_v12 = vpop.permute.xlu0 %1192  ;;  %v8947_v13 = vmul.f32 %v8011_v51, %v1191_v10 }
0x1079   :  { %v8949_v14 = vmul.f32 %v8013_v53, %v1193_v12 }
0x107a   :  { %v1209_v16 = vrot.slane %v8947_v13, 5 }
0x107b   :  { %v1210_v17 = vrot.slane %v8949_v14, 4 }
0x107d   :  { %v1211_v18 = vsel %vm467_vm2, %v1210_v17, %v1209_v16 }
0x107e   :  { %1212 = vrot.lane.b32.xlu1 %v1211_v18, %s8553_s24 }
0x10f0   :  { %v1213_v19 = vpop.permute.xlu1 %1212 }
0x10f1   :  { %7485 = vmatmul.mubr.msk.f32.vlgmr.msra.gmra.mxu1 %vm327_vm3, %v1213_v19 }
0x11b1   :  { %v1282_v20 = vpop.f32.mrf.mxu1 }
0x11b2   :  { %v1287_v21 = vrot.slane %v1282_v20, 2  ;;  %v1288_v24 = vrot.slane %v1282_v20, 3 }
0x11b3   :  { %v7486_v25 = vpop.f32.mrf.mxu1 }
0x11b4   :  { %v1291_v26 = vadd.f32 %v1287_v21, %v8803_v15  ;;  %v1292_v27 = vadd.f32 %v1288_v24, %v8801_v11 }
0x11b6   :  { %8018 = vtanh.f32 %v1291_v26  ;;  %v7031_v30 = vmul.f32 -1.442695, %v1291_v26  ;;  %v7032_v33 = vmul.f32 -1.442695, %v1292_v27 }
0x11b7   :  { %8020 = vtanh.f32 %v1292_v27 }
0x11b8   :  { %8022 = vpow2.f32 %v7031_v30 }
0x11b9   :  { %8024 = vpow2.f32 %v7032_v33 }
0x11c3   :  { %v8019_v28 = vpop.eup %8018 }
0x11c4   :  { %v8021_v29 = vpop.eup %8020  ;;  %1317 = vrot.lane.b32.xlu0 %v8019_v28, %s8552_s17 }
0x11c5   :  { %1319 = vrot.lane.b32.xlu1 %v8021_v29, %s8552_s17  ;;  %v8023_v34 = vpop.eup %8022 }
0x11c6   :  { %v8025_v35 = vpop.eup %8024  ;;  %v1299_v36 = vadd.f32 1.0, %v8023_v34 }
0x11c7   :  { %v1300_v37 = vadd.f32 1.0, %v8025_v35 }
0x11c8   :  { %8026 = vrcp.f32 %v1299_v36 }
0x11c9   :  { %8028 = vrcp.f32 %v1300_v37 }
0x11d5   :  { %v8027_v38 = vpop.eup %8026 }
0x11d6   :  { %v8029_v39 = vpop.eup %8028  ;;  %v1313_v8 = vmul.f32 %v8027_v38, %v1309_v43 }
0x11d7   :  { %v1314_v44 = vmul.f32 %v8029_v39, %v1310_v7 }
0x1236   :  { %v1318_v2 = vpop.permute.xlu0 %1317 }
0x1237   :  { %v1320_v40 = vpop.permute.xlu1 %1319  ;;  %v1323_v41 = vmul.f32 %v8027_v38, %v1318_v2 }
0x1238   :  { %v1324_v4 = vmul.f32 %v8029_v39, %v1320_v40 }
0x1239   :  { %1327 = vrot.lane.b32.xlu0 %v1323_v41, %s8552_s17 }
0x123a   :  { %1329 = vrot.lane.b32.xlu1 %v1324_v4, %s8552_s17 }
0x12ab   :  { %v1328_v48 = vpop.permute.xlu0 %1327 }
0x12ac   :  { %v1330_v49 = vpop.permute.xlu1 %1329  ;;  %v1333_v50 = vadd.f32 %v1328_v48, %v1313_v8 }
0x12ad   :  { %v1334_v51 = vadd.f32 %v1330_v49, %v1314_v44 }
0x12ae   :  { %8030 = vtanh.f32 %v1333_v50  ;;  %v1458_v29 = vrot.slane %v1333_v50, 7 }
0x12af   :  { %8032 = vtanh.f32 %v1334_v51  ;;  %v1459_v30 = vrot.slane %v1334_v51, 7 }
0x12bb   :  { %v8031_v52 = vpop.eup %8030 }
0x12bc   :  { %v8033_v53 = vpop.eup %8032  ;;  %1339 = vrot.lane.b32.xlu0 %v8031_v52, %s8552_s17 }
0x12bd   :  { %1341 = vrot.lane.b32.xlu1 %v8033_v53, %s8552_s17 }
0x132e   :  { %v1340_v54 = vpop.permute.xlu0 %1339 }
0x132f   :  { %v1342_v55 = vpop.permute.xlu1 %1341  ;;  %v1345_v56 = vmul.f32 %v8027_v38, %v1340_v54 }
0x1330   :  { %v8964_v57 = vmul.f32 %v8029_v39, %v1342_v55 }
0x1331   :  { %v1358_v58 = vrot.slane %v1345_v56, 6 }
0x1332   :  { %v1359_v59 = vrot.slane %v8964_v57, 5 }
0x1334   :  { %v1360_v60 = vsel %vm467_vm2, %v1359_v59, %v1358_v58 }
0x1335   :  { %1361 = vrot.lane.b32.xlu0 %v1360_v60, %s8553_s24 }
0x13a7   :  { %v1362_v63 = vpop.permute.xlu0 %1361 }
0x13a8   :  { %7496 = vmatmul.mubr.msk.f32.vlgmr.msra.gmra.mxu0 %vm327_vm3, %v1362_v63  ;;  %v7036_v63 = vld [vmem:[%s9818_s6] ss:$0 sm:$0xff] }
0x13a9   :  { %7517 = vmatprep.mubr.msk.f32.mxu0 %vm8551_vm0, %v8550_v0 }
0x1468   :  { %v1431_v1 = vpop.f32.mrf.mxu0 }
0x1469   :  { %v1436_v3 = vrot.slane %v1431_v1, 1  ;;  %v1437_v5 = vrot.slane %v1431_v1, 2 }
0x146a   :  { %v7497_v6 = vpop.f32.mrf.mxu0 }
0x146b   :  { %v1440_v9 = vadd.f32 %v1436_v3, %v8803_v15  ;;  %v1441_v10 = vadd.f32 %v1437_v5, %v8801_v11 }
0x146d   :  { %8034 = vtanh.f32 %v1440_v9  ;;  %v7034_v17 = vmul.f32 -1.442695, %v1440_v9  ;;  %v7035_v18 = vmul.f32 -1.442695, %v1441_v10 }
0x146e   :  { %8036 = vtanh.f32 %v1441_v10 }
0x146f   :  { %8038 = vpow2.f32 %v7034_v17 }
0x1470   :  { %8040 = vpow2.f32 %v7035_v18 }
0x147a   :  { %v8035_v12 = vpop.eup %8034 }
0x147b   :  { %v8037_v16 = vpop.eup %8036  ;;  %1466 = vrot.lane.b32.xlu1 %v8035_v12, %s8552_s17 }
0x147c   :  { %1468 = vrot.lane.b32.xlu0 %v8037_v16, %s8552_s17  ;;  %v8039_v19 = vpop.eup %8038 }
0x147d   :  { %v8041_v20 = vpop.eup %8040  ;;  %v1448_v21 = vadd.f32 1.0, %v8039_v19 }
0x147e   :  { %v1449_v24 = vadd.f32 1.0, %v8041_v20 }
0x147f   :  { %8042 = vrcp.f32 %v1448_v21 }
0x1480   :  { %8044 = vrcp.f32 %v1449_v24 }
0x148c   :  { %v8043_v15 = vpop.eup %8042 }
0x148d   :  { %v8976_v25 = vpop.eup %8044  ;;  %v1462_v33 = vmul.f32 %v8043_v15, %v1458_v29 }
0x148e   :  { %v1463_v34 = vmul.f32 %v8976_v25, %v1459_v30 }
0x14ed   :  { %v1467_v11 = vpop.permute.xlu1 %1466 }
0x14ee   :  { %v1469_v26 = vpop.permute.xlu0 %1468  ;;  %v1472_v27 = vmul.f32 %v8043_v15, %v1467_v11 }
0x14ef   :  { %v1473_v28 = vmul.f32 %v8976_v25, %v1469_v26 }
0x14f0   :  { %1476 = vrot.lane.b32.xlu1 %v1472_v27, %s8552_s17 }
0x14f1   :  { %1478 = vrot.lane.b32.xlu0 %v1473_v28, %s8552_s17 }
0x1562   :  { %v1477_v35 = vpop.permute.xlu1 %1476 }
0x1563   :  { %v1479_v36 = vpop.permute.xlu0 %1478  ;;  %v1482_v37 = vadd.f32 %v1477_v35, %v1462_v33 }
0x1564   :  { %v1483_v38 = vadd.f32 %v1479_v36, %v1463_v34 }
0x1565   :  { %8046 = vtanh.f32 %v1482_v37 }
0x1566   :  { %8048 = vtanh.f32 %v1483_v38 }
0x1572   :  { %v8047_v2 = vpop.eup %8046 }
0x1573   :  { %v8049_v39 = vpop.eup %8048  ;;  %1488 = vrot.lane.b32.xlu1 %v8047_v2, %s8552_s17 }
0x1574   :  { %1490 = vrot.lane.b32.xlu0 %v8049_v39, %s8552_s17 }
0x1577   :  { %457 = vrot.lane.b32.xlu1 %v8816_v45, %s8553_s24  ;;  %v9011_v45 = vld [vmem:[#allocation8 + $0x18] sm:$0xff] }
0x1578   :  { %605 = vrot.lane.b32.xlu0 %v8840_v22, %s8553_s24  ;;  %7510 = vmatpush3.msra.mxu0 %v9011_v45  ;;  %v9018_v22 = vld [vmem:[#allocation8 + $0x10] sm:$0xff] }
0x1579   :  { %7511 = vmatprep.subr.mxu0 %v8550_v0 }
0x157a   :  { %7512 = vmatpush3.msra.mxu0 %v9018_v22 }
0x157b   :  { %753 = vrot.lane.b32.xlu1 %v8867_v61, %s8553_s24  ;;  %v9024_v61 = vld [vmem:[#allocation8 + $0x8] sm:$0xff]  ;;  %7513 = vmatprep.subr.mxu0 %v8550_v0 }
0x157c   :  { %902 = vrot.lane.b32.xlu0 %v8894_v46, %s8553_s24  ;;  %7514 = vmatpush3.msra.mxu0 %v9024_v61  ;;  %v9032_v46 = vld [vmem:[#allocation8] sm:$0xff] }
0x157d   :  { %7515 = vmatprep.subr.mxu0 %v8550_v0 }
0x157e   :  { %7516 = vmatpush3.msra.mxu0 %v9032_v46 }
0x157f   :  { %1051 = vrot.lane.b32.xlu1 %v8920_v31, %s8553_s24  ;;  %7518 = vmatmul.mubr.f32.vlgmr.msra.gmra.mxu0 %v8550_v0 }
0x1580   :  { %1200 = vrot.lane.b32.xlu0 %v8947_v13, %s8553_s24  ;;  %7531 = vmatprep.subr.mxu0 %v8550_v0 }
0x1581   :  { %7532 = vmatpush3.msra.mxu0 %v9011_v45  ;;  %7539 = vmatprep.mubr.msk.f32.mxu0 %vm8551_vm0, %v8550_v0 }
0x1582   :  { %7533 = vmatprep.subr.mxu0 %v8550_v0 }
0x1583   :  { %1349 = vrot.lane.b32.xlu1 %v1345_v56, %s8553_s24  ;;  %7534 = vmatpush3.msra.mxu0 %v9018_v22 }
0x1584   :  { %607 = vrot.lane.b32.xlu0 %v8842_v23, %s8553_s24  ;;  %v1515_v23 = vld [vmem:[%s9847_s12 + $0x10] sm:$0xff]  ;;  %7535 = vmatprep.subr.mxu0 %v8550_v0 }
0x1585   :  { %7536 = vmatpush3.msra.mxu0 %v9024_v61 }
0x1586   :  { %7537 = vmatprep.subr.mxu0 %v8550_v0 }
0x1587   :  { %459 = vrot.lane.b32.xlu1 %v8813_v42, %s8553_s24  ;;  %v1516_v42 = vld [vmem:[%s9847_s12 + $0x18] sm:$0xff]  ;;  %7538 = vmatpush3.msra.mxu0 %v9032_v46 }
0x1588   :  { %904 = vrot.lane.b32.xlu0 %v8896_v47, %s8553_s24  ;;  %7498 = vmatprep.subr.mxu1 %v1516_v42  ;;  %v1513_v47 = vld [vmem:[%s9847_s12] sm:$0xff] }
0x1589   :  { %7499 = vmatpush3.msra.mxu1 %v1516_v42  ;;  %7553 = vmatprep.subr.mxu0 %v8550_v0 }
0x158a   :  { %7500 = vmatprep.subr.mxu1 %v1515_v23 }
0x158b   :  { %755 = vrot.lane.b32.xlu1 %v8869_v62, %s8553_s24  ;;  %v1514_v62 = vld [vmem:[%s9847_s12 + $0x8] sm:$0xff]  ;;  %7501 = vmatpush3.msra.mxu1 %v1515_v23  ;;  %s8559_s12 = smov 112  }
0x158c   :  { %1202 = vrot.lane.b32.xlu0 %v8949_v14, %s8553_s24  ;;  %7502 = vmatprep.subr.mxu1 %v1514_v62 }
0x158d   :  { %7503 = vmatpush3.msra.mxu1 %v1514_v62 }
0x158e   :  { %7504 = vmatprep.subr.mxu1 %v1513_v47 }
0x158f   :  { %1053 = vrot.lane.b32.xlu1 %v8922_v32, %s8553_s24  ;;  %7505 = vmatpush3.msra.mxu1 %v1513_v47 }
0x1590   :  { %7520 = vmatprep.subr.mxu1 %v8550_v0 }
0x1593   :  { %1351 = vrot.lane.b32.xlu1 %v8964_v57, %s8553_s24 }
0x15e5   :  { %v1489_v31 = vpop.permute.xlu1 %1488 }
0x15e6   :  { %v1491_v32 = vpop.permute.xlu0 %1490  ;;  %v1494_v13 = vmul.f32 %v8043_v15, %v1489_v31 }
0x15e7   :  { %v1495_v40 = vmul.f32 %v8976_v25, %v1491_v32 }
0x15e8   :  { %1498 = vrot.lane.b32.xlu0 %v1494_v13, %s8553_s24 }
0x15e9   :  { %v458_v14 = vpop.permute.xlu1 %457 }
0x15ea   :  { %v606_v41 = vpop.permute.xlu0 %605  ;;  %464 = vst.msk [vmem:[#allocation2] sm:$0x1] %vm463_vm4, %v458_v14 }
0x15eb   :  { %612 = vst.msk [vmem:[#allocation2] sm:$0x2] %vm611_vm5, %v606_v41 }
0x15ec   :  { %1500 = vrot.lane.b32.xlu0 %v1495_v40, %s8553_s24 }
0x15ed   :  { %v754_v4 = vpop.permute.xlu1 %753 }
0x15ee   :  { %v903_v43 = vpop.permute.xlu0 %902  ;;  %760 = vst.msk [vmem:[#allocation2] sm:$0x4] %vm759_vm6, %v754_v4 }
0x15ef   :  { %909 = vst.msk [vmem:[#allocation2] sm:$0x8] %vm908_vm7, %v903_v43 }
0x15f1   :  { %v1052_v7 = vpop.permute.xlu1 %1051 }
0x15f2   :  { %v1201_v8 = vpop.permute.xlu0 %1200  ;;  %1058 = vst.msk [vmem:[#allocation2] sm:$0x10] %vm1057_vm8, %v1052_v7 }
0x15f3   :  { %1207 = vst.msk [vmem:[#allocation2] sm:$0x20] %vm1206_vm9, %v1201_v8 }
0x15f5   :  { %v1350_v44 = vpop.permute.xlu1 %1349 }
0x15f6   :  { %v608_v48 = vpop.permute.xlu0 %607  ;;  %1356 = vst.msk [vmem:[#allocation2] sm:$0x40] %vm1355_vm10, %v1350_v44 }
0x15f7   :  { %613 = vst.msk [vmem:[#allocation2 + $0x8] sm:$0x2] %vm611_vm5, %v608_v48 }
0x15f9   :  { %v460_v49 = vpop.permute.xlu1 %459 }
0x15fa   :  { %v905_v50 = vpop.permute.xlu0 %904  ;;  %465 = vst.msk [vmem:[#allocation2 + $0x8] sm:$0x1] %vm463_vm4, %v460_v49 }
0x15fb   :  { %910 = vst.msk [vmem:[#allocation2 + $0x8] sm:$0x8] %vm908_vm7, %v905_v50 }
0x15fd   :  { %v756_v51 = vpop.permute.xlu1 %755 }
0x15fe   :  { %v1203_v52 = vpop.permute.xlu0 %1202  ;;  %761 = vst.msk [vmem:[#allocation2 + $0x8] sm:$0x4] %vm759_vm6, %v756_v51 }
0x15ff   :  { %1208 = vst.msk [vmem:[#allocation2 + $0x8] sm:$0x20] %vm1206_vm9, %v1203_v52 }
0x1601   :  { %v1054_v53 = vpop.permute.xlu1 %1053 }
0x1602   :  { %1059 = vst.msk [vmem:[#allocation2 + $0x8] sm:$0x10] %vm1057_vm8, %v1054_v53 }
0x1605   :  { %v1352_v54 = vpop.permute.xlu1 %1351 }
0x1606   :  { %1357 = vst.msk [vmem:[#allocation2 + $0x8] sm:$0x40] %vm1355_vm10, %v1352_v54 }
0x163f   :  { %v1671_v59 = vpop.f32.mrf.mxu0 }
0x1640   :  { %v1676_v1 = vrot.slane %v1671_v59, 1 }
0x1641   :  { %v7519_v60 = vpop.f32.mrf.mxu0 }
0x165a   :  { %v1499_v55 = vpop.permute.xlu0 %1498 }
0x165b   :  { %1505 = vst.msk [vmem:[#allocation2] sm:$0x80] %vm1504_vm11, %v1499_v55 }
0x165e   :  { %v1501_v56 = vpop.permute.xlu0 %1500 }
0x165f   :  { %1506 = vst.msk [vmem:[#allocation2 + $0x8] sm:$0x80] %vm1504_vm11, %v1501_v56 }
0x1662   :  { %v1507_v57 = vld [vmem:[#allocation2] sm:$0xff] }
0x1663   :  { %7506 = vmatprep.mubr.msk.f32.mxu1 %vm327_vm3, %v1507_v57 }
0x1666   :  { %v1508_v58 = vld [vmem:[#allocation2 + $0x8] sm:$0xff] }
0x1667   :  { %7507 = vmatmul.mubr.msk.f32.vlgmr.msra.gmra.mxu1 %vm327_vm3, %v1508_v58 }
0x1668   :  { %7521 = vmatpush3.msra.mxu1 %v9011_v45  ;;  %7528 = vmatprep.mubr.msk.f32.mxu1 %vm8551_vm0, %v8550_v0 }
0x1669   :  { %7522 = vmatprep.subr.mxu1 %v8550_v0 }
0x166a   :  { %7523 = vmatpush3.msra.mxu1 %v9018_v22 }
0x166b   :  { %7524 = vmatprep.subr.mxu1 %v8550_v0 }
0x166c   :  { %7525 = vmatpush3.msra.mxu1 %v9024_v61 }
0x166d   :  { %7526 = vmatprep.subr.mxu1 %v8550_v0 }
0x166e   :  { %7527 = vmatpush3.msra.mxu1 %v9032_v46 }
0x166f   :  { %7542 = vmatprep.subr.mxu1 %v8550_v0 }
0x1727   :  { %v7508_v3 = vpop.f32.mrf.mxu1 }
0x1728   :  { %v9085_v5 = vadd.f32 %v7508_v3, %v7036_v63 }
0x1729   :  { %v1596_v6 = vpop.f32.mrf.mxu1 }
0x172a   :  { %v1680_v9 = vadd.f32 %v1676_v1, %v9085_v5  ;;  %v9088_v10 = vadd.f32 %v7036_v63, %v1596_v6 }
0x172c   :  { %v1679_v12 = vadd.f32 %v1671_v59, %v9088_v10  ;;  %8050 = vtanh.f32 %v1680_v9  ;;  %v7040_v18 = vmul.f32 -1.442695, %v1680_v9 }
0x172e   :  { %8052 = vtanh.f32 %v1679_v12  ;;  %v7039_v19 = vmul.f32 -1.442695, %v1679_v12 }
0x172f   :  { %8054 = vpow2.f32 %v7040_v18 }
0x1730   :  { %8056 = vpow2.f32 %v7039_v19 }
0x1739   :  { %v8051_v16 = vpop.eup %8050 }
0x173a   :  { %1701 = vrot.lane.b32.xlu1 %v8051_v16, %s8552_s17 }
0x173b   :  { %v8053_v17 = vpop.eup %8052 }
0x173c   :  { %1699 = vrot.lane.b32.xlu0 %v8053_v17, %s8552_s17  ;;  %v8055_v20 = vpop.eup %8054 }
0x173d   :  { %v8057_v21 = vpop.eup %8056  ;;  %v1688_v24 = vadd.f32 1.0, %v8055_v20 }
0x173e   :  { %v1687_v15 = vadd.f32 1.0, %v8057_v21 }
0x173f   :  { %8058 = vrcp.f32 %v1688_v24 }
0x1740   :  { %8060 = vrcp.f32 %v1687_v15 }
0x174c   :  { %v8059_v11 = vpop.eup %8058 }
0x174d   :  { %v8061_v27 = vpop.eup %8060  ;;  %v1696_v30 = vmul.f32 0.0, %v8059_v11 }
0x174e   :  { %v1695_v35 = vmul.f32 0.0, %v8061_v27 }
0x17ac   :  { %v1702_v25 = vpop.permute.xlu1 %1701 }
0x17ad   :  { %v1706_v26 = vmul.f32 %v8059_v11, %v1702_v25 }
0x17ae   :  { %v1700_v28 = vpop.permute.xlu0 %1699 }
0x17af   :  { %1711 = vrot.lane.b32.xlu1 %v1706_v26, %s8552_s17  ;;  %v1705_v29 = vmul.f32 %v8061_v27, %v1700_v28 }
0x17b1   :  { %1709 = vrot.lane.b32.xlu0 %v1705_v29, %s8552_s17 }
0x1821   :  { %v1712_v33 = vpop.permute.xlu1 %1711 }
0x1822   :  { %v1716_v34 = vadd.f32 %v1712_v33, %v1696_v30 }
0x1823   :  { %v1710_v36 = vpop.permute.xlu0 %1709 }
0x1824   :  { %8062 = vtanh.f32 %v1716_v34  ;;  %v1715_v37 = vadd.f32 %v1710_v36, %v1695_v35  ;;  %v1838_v58 = vrot.slane %v1716_v34, 7 }
0x1826   :  { %8064 = vtanh.f32 %v1715_v37  ;;  %v1837_v60 = vrot.slane %v1715_v37, 7 }
0x1831   :  { %v8063_v38 = vpop.eup %8062 }
0x1832   :  { %1723 = vrot.lane.b32.xlu1 %v8063_v38, %s8552_s17 }
0x1833   :  { %v8065_v2 = vpop.eup %8064 }
0x1834   :  { %1721 = vrot.lane.b32.xlu0 %v8065_v2, %s8552_s17 }
0x18a4   :  { %v1724_v39 = vpop.permute.xlu1 %1723 }
0x18a5   :  { %v9097_v42 = vmul.f32 %v8059_v11, %v1724_v39 }
0x18a6   :  { %v1722_v62 = vpop.permute.xlu0 %1721 }
0x18a7   :  { %v1739_v23 = vrot.slane %v9097_v42, 7  ;;  %v9100_v47 = vmul.f32 %v8061_v27, %v1722_v62 }
0x18a9   :  { %v1740_v31 = vsel %vm467_vm2, %v1739_v23, %v9100_v47 }
0x18aa   :  { %1741 = vrot.lane.b32.xlu1 %v1740_v31, %s8553_s24 }
0x191c   :  { %v1742_v32 = vpop.permute.xlu1 %1741 }
0x191d   :  { %7529 = vmatmul.mubr.msk.f32.vlgmr.msra.gmra.mxu1 %vm327_vm3, %v1742_v32 }
0x191e   :  { %7543 = vmatpush3.msra.mxu1 %v9011_v45  ;;  %7550 = vmatprep.mubr.msk.f32.mxu1 %vm8551_vm0, %v8550_v0 }
0x191f   :  { %7544 = vmatprep.subr.mxu1 %v8550_v0 }
0x1920   :  { %7545 = vmatpush3.msra.mxu1 %v9018_v22 }
0x1921   :  { %7546 = vmatprep.subr.mxu1 %v8550_v0 }
0x1922   :  { %7547 = vmatpush3.msra.mxu1 %v9024_v61 }
0x1923   :  { %7548 = vmatprep.subr.mxu1 %v8550_v0 }
0x1924   :  { %7549 = vmatpush3.msra.mxu1 %v9032_v46 }
0x1925   :  { %7564 = vmatprep.subr.mxu1 %v8550_v0 }
0x19dd   :  { %v1811_v13 = vpop.f32.mrf.mxu1 }
0x19de   :  { %v1816_v14 = vrot.slane %v1811_v13, 7  ;;  %v1820_v40 = vadd.f32 %v1811_v13, %v9085_v5 }
0x19df   :  { %v7530_v41 = vpop.f32.mrf.mxu1 }
0x19e0   :  { %v1819_v4 = vadd.f32 %v1816_v14, %v9088_v10  ;;  %8066 = vtanh.f32 %v1820_v40  ;;  %v7043_v8 = vmul.f32 -1.442695, %v1820_v40 }
0x19e2   :  { %8068 = vtanh.f32 %v1819_v4  ;;  %v7042_v44 = vmul.f32 -1.442695, %v1819_v4 }
0x19e3   :  { %8070 = vpow2.f32 %v7043_v8 }
0x19e4   :  { %8072 = vpow2.f32 %v7042_v44 }
0x19ed   :  { %v8067_v43 = vpop.eup %8066 }
0x19ee   :  { %1847 = vrot.lane.b32.xlu1 %v8067_v43, %s8552_s17 }
0x19ef   :  { %v8069_v7 = vpop.eup %8068 }
0x19f0   :  { %1845 = vrot.lane.b32.xlu0 %v8069_v7, %s8552_s17  ;;  %v8071_v48 = vpop.eup %8070 }
0x19f1   :  { %v8073_v49 = vpop.eup %8072  ;;  %v1828_v50 = vadd.f32 1.0, %v8071_v48 }
0x19f2   :  { %v1827_v51 = vadd.f32 1.0, %v8073_v49 }
0x19f3   :  { %8074 = vrcp.f32 %v1828_v50 }
0x19f4   :  { %8076 = vrcp.f32 %v1827_v51 }
0x1a00   :  { %v8075_v52 = vpop.eup %8074 }
0x1a01   :  { %v8077_v55 = vpop.eup %8076  ;;  %v1842_v59 = vmul.f32 %v8075_v52, %v1838_v58 }
0x1a02   :  { %v1841_v3 = vmul.f32 %v8077_v55, %v1837_v60 }
0x1a60   :  { %v1848_v53 = vpop.permute.xlu1 %1847 }
0x1a61   :  { %v1852_v54 = vmul.f32 %v8075_v52, %v1848_v53 }
0x1a62   :  { %v1846_v56 = vpop.permute.xlu0 %1845 }
0x1a63   :  { %1857 = vrot.lane.b32.xlu1 %v1852_v54, %s8552_s17  ;;  %v1851_v57 = vmul.f32 %v8077_v55, %v1846_v56 }
0x1a65   :  { %1855 = vrot.lane.b32.xlu0 %v1851_v57, %s8552_s17 }
0x1ad5   :  { %v1858_v63 = vpop.permute.xlu1 %1857 }
0x1ad6   :  { %v1862_v1 = vadd.f32 %v1858_v63, %v1842_v59 }
0x1ad7   :  { %v1856_v6 = vpop.permute.xlu0 %1855 }
0x1ad8   :  { %8078 = vtanh.f32 %v1862_v1  ;;  %v1861_v9 = vadd.f32 %v1856_v6, %v1841_v3  ;;  %v1985_v40 = vrot.slane %v1862_v1, 7 }
0x1ada   :  { %8080 = vtanh.f32 %v1861_v9  ;;  %v1984_v14 = vrot.slane %v1861_v9, 7 }
0x1ae5   :  { %v8079_v12 = vpop.eup %8078 }
0x1ae6   :  { %1869 = vrot.lane.b32.xlu1 %v8079_v12, %s8552_s17 }
0x1ae7   :  { %v8081_v16 = vpop.eup %8080 }
0x1ae8   :  { %1867 = vrot.lane.b32.xlu0 %v8081_v16, %s8552_s17 }
0x1b58   :  { %v1870_v17 = vpop.permute.xlu1 %1869 }
0x1b59   :  { %v9126_v20 = vmul.f32 %v8075_v52, %v1870_v17 }
0x1b5a   :  { %v1868_v18 = vpop.permute.xlu0 %1867 }
0x1b5b   :  { %v9124_v19 = vmul.f32 %v8077_v55, %v1868_v18 }
0x1b5d   :  { %v1885_v21 = vrot.slane %v9124_v19, 1 }
0x1b5f   :  { %v1886_v24 = vsel %vm467_vm2, %v9126_v20, %v1885_v21 }
0x1b60   :  { %1887 = vrot.lane.b32.xlu0 %v1886_v24, %s8553_s24 }
0x1bd2   :  { %v1888_v15 = vpop.permute.xlu0 %1887 }
0x1bd3   :  { %7540 = vmatmul.mubr.msk.f32.vlgmr.msra.gmra.mxu0 %vm327_vm3, %v1888_v15 }
0x1bd4   :  { %7554 = vmatpush3.msra.mxu0 %v9011_v45  ;;  %7561 = vmatprep.mubr.msk.f32.mxu0 %vm8551_vm0, %v8550_v0 }
0x1bd5   :  { %7555 = vmatprep.subr.mxu0 %v8550_v0 }
0x1bd6   :  { %7556 = vmatpush3.msra.mxu0 %v9018_v22 }
0x1bd7   :  { %7557 = vmatprep.subr.mxu0 %v8550_v0 }
0x1bd8   :  { %7558 = vmatpush3.msra.mxu0 %v9024_v61 }
0x1bd9   :  { %7559 = vmatprep.subr.mxu0 %v8550_v0 }
0x1bda   :  { %7560 = vmatpush3.msra.mxu0 %v9032_v46 }
0x1bdb   :  { %7575 = vmatprep.subr.mxu0 %v8550_v0 }
0x1c93   :  { %v1957_v11 = vpop.f32.mrf.mxu0 }
0x1c94   :  { %v1962_v25 = vrot.slane %v1957_v11, 6  ;;  %v1963_v26 = vrot.slane %v1957_v11, 7 }
0x1c95   :  { %v7541_v27 = vpop.f32.mrf.mxu0 }
0x1c96   :  { %v1966_v28 = vadd.f32 %v1962_v25, %v9088_v10  ;;  %v1967_v29 = vadd.f32 %v1963_v26, %v9085_v5 }
0x1c98   :  { %8082 = vtanh.f32 %v1966_v28  ;;  %v7045_v34 = vmul.f32 -1.442695, %v1966_v28  ;;  %v7046_v35 = vmul.f32 -1.442695, %v1967_v29 }
0x1c99   :  { %8084 = vtanh.f32 %v1967_v29 }
0x1c9a   :  { %8086 = vpow2.f32 %v7045_v34 }
0x1c9b   :  { %8088 = vpow2.f32 %v7046_v35 }
0x1ca5   :  { %v8083_v30 = vpop.eup %8082 }
0x1ca6   :  { %v8085_v33 = vpop.eup %8084  ;;  %1992 = vrot.lane.b32.xlu1 %v8083_v30, %s8552_s17 }
0x1ca7   :  { %1994 = vrot.lane.b32.xlu0 %v8085_v33, %s8552_s17  ;;  %v8087_v36 = vpop.eup %8086 }
0x1ca8   :  { %v8089_v37 = vpop.eup %8088  ;;  %v1974_v38 = vadd.f32 1.0, %v8087_v36 }
0x1ca9   :  { %v1975_v2 = vadd.f32 1.0, %v8089_v37 }
0x1caa   :  { %8090 = vrcp.f32 %v1974_v38 }
0x1cab   :  { %8092 = vrcp.f32 %v1975_v2 }
0x1cb7   :  { %v8091_v39 = vpop.eup %8090 }
0x1cb8   :  { %v8093_v62 = vpop.eup %8092  ;;  %v1988_v41 = vmul.f32 %v8091_v39, %v1984_v14 }
0x1cb9   :  { %v1989_v4 = vmul.f32 %v8093_v62, %v1985_v40 }
0x1d18   :  { %v1993_v23 = vpop.permute.xlu1 %1992 }
0x1d19   :  { %v1995_v31 = vpop.permute.xlu0 %1994  ;;  %v1998_v32 = vmul.f32 %v8091_v39, %v1993_v23 }
0x1d1a   :  { %v1999_v13 = vmul.f32 %v8093_v62, %v1995_v31 }
0x1d1b   :  { %2002 = vrot.lane.b32.xlu1 %v1998_v32, %s8552_s17 }
0x1d1c   :  { %2004 = vrot.lane.b32.xlu0 %v1999_v13, %s8552_s17 }
0x1d8d   :  { %v2003_v43 = vpop.permute.xlu1 %2002 }
0x1d8e   :  { %v2005_v7 = vpop.permute.xlu0 %2004  ;;  %v2008_v8 = vadd.f32 %v2003_v43, %v1988_v41 }
0x1d8f   :  { %v2009_v44 = vadd.f32 %v2005_v7, %v1989_v4 }
0x1d90   :  { %8094 = vtanh.f32 %v2008_v8  ;;  %v2132_v29 = vrot.slane %v2008_v8, 7 }
0x1d91   :  { %8096 = vtanh.f32 %v2009_v44  ;;  %v2133_v30 = vrot.slane %v2009_v44, 7 }
0x1d9d   :  { %v8095_v48 = vpop.eup %8094 }
0x1d9e   :  { %v8097_v49 = vpop.eup %8096  ;;  %2014 = vrot.lane.b32.xlu1 %v8095_v48, %s8552_s17 }
0x1d9f   :  { %2016 = vrot.lane.b32.xlu0 %v8097_v49, %s8552_s17 }
0x1e10   :  { %v2015_v50 = vpop.permute.xlu1 %2014 }
0x1e11   :  { %v2017_v51 = vpop.permute.xlu0 %2016  ;;  %v9151_v52 = vmul.f32 %v8091_v39, %v2015_v50 }
0x1e12   :  { %v9153_v53 = vmul.f32 %v8093_v62, %v2017_v51 }
0x1e13   :  { %v2032_v54 = vrot.slane %v9151_v52, 2 }
0x1e14   :  { %v2033_v55 = vrot.slane %v9153_v53, 1 }
0x1e16   :  { %v2034_v56 = vsel %vm467_vm2, %v2033_v55, %v2032_v54 }
0x1e17   :  { %2035 = vrot.lane.b32.xlu1 %v2034_v56, %s8553_s24 }
0x1e89   :  { %v2036_v57 = vpop.permute.xlu1 %2035 }
0x1e8a   :  { %7551 = vmatmul.mubr.msk.f32.vlgmr.msra.gmra.mxu1 %vm327_vm3, %v2036_v57 }
0x1e8b   :  { %7565 = vmatpush3.msra.mxu1 %v9011_v45  ;;  %7572 = vmatprep.mubr.msk.f32.mxu1 %vm8551_vm0, %v8550_v0 }
0x1e8c   :  { %7566 = vmatprep.subr.mxu1 %v8550_v0 }
0x1e8d   :  { %7567 = vmatpush3.msra.mxu1 %v9018_v22 }
0x1e8e   :  { %7568 = vmatprep.subr.mxu1 %v8550_v0 }
0x1e8f   :  { %7569 = vmatpush3.msra.mxu1 %v9024_v61 }
0x1e90   :  { %7570 = vmatprep.subr.mxu1 %v8550_v0 }
0x1e91   :  { %7571 = vmatpush3.msra.mxu1 %v9032_v46 }
0x1e92   :  { %7586 = vmatprep.subr.mxu1 %v8550_v0 }
0x1f4a   :  { %v2105_v58 = vpop.f32.mrf.mxu1 }
0x1f4b   :  { %v2110_v59 = vrot.slane %v2105_v58, 5  ;;  %v2111_v60 = vrot.slane %v2105_v58, 6 }
0x1f4c   :  { %v7552_v63 = vpop.f32.mrf.mxu1 }
0x1f4d   :  { %v2114_v1 = vadd.f32 %v2110_v59, %v9088_v10  ;;  %v2115_v3 = vadd.f32 %v2111_v60, %v9085_v5 }
0x1f4f   :  { %8098 = vtanh.f32 %v2114_v1  ;;  %v7048_v12 = vmul.f32 -1.442695, %v2114_v1  ;;  %v7049_v16 = vmul.f32 -1.442695, %v2115_v3 }
0x1f50   :  { %8100 = vtanh.f32 %v2115_v3 }
0x1f51   :  { %8102 = vpow2.f32 %v7048_v12 }
0x1f52   :  { %8104 = vpow2.f32 %v7049_v16 }
0x1f5c   :  { %v8099_v6 = vpop.eup %8098 }
0x1f5d   :  { %v8101_v9 = vpop.eup %8100  ;;  %2140 = vrot.lane.b32.xlu0 %v8099_v6, %s8552_s17 }
0x1f5e   :  { %2142 = vrot.lane.b32.xlu1 %v8101_v9, %s8552_s17  ;;  %v8103_v17 = vpop.eup %8102 }
0x1f5f   :  { %v8105_v18 = vpop.eup %8104  ;;  %v2122_v21 = vadd.f32 1.0, %v8103_v17 }
0x1f60   :  { %v2123_v24 = vadd.f32 1.0, %v8105_v18 }
0x1f61   :  { %8106 = vrcp.f32 %v2122_v21 }
0x1f62   :  { %8108 = vrcp.f32 %v2123_v24 }
0x1f6e   :  { %v8107_v15 = vpop.eup %8106 }
0x1f6f   :  { %v8109_v25 = vpop.eup %8108  ;;  %v2136_v33 = vmul.f32 %v8107_v15, %v2132_v29 }
0x1f70   :  { %v2137_v34 = vmul.f32 %v8109_v25, %v2133_v30 }
0x1fcf   :  { %v2141_v11 = vpop.permute.xlu0 %2140 }
0x1fd0   :  { %v2143_v26 = vpop.permute.xlu1 %2142  ;;  %v2146_v27 = vmul.f32 %v8107_v15, %v2141_v11 }
0x1fd1   :  { %v2147_v28 = vmul.f32 %v8109_v25, %v2143_v26 }
0x1fd2   :  { %2150 = vrot.lane.b32.xlu0 %v2146_v27, %s8552_s17 }
0x1fd3   :  { %2152 = vrot.lane.b32.xlu1 %v2147_v28, %s8552_s17 }
0x2044   :  { %v2151_v35 = vpop.permute.xlu0 %2150 }
0x2045   :  { %v2153_v36 = vpop.permute.xlu1 %2152  ;;  %v2156_v37 = vadd.f32 %v2151_v35, %v2136_v33 }
0x2046   :  { %v2157_v38 = vadd.f32 %v2153_v36, %v2137_v34 }
0x2047   :  { %8110 = vtanh.f32 %v2156_v37  ;;  %v2280_v9 = vrot.slane %v2156_v37, 7 }
0x2048   :  { %8112 = vtanh.f32 %v2157_v38  ;;  %v2281_v12 = vrot.slane %v2157_v38, 7 }
0x2054   :  { %v8111_v2 = vpop.eup %8110 }
0x2055   :  { %v8113_v39 = vpop.eup %8112  ;;  %2162 = vrot.lane.b32.xlu0 %v8111_v2, %s8552_s17 }
0x2056   :  { %2164 = vrot.lane.b32.xlu1 %v8113_v39, %s8552_s17 }
0x20c7   :  { %v2163_v23 = vpop.permute.xlu0 %2162 }
0x20c8   :  { %v2165_v62 = vpop.permute.xlu1 %2164  ;;  %v9178_v31 = vmul.f32 %v8107_v15, %v2163_v23 }
0x20c9   :  { %v9180_v32 = vmul.f32 %v8109_v25, %v2165_v62 }
0x20ca   :  { %v2180_v13 = vrot.slane %v9178_v31, 3 }
0x20cb   :  { %v2181_v14 = vrot.slane %v9180_v32, 2 }
0x20cd   :  { %v2182_v40 = vsel %vm467_vm2, %v2181_v14, %v2180_v13 }
0x20ce   :  { %2183 = vrot.lane.b32.xlu0 %v2182_v40, %s8553_s24 }
0x2140   :  { %v2184_v41 = vpop.permute.xlu0 %2183 }
0x2141   :  { %7562 = vmatmul.mubr.msk.f32.vlgmr.msra.gmra.mxu0 %vm327_vm3, %v2184_v41 }
0x2142   :  { %7576 = vmatpush3.msra.mxu0 %v9011_v45  ;;  %7583 = vmatprep.mubr.msk.f32.mxu0 %vm8551_vm0, %v8550_v0 }
0x2143   :  { %7577 = vmatprep.subr.mxu0 %v8550_v0 }
0x2144   :  { %7578 = vmatpush3.msra.mxu0 %v9018_v22 }
0x2145   :  { %7579 = vmatprep.subr.mxu0 %v8550_v0 }
0x2146   :  { %7580 = vmatpush3.msra.mxu0 %v9024_v61 }
0x2147   :  { %7581 = vmatprep.subr.mxu0 %v8550_v0 }
0x2148   :  { %7582 = vmatpush3.msra.mxu0 %v9032_v46 }
0x2201   :  { %v2253_v4 = vpop.f32.mrf.mxu0 }
0x2202   :  { %v2258_v43 = vrot.slane %v2253_v4, 4  ;;  %v2259_v7 = vrot.slane %v2253_v4, 5 }
0x2203   :  { %v7563_v8 = vpop.f32.mrf.mxu0 }
0x2204   :  { %v2262_v44 = vadd.f32 %v2258_v43, %v9088_v10  ;;  %v2263_v48 = vadd.f32 %v2259_v7, %v9085_v5 }
0x2206   :  { %8114 = vtanh.f32 %v2262_v44  ;;  %v7051_v51 = vmul.f32 -1.442695, %v2262_v44  ;;  %v7052_v54 = vmul.f32 -1.442695, %v2263_v48 }
0x2207   :  { %8116 = vtanh.f32 %v2263_v48 }
0x2208   :  { %8118 = vpow2.f32 %v7051_v51 }
0x2209   :  { %8120 = vpow2.f32 %v7052_v54 }
0x2213   :  { %v8115_v49 = vpop.eup %8114 }
0x2214   :  { %v8117_v50 = vpop.eup %8116  ;;  %2288 = vrot.lane.b32.xlu1 %v8115_v49, %s8552_s17 }
0x2215   :  { %2290 = vrot.lane.b32.xlu0 %v8117_v50, %s8552_s17  ;;  %v8119_v55 = vpop.eup %8118 }
0x2216   :  { %v8121_v56 = vpop.eup %8120  ;;  %v2270_v57 = vadd.f32 1.0, %v8119_v55 }
0x2217   :  { %v2271_v58 = vadd.f32 1.0, %v8121_v56 }
0x2218   :  { %8122 = vrcp.f32 %v2270_v57 }
0x2219   :  { %8124 = vrcp.f32 %v2271_v58 }
0x2225   :  { %v8123_v59 = vpop.eup %8122 }
0x2226   :  { %v8125_v63 = vpop.eup %8124  ;;  %v2284_v16 = vmul.f32 %v8123_v59, %v2280_v9 }
0x2227   :  { %v2285_v17 = vmul.f32 %v8125_v63, %v2281_v12 }
0x2286   :  { %v2289_v60 = vpop.permute.xlu1 %2288 }
0x2287   :  { %v2291_v1 = vpop.permute.xlu0 %2290  ;;  %v2294_v3 = vmul.f32 %v8123_v59, %v2289_v60 }
0x2288   :  { %v2295_v6 = vmul.f32 %v8125_v63, %v2291_v1 }
0x2289   :  { %2298 = vrot.lane.b32.xlu1 %v2294_v3, %s8552_s17 }
0x228a   :  { %2300 = vrot.lane.b32.xlu0 %v2295_v6, %s8552_s17 }
0x22fb   :  { %v2299_v18 = vpop.permute.xlu1 %2298 }
0x22fc   :  { %v2301_v21 = vpop.permute.xlu0 %2300  ;;  %v2304_v24 = vadd.f32 %v2299_v18, %v2284_v16 }
0x22fd   :  { %v2305_v15 = vadd.f32 %v2301_v21, %v2285_v17 }
0x22fe   :  { %8126 = vtanh.f32 %v2304_v24  ;;  %v2428_v48 = vrot.slane %v2304_v24, 7 }
0x22ff   :  { %8128 = vtanh.f32 %v2305_v15  ;;  %v2429_v49 = vrot.slane %v2305_v15, 7 }
0x230b   :  { %v8127_v11 = vpop.eup %8126 }
0x230c   :  { %v8129_v25 = vpop.eup %8128  ;;  %2310 = vrot.lane.b32.xlu1 %v8127_v11, %s8552_s17 }
0x230d   :  { %2312 = vrot.lane.b32.xlu0 %v8129_v25, %s8552_s17 }
0x237e   :  { %v2311_v26 = vpop.permute.xlu1 %2310 }
0x237f   :  { %v2313_v27 = vpop.permute.xlu0 %2312  ;;  %v9204_v28 = vmul.f32 %v8123_v59, %v2311_v26 }
0x2380   :  { %v9206_v29 = vmul.f32 %v8125_v63, %v2313_v27 }
0x2381   :  { %v2328_v30 = vrot.slane %v9204_v28, 4 }
0x2382   :  { %v2329_v33 = vrot.slane %v9206_v29, 3 }
0x2384   :  { %v2330_v34 = vsel %vm467_vm2, %v2329_v33, %v2328_v30 }
0x2385   :  { %2331 = vrot.lane.b32.xlu1 %v2330_v34, %s8553_s24 }
0x23f7   :  { %v2332_v35 = vpop.permute.xlu1 %2331 }
0x23f8   :  { %7573 = vmatmul.mubr.msk.f32.vlgmr.msra.gmra.mxu1 %vm327_vm3, %v2332_v35 }
0x23f9   :  { %7587 = vmatpush3.msra.mxu1 %v9011_v45  ;;  %7594 = vmatprep.mubr.msk.f32.mxu1 %vm8551_vm0, %v8550_v0 }
0x23fa   :  { %7588 = vmatprep.subr.mxu1 %v8550_v0 }
0x23fb   :  { %7589 = vmatpush3.msra.mxu1 %v9018_v22 }
0x23fc   :  { %7590 = vmatprep.subr.mxu1 %v8550_v0 }
0x23fd   :  { %7591 = vmatpush3.msra.mxu1 %v9024_v61 }
0x23fe   :  { %7592 = vmatprep.subr.mxu1 %v8550_v0 }
0x23ff   :  { %7593 = vmatpush3.msra.mxu1 %v9032_v46 }
0x2400   :  { %7608 = vmatprep.subr.mxu1 %v8550_v0 }
0x24b8   :  { %v2401_v36 = vpop.f32.mrf.mxu1 }
0x24b9   :  { %v2406_v37 = vrot.slane %v2401_v36, 3  ;;  %v2407_v45 = vrot.slane %v2401_v36, 4 }
0x24ba   :  { %v7574_v38 = vpop.f32.mrf.mxu1 }
0x24bb   :  { %v2410_v2 = vadd.f32 %v2406_v37, %v9088_v10  ;;  %v2411_v39 = vadd.f32 %v2407_v45, %v9085_v5 }
0x24bd   :  { %8130 = vtanh.f32 %v2410_v2  ;;  %v7054_v61 = vmul.f32 -1.442695, %v2410_v2  ;;  %v7055_v46 = vmul.f32 -1.442695, %v2411_v39 }
0x24be   :  { %8132 = vtanh.f32 %v2411_v39 }
0x24bf   :  { %8134 = vpow2.f32 %v7054_v61 }
0x24c0   :  { %8136 = vpow2.f32 %v7055_v46 }
0x24ca   :  { %v8131_v22 = vpop.eup %8130 }
0x24cb   :  { %v8133_v23 = vpop.eup %8132  ;;  %2436 = vrot.lane.b32.xlu0 %v8131_v22, %s8552_s17 }
0x24cc   :  { %2438 = vrot.lane.b32.xlu1 %v8133_v23, %s8552_s17  ;;  %v8135_v62 = vpop.eup %8134 }
0x24cd   :  { %v8137_v13 = vpop.eup %8136  ;;  %v2418_v14 = vadd.f32 1.0, %v8135_v62 }
0x24ce   :  { %v2419_v40 = vadd.f32 1.0, %v8137_v13 }
0x24cf   :  { %8138 = vrcp.f32 %v2418_v14 }
0x24d0   :  { %8140 = vrcp.f32 %v2419_v40 }
0x24dc   :  { %v8139_v41 = vpop.eup %8138 }
0x24dd   :  { %v8141_v43 = vpop.eup %8140  ;;  %v2432_v50 = vmul.f32 %v8139_v41, %v2428_v48 }
0x24de   :  { %v2433_v51 = vmul.f32 %v8141_v43, %v2429_v49 }
0x253d   :  { %v2437_v4 = vpop.permute.xlu0 %2436 }
0x253e   :  { %v2439_v7 = vpop.permute.xlu1 %2438  ;;  %v2442_v8 = vmul.f32 %v8139_v41, %v2437_v4 }
0x253f   :  { %v2443_v44 = vmul.f32 %v8141_v43, %v2439_v7 }
0x2540   :  { %2446 = vrot.lane.b32.xlu0 %v2442_v8, %s8552_s17 }
0x2541   :  { %2448 = vrot.lane.b32.xlu1 %v2443_v44, %s8552_s17 }
0x25b2   :  { %v2447_v54 = vpop.permute.xlu0 %2446 }
0x25b3   :  { %v2449_v55 = vpop.permute.xlu1 %2448  ;;  %v2452_v56 = vadd.f32 %v2447_v54, %v2432_v50 }
0x25b4   :  { %v2453_v57 = vadd.f32 %v2449_v55, %v2433_v51 }
0x25b5   :  { %8142 = vtanh.f32 %v2452_v56  ;;  %v2576_v23 = vrot.slane %v2452_v56, 7 }
0x25b6   :  { %8144 = vtanh.f32 %v2453_v57  ;;  %v2577_v61 = vrot.slane %v2453_v57, 7 }
0x25c2   :  { %v8143_v58 = vpop.eup %8142 }
0x25c3   :  { %v8145_v59 = vpop.eup %8144  ;;  %2458 = vrot.lane.b32.xlu0 %v8143_v58, %s8552_s17 }
0x25c4   :  { %2460 = vrot.lane.b32.xlu1 %v8145_v59, %s8552_s17 }
0x2635   :  { %v2459_v60 = vpop.permute.xlu0 %2458 }
0x2636   :  { %v2461_v63 = vpop.permute.xlu1 %2460  ;;  %v9231_v1 = vmul.f32 %v8139_v41, %v2459_v60 }
0x2637   :  { %v9233_v3 = vmul.f32 %v8141_v43, %v2461_v63 }
0x2638   :  { %v2476_v6 = vrot.slane %v9231_v1, 5 }
0x2639   :  { %v2477_v9 = vrot.slane %v9233_v3, 4 }
0x263b   :  { %v2478_v12 = vsel %vm467_vm2, %v2477_v9, %v2476_v6 }
0x263c   :  { %2479 = vrot.lane.b32.xlu0 %v2478_v12, %s8553_s24 }
0x26ae   :  { %v2480_v16 = vpop.permute.xlu0 %2479 }
0x26af   :  { %7584 = vmatmul.mubr.msk.f32.vlgmr.msra.gmra.mxu0 %vm327_vm3, %v2480_v16 }
0x276f   :  { %v2549_v17 = vpop.f32.mrf.mxu0 }
0x2770   :  { %v2554_v18 = vrot.slane %v2549_v17, 2  ;;  %v2555_v21 = vrot.slane %v2549_v17, 3 }
0x2771   :  { %v7585_v24 = vpop.f32.mrf.mxu0 }
0x2772   :  { %v2558_v15 = vadd.f32 %v2554_v18, %v9088_v10  ;;  %v2559_v11 = vadd.f32 %v2555_v21, %v9085_v5 }
0x2774   :  { %8146 = vtanh.f32 %v2558_v15  ;;  %v7057_v27 = vmul.f32 -1.442695, %v2558_v15  ;;  %v7058_v30 = vmul.f32 -1.442695, %v2559_v11 }
0x2775   :  { %8148 = vtanh.f32 %v2559_v11 }
0x2776   :  { %8150 = vpow2.f32 %v7057_v27 }
0x2777   :  { %8152 = vpow2.f32 %v7058_v30 }
0x2781   :  { %v8147_v25 = vpop.eup %8146 }
0x2782   :  { %v8149_v26 = vpop.eup %8148  ;;  %2584 = vrot.lane.b32.xlu1 %v8147_v25, %s8552_s17 }
0x2783   :  { %2586 = vrot.lane.b32.xlu0 %v8149_v26, %s8552_s17  ;;  %v8151_v33 = vpop.eup %8150 }
0x2784   :  { %v8153_v34 = vpop.eup %8152  ;;  %v2566_v35 = vadd.f32 1.0, %v8151_v33 }
0x2785   :  { %v2567_v36 = vadd.f32 1.0, %v8153_v34 }
0x2786   :  { %8154 = vrcp.f32 %v2566_v35 }
0x2787   :  { %8156 = vrcp.f32 %v2567_v36 }
0x2793   :  { %v8155_v37 = vpop.eup %8154 }
0x2794   :  { %v8157_v38 = vpop.eup %8156  ;;  %v2580_v46 = vmul.f32 %v8155_v37, %v2576_v23 }
0x2795   :  { %v2581_v62 = vmul.f32 %v8157_v38, %v2577_v61 }
0x27f4   :  { %v2585_v45 = vpop.permute.xlu1 %2584 }
0x27f5   :  { %v2587_v2 = vpop.permute.xlu0 %2586  ;;  %v2590_v39 = vmul.f32 %v8155_v37, %v2585_v45 }
0x27f6   :  { %v2591_v22 = vmul.f32 %v8157_v38, %v2587_v2 }
0x27f7   :  { %2594 = vrot.lane.b32.xlu1 %v2590_v39, %s8552_s17 }
0x27f8   :  { %2596 = vrot.lane.b32.xlu0 %v2591_v22, %s8552_s17 }
0x2869   :  { %v2595_v13 = vpop.permute.xlu1 %2594 }
0x286a   :  { %v2597_v14 = vpop.permute.xlu0 %2596  ;;  %v2600_v40 = vadd.f32 %v2595_v13, %v2580_v46 }
0x286b   :  { %v2601_v41 = vadd.f32 %v2597_v14, %v2581_v62 }
0x286c   :  { %8158 = vtanh.f32 %v2600_v40  ;;  %v2724_v26 = vrot.slane %v2600_v40, 7 }
0x286d   :  { %8160 = vtanh.f32 %v2601_v41  ;;  %v2725_v27 = vrot.slane %v2601_v41, 7 }
0x2879   :  { %v8159_v4 = vpop.eup %8158 }
0x287a   :  { %v8161_v43 = vpop.eup %8160  ;;  %2606 = vrot.lane.b32.xlu1 %v8159_v4, %s8552_s17 }
0x287b   :  { %2608 = vrot.lane.b32.xlu0 %v8161_v43, %s8552_s17 }
0x28ec   :  { %v2607_v7 = vpop.permute.xlu1 %2606 }
0x28ed   :  { %v2609_v8 = vpop.permute.xlu0 %2608  ;;  %v2612_v44 = vmul.f32 %v8155_v37, %v2607_v7 }
0x28ee   :  { %v9248_v48 = vmul.f32 %v8157_v38, %v2609_v8  ;;  %v7062_v8 = vld [vmem:[#allocation9] ss:$0 sm:$0xff] }
0x28ef   :  { %v2624_v49 = vrot.slane %v2612_v44, 6 }
0x28f0   :  { %v2625_v50 = vrot.slane %v9248_v48, 5 }
0x28f2   :  { %v2626_v51 = vsel %vm467_vm2, %v2625_v50, %v2624_v49 }
0x28f3   :  { %2627 = vrot.lane.b32.xlu1 %v2626_v51, %s8553_s24 }
0x2965   :  { %v2628_v54 = vpop.permute.xlu1 %2627 }
0x2966   :  { %7595 = vmatmul.mubr.msk.f32.vlgmr.msra.gmra.mxu1 %vm327_vm3, %v2628_v54 }
0x2967   :  { %7610 = vmatprep.mubr.msk.f32.mxu1 %vm8551_vm0, %v8550_v0 }
0x2a26   :  { %v2697_v55 = vpop.f32.mrf.mxu1 }
0x2a27   :  { %v2702_v56 = vrot.slane %v2697_v55, 1  ;;  %v2703_v57 = vrot.slane %v2697_v55, 2 }
0x2a28   :  { %v7596_v58 = vpop.f32.mrf.mxu1 }
0x2a29   :  { %v2706_v59 = vadd.f32 %v2702_v56, %v9088_v10  ;;  %v2707_v60 = vadd.f32 %v2703_v57, %v9085_v5 }
0x2a2b   :  { %8162 = vtanh.f32 %v2706_v59  ;;  %v7060_v9 = vmul.f32 -1.442695, %v2706_v59  ;;  %v7061_v12 = vmul.f32 -1.442695, %v2707_v60 }
0x2a2c   :  { %8164 = vtanh.f32 %v2707_v60 }
0x2a2d   :  { %8166 = vpow2.f32 %v7060_v9 }
0x2a2e   :  { %8168 = vpow2.f32 %v7061_v12 }
0x2a38   :  { %v8163_v63 = vpop.eup %8162 }
0x2a39   :  { %v8165_v6 = vpop.eup %8164  ;;  %2732 = vrot.lane.b32.xlu0 %v8163_v63, %s8552_s17 }
0x2a3a   :  { %2734 = vrot.lane.b32.xlu1 %v8165_v6, %s8552_s17  ;;  %v8167_v16 = vpop.eup %8166 }
0x2a3b   :  { %v8169_v17 = vpop.eup %8168  ;;  %v2714_v18 = vadd.f32 1.0, %v8167_v16 }
0x2a3c   :  { %v2715_v21 = vadd.f32 1.0, %v8169_v17 }
0x2a3d   :  { %8170 = vrcp.f32 %v2714_v18 }
0x2a3e   :  { %8172 = vrcp.f32 %v2715_v21 }
0x2a4a   :  { %v8171_v10 = vpop.eup %8170 }
0x2a4b   :  { %v8173_v24 = vpop.eup %8172  ;;  %v2728_v30 = vmul.f32 %v8171_v10, %v2724_v26 }
0x2a4c   :  { %v2729_v33 = vmul.f32 %v8173_v24, %v2725_v27 }
0x2aab   :  { %v2733_v5 = vpop.permute.xlu0 %2732 }
0x2aac   :  { %v2735_v15 = vpop.permute.xlu1 %2734  ;;  %v2738_v11 = vmul.f32 %v8171_v10, %v2733_v5 }
0x2aad   :  { %v2739_v25 = vmul.f32 %v8173_v24, %v2735_v15 }
0x2aae   :  { %2742 = vrot.lane.b32.xlu0 %v2738_v11, %s8552_s17 }
0x2aaf   :  { %2744 = vrot.lane.b32.xlu1 %v2739_v25, %s8552_s17 }
0x2b20   :  { %v2743_v34 = vpop.permute.xlu0 %2742 }
0x2b21   :  { %v2745_v35 = vpop.permute.xlu1 %2744  ;;  %v2748_v36 = vadd.f32 %v2743_v34, %v2728_v30 }
0x2b22   :  { %v2749_v37 = vadd.f32 %v2745_v35, %v2729_v33 }
0x2b23   :  { %8174 = vtanh.f32 %v2748_v36 }
0x2b24   :  { %8176 = vtanh.f32 %v2749_v37 }
0x2b30   :  { %v8175_v45 = vpop.eup %8174 }
0x2b31   :  { %v8177_v38 = vpop.eup %8176  ;;  %2754 = vrot.lane.b32.xlu0 %v8175_v45, %s8552_s17 }
0x2b32   :  { %2756 = vrot.lane.b32.xlu1 %v8177_v38, %s8552_s17  ;;  %s8556_s17 = smov 120  }
0x2b35   :  { %1731 = vrot.lane.b32.xlu0 %v9100_v47, %s8553_s24  ;;  %v2777_v47 = vld [vmem:[%s9819_s7 + $0x18] sm:$0xff] }
0x2b36   :  { %1877 = vrot.lane.b32.xlu1 %v9124_v19, %s8553_s24  ;;  %7597 = vmatprep.subr.mxu0 %v2777_v47  ;;  %v2775_v19 = vld [vmem:[%s9819_s7 + $0x8] sm:$0xff] }
0x2b37   :  { %7598 = vmatpush3.msra.mxu0 %v2777_v47 }
0x2b39   :  { %2024 = vrot.lane.b32.xlu0 %v9151_v52, %s8553_s24 }
0x2b3a   :  { %2172 = vrot.lane.b32.xlu1 %v9178_v31, %s8553_s24 }
0x2b3d   :  { %2320 = vrot.lane.b32.xlu0 %v9204_v28, %s8553_s24 }
0x2b3e   :  { %2468 = vrot.lane.b32.xlu1 %v9231_v1, %s8553_s24 }
0x2b41   :  { %2616 = vrot.lane.b32.xlu0 %v2612_v44, %s8553_s24 }
0x2b42   :  { %1879 = vrot.lane.b32.xlu1 %v9126_v20, %s8553_s24  ;;  %v2774_v20 = vld [vmem:[%s9819_s7] sm:$0xff] }
0x2b45   :  { %1733 = vrot.lane.b32.xlu0 %v9097_v42, %s8553_s24  ;;  %v2776_v42 = vld [vmem:[%s9819_s7 + $0x10] sm:$0xff] }
0x2b46   :  { %2174 = vrot.lane.b32.xlu1 %v9180_v32, %s8553_s24  ;;  %7599 = vmatprep.subr.mxu0 %v2776_v42 }
0x2b47   :  { %7600 = vmatpush3.msra.mxu0 %v2776_v42 }
0x2b48   :  { %7601 = vmatprep.subr.mxu0 %v2775_v19 }
0x2b49   :  { %2026 = vrot.lane.b32.xlu0 %v9153_v53, %s8553_s24  ;;  %7602 = vmatpush3.msra.mxu0 %v2775_v19 }
0x2b4a   :  { %2470 = vrot.lane.b32.xlu1 %v9233_v3, %s8553_s24  ;;  %7603 = vmatprep.subr.mxu0 %v2774_v20 }
0x2b4b   :  { %7604 = vmatpush3.msra.mxu0 %v2774_v20 }
0x2b4c   :  { %7613 = vmatprep.subr.mxu0 %v8550_v0 }
0x2b4d   :  { %2322 = vrot.lane.b32.xlu0 %v9206_v29, %s8553_s24 }
0x2b51   :  { %2618 = vrot.lane.b32.xlu0 %v9248_v48, %s8553_s24 }
0x2ba3   :  { %v2755_v52 = vpop.permute.xlu0 %2754 }
0x2ba4   :  { %v2757_v53 = vpop.permute.xlu1 %2756  ;;  %v2760_v31 = vmul.f32 %v8171_v10, %v2755_v52 }
0x2ba5   :  { %v2761_v28 = vmul.f32 %v8173_v24, %v2757_v53 }
0x2ba6   :  { %2764 = vrot.lane.b32.xlu1 %v2760_v31, %s8553_s24 }
0x2ba7   :  { %v1732_v32 = vpop.permute.xlu0 %1731 }
0x2ba8   :  { %v1878_v29 = vpop.permute.xlu1 %1877  ;;  %1737 = vst.msk [vmem:[#allocation2] sm:$0x1] %vm463_vm4, %v1732_v32 }
0x2ba9   :  { %1883 = vst.msk [vmem:[#allocation2] sm:$0x2] %vm611_vm5, %v1878_v29 }
0x2baa   :  { %2766 = vrot.lane.b32.xlu1 %v2761_v28, %s8553_s24 }
0x2bab   :  { %v2025_v1 = vpop.permute.xlu0 %2024 }
0x2bac   :  { %v2173_v3 = vpop.permute.xlu1 %2172  ;;  %2030 = vst.msk [vmem:[#allocation2] sm:$0x4] %vm759_vm6, %v2025_v1 }
0x2bad   :  { %2178 = vst.msk [vmem:[#allocation2] sm:$0x8] %vm908_vm7, %v2173_v3 }
0x2baf   :  { %v2321_v2 = vpop.permute.xlu0 %2320 }
0x2bb0   :  { %v2469_v39 = vpop.permute.xlu1 %2468  ;;  %2326 = vst.msk [vmem:[#allocation2] sm:$0x10] %vm1057_vm8, %v2321_v2 }
0x2bb1   :  { %2474 = vst.msk [vmem:[#allocation2] sm:$0x20] %vm1206_vm9, %v2469_v39 }
0x2bb3   :  { %v2617_v22 = vpop.permute.xlu0 %2616 }
0x2bb4   :  { %v1880_v23 = vpop.permute.xlu1 %1879  ;;  %2622 = vst.msk [vmem:[#allocation2] sm:$0x40] %vm1355_vm10, %v2617_v22 }
0x2bb5   :  { %1884 = vst.msk [vmem:[#allocation2 + $0x8] sm:$0x2] %vm611_vm5, %v1880_v23 }
0x2bb7   :  { %v1734_v61 = vpop.permute.xlu0 %1733 }
0x2bb8   :  { %v2175_v46 = vpop.permute.xlu1 %2174  ;;  %1738 = vst.msk [vmem:[#allocation2 + $0x8] sm:$0x1] %vm463_vm4, %v1734_v61 }
0x2bb9   :  { %2179 = vst.msk [vmem:[#allocation2 + $0x8] sm:$0x8] %vm908_vm7, %v2175_v46 }
0x2bbb   :  { %v2027_v62 = vpop.permute.xlu0 %2026 }
0x2bbc   :  { %v2471_v13 = vpop.permute.xlu1 %2470  ;;  %2031 = vst.msk [vmem:[#allocation2 + $0x8] sm:$0x4] %vm759_vm6, %v2027_v62 }
0x2bbd   :  { %2475 = vst.msk [vmem:[#allocation2 + $0x8] sm:$0x20] %vm1206_vm9, %v2471_v13 }
0x2bbf   :  { %v2323_v14 = vpop.permute.xlu0 %2322 }
0x2bc0   :  { %2327 = vst.msk [vmem:[#allocation2 + $0x8] sm:$0x10] %vm1057_vm8, %v2323_v14 }
0x2bc3   :  { %v2619_v40 = vpop.permute.xlu0 %2618 }
0x2bc4   :  { %2623 = vst.msk [vmem:[#allocation2 + $0x8] sm:$0x40] %vm1355_vm10, %v2619_v40 }
0x2c18   :  { %v2765_v41 = vpop.permute.xlu1 %2764 }
0x2c19   :  { %2770 = vst.msk [vmem:[#allocation2] sm:$0x80] %vm1504_vm11, %v2765_v41 }
0x2c1c   :  { %v2767_v4 = vpop.permute.xlu1 %2766 }
0x2c1d   :  { %2771 = vst.msk [vmem:[#allocation2 + $0x8] sm:$0x80] %vm1504_vm11, %v2767_v4 }
0x2c20   :  { %v9322_v43 = vld [vmem:[#allocation2] sm:$0xff] }
0x2c21   :  { %7605 = vmatprep.mubr.msk.f32.mxu0 %vm327_vm3, %v9322_v43 }
0x2c24   :  { %v9326_v7 = vld [vmem:[#allocation2 + $0x8] sm:$0xff] }
0x2c25   :  { %7606 = vmatmul.mubr.msk.f32.vlgmr.msra.gmra.mxu0 %vm327_vm3, %v9326_v7 }
0x2c26   :  { %7615 = vmatprep.mubr.msk.f32.mxu0 %vm8551_vm0, %v8550_v0 }
0x2ce5   :  { %v7607_v44 = vpop.f32.mrf.mxu0 }
0x2ce6   :  { %v9332_v48 = vadd.f32 %v7607_v44, %v7062_v8  ;;  %v2866_v44 = vld [vmem:[%s9821_s9] sm:$0xff] }
0x2ce7   :  { %v2857_v49 = vpop.f32.mrf.mxu0 }
0x2ce8   :  { %v9334_v50 = vadd.f32 %v7062_v8, %v2857_v49  ;;  %2949 = vrot.lane.b32.xlu1 %v9332_v48, %s8554_s5 }
0x2cea   :  { %2871 = vrot.lane.b32.xlu0 %v9334_v50, %s8554_s5 }
0x2d5a   :  { %v2950_v51 = vpop.permute.xlu1 %2949 }
0x2d5b   :  { %7614 = vmatpush3.xpose.msk.msra.mxu0 %vm2873_vm12, %v2950_v51 }
0x2d5c   :  { %v2872_v54 = vpop.permute.xlu0 %2871  ;;  %7623 = vmatprep.subr.mxu0 %v8550_v0 }
0x2d5d   :  { %7609 = vmatpush3.xpose.msk.msra.mxu1 %vm2873_vm12, %v2872_v54 }
0x2d5e   :  { %7616 = vmatmul.mubr.msk.f32.vlgmr.msra.gmra.mxu0 %vm2873_vm12, %v9332_v48  ;;  %7618 = vmatprep.subr.mxu1 %v8550_v0 }
0x2d5f   :  { %7625 = vmatprep.mubr.msk.f32.mxu0 %vm8551_vm0, %v8550_v0 }
0x2d60   :  { %7611 = vmatmul.mubr.msk.f32.vlgmr.msra.gmra.mxu1 %vm2873_vm12, %v9334_v50 }
0x2d61   :  { %7620 = vmatprep.mubr.msk.f32.mxu1 %vm8551_vm0, %v8550_v0 }
0x2e1e   :  { %v3021_v55 = vpop.f32.mrf.mxu0 }
0x2e1f   :  { %v3026_v56 = vmul.f32 0.35355338, %v3021_v55 }
0x2e20   :  { %v2944_v57 = vpop.f32.mrf.mxu1  ;;  %v7617_v58 = vpop.f32.mrf.mxu0 }
0x2e21   :  { %v3025_v59 = vmul.f32 0.35355338, %v2944_v57  ;;  %v3030_v60 = vsel %vm2873_vm12, %v3026_v56, -inf }
0x2e22   :  { %3031 = vmax.xlane.f32.xlu1 %v3030_v60  ;;  %v7612_v63 = vpop.f32.mrf.mxu1  ;;  %v2867_v60 = vld [vmem:[%s9821_s9 + $0x8] sm:$0xff] }
0x2e23   :  { %v3027_v6 = vsel %vm2873_vm12, %v3025_v59, -inf }
0x2e24   :  { %3028 = vmax.xlane.f32.xlu0 %v3027_v6 }
0x2e33   :  { %3049 = vrot.lane.b32.xlu1 %v9334_v50, %s8553_s24 }
0x2e37   :  { %3203 = vrot.lane.b32.xlu1 %v9334_v50, %s8555_s1 }
0x2e3b   :  { %3281 = vrot.lane.b32.xlu1 %v9332_v48, %s8555_s1 }
0x2e3f   :  { %3279 = vrot.lane.b32.xlu1 %v9332_v48, %s8556_s17 }
0x2eab   :  { %v3032_v9 = vpop.xlane.xlu1 %3031 }
0x2eac   :  { %v3034_v12 = vsub.f32 %v3026_v56, %v3032_v9 }
0x2ead   :  { %v3029_v16 = vpop.xlane.xlu0 %3028 }
0x2eae   :  { %v3037_v17 = vmul.f32 1.442695, %v3034_v12  ;;  %v3033_v18 = vsub.f32 %v3025_v59, %v3029_v16 }
0x2eaf   :  { %v3050_v21 = vpop.permute.xlu1 %3049 }
0x2eb0   :  { %8178 = vpow2.f32 %v3037_v17  ;;  %v3035_v10 = vmul.f32 1.442695, %v3033_v18  ;;  %7619 = vmatpush3.msra.mxu1 %v3050_v21 }
0x2eb1   :  { %7628 = vmatprep.subr.mxu1 %v8550_v0 }
0x2eb2   :  { %8180 = vpow2.f32 %v3035_v10 }
0x2eb3   :  { %v3204_v27 = vpop.permute.xlu1 %3203 }
0x2eb7   :  { %v3282_v34 = vpop.permute.xlu1 %3281 }
0x2ebb   :  { %v3280_v45 = vpop.permute.xlu1 %3279 }
0x2ebd   :  { %v8179_v5 = vpop.eup %8178 }
0x2ebe   :  { %v3042_v24 = vsel %vm2873_vm12, %v8179_v5, 0.0 }
0x2ebf   :  { %v8181_v15 = vpop.eup %8180  ;;  %3043 = vadd.xlane.f32.xlu0 %v3042_v24 }
0x2ec0   :  { %v3039_v11 = vsel %vm2873_vm12, %v8181_v15, 0.0 }
0x2ec3   :  { %3040 = vadd.xlane.f32.xlu0 %v3039_v11 }
0x2ed9   :  { %3125 = vrot.lane.b32.xlu0 %v9332_v48, %s8553_s24 }
0x2edd   :  { %3201 = vrot.lane.b32.xlu0 %v9334_v50, %s8556_s17 }
0x2f48   :  { %v3044_v25 = vpop.xlane.xlu0 %3043 }
0x2f49   :  { %8182 = vrcp.f32 %v3044_v25 }
0x2f4c   :  { %v3041_v26 = vpop.xlane.xlu0 %3040 }
0x2f4d   :  { %8184 = vrcp.f32 %v3041_v26 }
0x2f50   :  { %v3126_v30 = vpop.permute.xlu0 %3125 }
0x2f51   :  { %7624 = vmatpush3.msra.mxu0 %v3126_v30 }
0x2f52   :  { %7633 = vmatprep.subr.mxu0 %v8550_v0 }
0x2f54   :  { %v3202_v38 = vpop.permute.xlu0 %3201 }
0x2f56   :  { %v8183_v33 = vpop.eup %8182 }
0x2f57   :  { %v3048_v35 = vmul.f32 %v8183_v33, %v8179_v5 }
0x2f59   :  { %7626 = vmatmul.mubr.msk.f32.vlgmr.msra.gmra.mxu0 %vm2873_vm12, %v3048_v35 }
0x2f5a   :  { %v8185_v36 = vpop.eup %8184  ;;  %7634 = vmatpush3.xpose.msk.msra.mxu0 %vm2873_vm12, %v3282_v34  ;;  %7635 = vmatprep.mubr.msk.f32.mxu0 %vm8551_vm0, %v8550_v0 }
0x2f5b   :  { %v3046_v37 = vmul.f32 %v8185_v36, %v8181_v15  ;;  %7643 = vmatprep.subr.mxu0 %v8550_v0 }
0x2f5d   :  { %7621 = vmatmul.mubr.msk.f32.vlgmr.msra.gmra.mxu1 %vm2873_vm12, %v3046_v37  ;;  %7636 = vmatmul.mubr.msk.f32.vlgmr.msra.gmra.mxu0 %vm2873_vm12, %v3280_v45 }
0x2f5e   :  { %7629 = vmatpush3.xpose.msk.msra.mxu1 %vm2873_vm12, %v3204_v27  ;;  %7630 = vmatprep.mubr.msk.f32.mxu1 %vm8551_vm0, %v8550_v0 }
0x2f5f   :  { %7638 = vmatprep.subr.mxu1 %v8550_v0  ;;  %7645 = vmatprep.mubr.msk.f32.mxu0 %vm8551_vm0, %v8550_v0 }
0x2f61   :  { %7631 = vmatmul.mubr.msk.f32.vlgmr.msra.gmra.mxu1 %vm2873_vm12, %v3202_v38 }
0x2f62   :  { %7640 = vmatprep.mubr.msk.f32.mxu1 %vm8551_vm0, %v8550_v0 }
0x3019   :  { %v3197_v47 = vpop.f32.mrf.mxu0 }
0x301b   :  { %v7627_v42 = vpop.f32.mrf.mxu0 }
0x301d   :  { %v3121_v19 = vpop.f32.mrf.mxu1  ;;  %v3353_v20 = vpop.f32.mrf.mxu0 }
0x301e   :  { %v3358_v52 = vmul.f32 0.35355338, %v3353_v20 }
0x301f   :  { %v7622_v53 = vpop.f32.mrf.mxu1  ;;  %v7637_v31 = vpop.f32.mrf.mxu0 }
0x3020   :  { %v3362_v32 = vsel %vm2873_vm12, %v3358_v52, -inf }
0x3021   :  { %3363 = vmax.xlane.f32.xlu1 %v3362_v32  ;;  %v3275_v28 = vpop.f32.mrf.mxu1 }
0x3022   :  { %v3357_v29 = vmul.f32 0.35355338, %v3275_v28 }
0x3023   :  { %v7632_v1 = vpop.f32.mrf.mxu1 }
0x3024   :  { %v3359_v3 = vsel %vm2873_vm12, %v3357_v29, -inf }
0x3025   :  { %3360 = vmax.xlane.f32.xlu0 %v3359_v3 }
0x3032   :  { %3381 = vrot.lane.b32.xlu1 %v9334_v50, %s8557_s2 }
0x3036   :  { %3697 = vrot.lane.b32.xlu1 %v9334_v50, %s8558_s14 }
0x303a   :  { %3775 = vrot.lane.b32.xlu1 %v9332_v48, %s8558_s14 }
0x303e   :  { %3773 = vrot.lane.b32.xlu1 %v9332_v48, %s8559_s12 }
0x30aa   :  { %v3364_v2 = vpop.xlane.xlu1 %3363 }
0x30ab   :  { %v3366_v39 = vsub.f32 %v3358_v52, %v3364_v2 }
0x30ad   :  { %v3369_v22 = vmul.f32 1.442695, %v3366_v39  ;;  %v2868_v39 = vld [vmem:[%s9821_s9 + $0x10] sm:$0xff] }
0x30ae   :  { %v3382_v23 = vpop.permute.xlu1 %3381  ;;  %v3361_v61 = vpop.xlane.xlu0 %3360 }
0x30af   :  { %8186 = vpow2.f32 %v3369_v22  ;;  %v3365_v46 = vsub.f32 %v3357_v29, %v3361_v61  ;;  %7639 = vmatpush3.msra.mxu1 %v3382_v23 }
0x30b0   :  { %7648 = vmatprep.subr.mxu1 %v2867_v60 }
0x30b1   :  { %v3367_v62 = vmul.f32 1.442695, %v3365_v46 }
0x30b2   :  { %v3698_v51 = vpop.permute.xlu1 %3697 }
0x30b3   :  { %8188 = vpow2.f32 %v3367_v62 }
0x30b6   :  { %v3776_v57 = vpop.permute.xlu1 %3775 }
0x30ba   :  { %v3774_v59 = vpop.permute.xlu1 %3773 }
0x30bc   :  { %v8187_v13 = vpop.eup %8186 }
0x30bd   :  { %v3374_v14 = vsel %vm2873_vm12, %v8187_v13, 0.0 }
0x30be   :  { %3375 = vadd.xlane.f32.xlu0 %v3374_v14 }
0x30c0   :  { %v8189_v40 = vpop.eup %8188 }
0x30c1   :  { %v3371_v41 = vsel %vm2873_vm12, %v8189_v40, 0.0 }
0x30c2   :  { %3372 = vadd.xlane.f32.xlu0 %v3371_v41 }
0x30d8   :  { %3457 = vrot.lane.b32.xlu0 %v9332_v48, %s8557_s2 }
0x30dc   :  { %3695 = vrot.lane.b32.xlu0 %v9334_v50, %s8559_s12 }
0x3147   :  { %v3376_v4 = vpop.xlane.xlu0 %3375 }
0x3148   :  { %8190 = vrcp.f32 %v3376_v4 }
0x314b   :  { %v3373_v8 = vpop.xlane.xlu0 %3372 }
0x314c   :  { %8192 = vrcp.f32 %v3373_v8 }
0x314f   :  { %v3458_v49 = vpop.permute.xlu0 %3457 }
0x3150   :  { %7644 = vmatpush3.msra.mxu0 %v3458_v49 }
0x3151   :  { %7653 = vmatprep.subr.mxu0 %v2866_v44 }
0x3153   :  { %v3696_v21 = vpop.permute.xlu0 %3695 }
0x3155   :  { %v8191_v54 = vpop.eup %8190 }
0x3156   :  { %v3380_v55 = vmul.f32 %v8191_v54, %v8187_v13 }
0x3158   :  { %7646 = vmatmul.mubr.msk.f32.vlgmr.msra.gmra.mxu0 %vm2873_vm12, %v3380_v55 }
0x3159   :  { %v8193_v56 = vpop.eup %8192  ;;  %7655 = vmatprep.mubr.msk.f32.mxu0 %vm2873_vm12, %v3121_v19  ;;  %7654 = vmatpush3.msra.mxu0 %v2866_v44 }
0x315a   :  { %7663 = vmatprep.subr.mxu0 %v8550_v0  ;;  %v3378_v58 = vmul.f32 %v8193_v56, %v8189_v40 }
0x315c   :  { %7641 = vmatmul.mubr.msk.f32.vlgmr.msra.gmra.mxu1 %vm2873_vm12, %v3378_v58  ;;  %7656 = vmatmul.mubr.msk.f32.vlgmr.msra.gmra.mxu0 %vm2873_vm12, %v3197_v47 }
0x315d   :  { %7664 = vmatpush3.xpose.msk.msra.mxu0 %vm2873_vm12, %v3776_v57  ;;  %7665 = vmatprep.mubr.msk.f32.mxu0 %vm8551_vm0, %v8550_v0 }
0x315e   :  { %7673 = vmatprep.subr.mxu0 %v8550_v0  ;;  %7649 = vmatpush3.msra.mxu1 %v2867_v60 }
0x315f   :  { %7658 = vmatprep.subr.mxu1 %v8550_v0 }
0x3160   :  { %7666 = vmatmul.mubr.msk.f32.vlgmr.msra.gmra.mxu0 %vm2873_vm12, %v3774_v59 }
0x3161   :  { %7675 = vmatprep.mubr.msk.f32.mxu0 %vm8551_vm0, %v8550_v0 }
0x3218   :  { %v3529_v63 = vpop.f32.mrf.mxu0 }
0x321a   :  { %v7647_v6 = vpop.f32.mrf.mxu0 }
0x321c   :  { %v3453_v9 = vpop.f32.mrf.mxu1  ;;  %v9421_v12 = vpop.f32.mrf.mxu0 }
0x321d   :  { %7650 = vmatprep.mubr.msk.f32.mxu1 %vm2873_vm12, %v3453_v9 }
0x321e   :  { %v7642_v16 = vpop.f32.mrf.mxu1  ;;  %7651 = vmatmul.mubr.msk.f32.vlgmr.msra.gmra.mxu1 %vm2873_vm12, %v3529_v63  ;;  %v9425_v17 = vpop.f32.mrf.mxu0 }
0x321f   :  { %7659 = vmatpush3.xpose.msk.msra.mxu1 %vm2873_vm12, %v3698_v51  ;;  %7660 = vmatprep.mubr.msk.f32.mxu1 %vm8551_vm0, %v8550_v0 }
0x3220   :  { %v3847_v18 = vpop.f32.mrf.mxu0  ;;  %7668 = vmatprep.subr.mxu1 %v8550_v0 }
0x3221   :  { %v3852_v10 = vmul.f32 0.35355338, %v3847_v18 }
0x3222   :  { %7661 = vmatmul.mubr.msk.f32.vlgmr.msra.gmra.mxu1 %vm2873_vm12, %v3696_v21  ;;  %v7667_v5 = vpop.f32.mrf.mxu0 }
0x3223   :  { %v3856_v24 = vsel %vm2873_vm12, %v3852_v10, -inf  ;;  %7670 = vmatprep.mubr.msk.f32.mxu1 %vm8551_vm0, %v8550_v0 }
0x3224   :  { %3857 = vmax.xlane.f32.xlu1 %v3856_v24 }
0x3235   :  { %3875 = vrot.lane.b32.xlu1 %v9334_v50, %s8560_s15 }
0x3239   :  { %4112 = vrot.lane.b32.xlu1 %v9334_v50, %s8561_s18 }
0x323d   :  { %4190 = vrot.lane.b32.xlu1 %v9332_v48, %s8561_s18 }
0x3241   :  { %4188 = vrot.lane.b32.xlu1 %v9332_v48, %s8562_s20 }
0x32ad   :  { %v3858_v15 = vpop.xlane.xlu1 %3857 }
0x32ae   :  { %v3860_v25 = vsub.f32 %v3852_v10, %v3858_v15 }
0x32b0   :  { %v3863_v26 = vmul.f32 1.442695, %v3860_v25 }
0x32b1   :  { %v3876_v11 = vpop.permute.xlu1 %3875 }
0x32b2   :  { %7669 = vmatpush3.msra.mxu1 %v3876_v11  ;;  %8194 = vpow2.f32 %v3863_v26 }
0x32b3   :  { %7678 = vmatprep.subr.mxu1 %v2868_v39 }
0x32b5   :  { %v4113_v29 = vpop.permute.xlu1 %4112 }
0x32b9   :  { %v4191_v14 = vpop.permute.xlu1 %4190 }
0x32bd   :  { %v4189_v4 = vpop.permute.xlu1 %4188 }
0x32bf   :  { %v8195_v37 = vpop.eup %8194 }
0x32c0   :  { %v3868_v45 = vsel %vm2873_vm12, %v8195_v37, 0.0 }
0x32de   :  { %v9443_v27 = vpop.f32.mrf.mxu1 }
0x32df   :  { %v3692_v55 = vadd.f32 %v9421_v12, %v9443_v27 }
0x32e0   :  { %v9445_v30 = vpop.f32.mrf.mxu1 }
0x32e1   :  { %v3687_v57 = vadd.f32 %v9425_v17, %v9445_v30 }
0x32e2   :  { %v3769_v33 = vpop.f32.mrf.mxu1 }
0x32e3   :  { %v3851_v34 = vmul.f32 0.35355338, %v3769_v33 }
0x32e4   :  { %v7662_v35 = vpop.f32.mrf.mxu1 }
0x32e5   :  { %v3853_v36 = vsel %vm2873_vm12, %v3851_v34, -inf }
0x32e6   :  { %3854 = vmax.xlane.f32.xlu0 %v3853_v36 }
0x32ea   :  { %3869 = vadd.xlane.f32.xlu0 %v3868_v45 }
0x336f   :  { %v3855_v38 = vpop.xlane.xlu0 %3854 }
0x3370   :  { %v3859_v47 = vsub.f32 %v3851_v34, %v3855_v38 }
0x3372   :  { %v3861_v42 = vmul.f32 1.442695, %v3859_v47 }
0x3373   :  { %v3870_v52 = vpop.xlane.xlu0 %3869 }
0x3374   :  { %8196 = vpow2.f32 %v3861_v42 }
0x3375   :  { %8198 = vrcp.f32 %v3870_v52 }
0x3381   :  { %v8197_v19 = vpop.eup %8196 }
0x3382   :  { %v3865_v20 = vsel %vm2873_vm12, %v8197_v19, 0.0  ;;  %v8199_v31 = vpop.eup %8198 }
0x3383   :  { %3866 = vadd.xlane.f32.xlu0 %v3865_v20  ;;  %v3874_v28 = vmul.f32 %v8199_v31, %v8195_v37  ;;  %v7097_v37 = vld [vmem:[#allocation11] ss:$0 sm:$0xff] }
0x3399   :  { %3951 = vrot.lane.b32.xlu0 %v9332_v48, %s8560_s15 }
0x339d   :  { %4110 = vrot.lane.b32.xlu0 %v9334_v50, %s8562_s20 }
0x340c   :  { %v3867_v53 = vpop.xlane.xlu0 %3866 }
0x340d   :  { %8200 = vrcp.f32 %v3867_v53 }
0x3410   :  { %v3952_v32 = vpop.permute.xlu0 %3951 }
0x3411   :  { %7674 = vmatpush3.msra.mxu0 %v3952_v32 }
0x3412   :  { %7676 = vmatmul.mubr.msk.f32.vlgmr.msra.gmra.mxu0 %vm2873_vm12, %v3874_v28  ;;  %7683 = vmatprep.subr.mxu0 %v8550_v0 }
0x3413   :  { %7684 = vmatpush3.xpose.msk.msra.mxu0 %vm2873_vm12, %v4113_v29  ;;  %7685 = vmatprep.mubr.msk.f32.mxu0 %vm8551_vm0, %v8550_v0 }
0x3414   :  { %v4111_v1 = vpop.permute.xlu0 %4110  ;;  %7693 = vmatprep.subr.mxu0 %v8550_v0 }
0x3416   :  { %7686 = vmatmul.mubr.msk.f32.vlgmr.msra.gmra.mxu0 %vm2873_vm12, %v4111_v1 }
0x3417   :  { %7695 = vmatprep.mubr.msk.f32.mxu0 %vm8551_vm0, %v8550_v0 }
0x341a   :  { %v8201_v3 = vpop.eup %8200 }
0x341b   :  { %v3872_v2 = vmul.f32 %v8201_v3, %v8197_v19 }
0x341d   :  { %7671 = vmatmul.mubr.msk.f32.vlgmr.msra.gmra.mxu1 %vm2873_vm12, %v3872_v2 }
0x341e   :  { %7679 = vmatpush3.msra.mxu1 %v2868_v39 }
0x341f   :  { %7688 = vmatprep.subr.mxu1 %v8550_v0 }
0x34d2   :  { %v4023_v22 = vpop.f32.mrf.mxu0 }
0x34d4   :  { %v7677_v23 = vpop.f32.mrf.mxu0 }
0x34d6   :  { %v4184_v61 = vpop.f32.mrf.mxu0 }
0x34d7   :  { %v4266_v46 = vmul.f32 0.35355338, %v4184_v61  ;;  %v4583_v61 = vld [vmem:[%s9823_s11 + $0x10] sm:$0xff] }
0x34d8   :  { %v7687_v62 = vpop.f32.mrf.mxu0 }
0x34d9   :  { %v4268_v13 = vsel %vm2873_vm12, %v4266_v46, -inf  ;;  %v4581_v62 = vld [vmem:[%s9823_s11] sm:$0xff] }
0x34da   :  { %4269 = vmax.xlane.f32.xlu0 %v4268_v13  ;;  %v4682_v13 = vld [vmem:[%s9825_s13 + $0x38] sm:$0xff] }
0x34dd   :  { %v3947_v40 = vpop.f32.mrf.mxu1 }
0x34de   :  { %7680 = vmatprep.mubr.msk.f32.mxu1 %vm2873_vm12, %v3947_v40  ;;  %v4680_v40 = vld [vmem:[%s9825_s13 + $0x28] sm:$0xff] }
0x34df   :  { %v7672_v41 = vpop.f32.mrf.mxu1  ;;  %7681 = vmatmul.mubr.msk.f32.vlgmr.msra.gmra.mxu1 %vm2873_vm12, %v4023_v22 }
0x34e0   :  { %7689 = vmatpush3.xpose.msk.msra.mxu1 %vm2873_vm12, %v4191_v14  ;;  %7690 = vmatprep.mubr.msk.f32.mxu1 %vm8551_vm0, %v8550_v0  ;;  %v4681_v14 = vld [vmem:[%s9825_s13 + $0x30] sm:$0xff]  ;;  %v4679_v41 = vld [vmem:[%s9825_s13 + $0x20] sm:$0xff] }
0x34e1   :  { %7698 = vmatprep.subr.mxu1 %v8550_v0 }
0x34e3   :  { %7691 = vmatmul.mubr.msk.f32.vlgmr.msra.gmra.mxu1 %vm2873_vm12, %v4189_v4 }
0x34e4   :  { %7700 = vmatprep.mubr.msk.f32.mxu1 %vm8551_vm0, %v8550_v0 }
0x3563   :  { %v4270_v8 = vpop.xlane.xlu0 %4269 }
0x3564   :  { %v4274_v44 = vsub.f32 %v4266_v46, %v4270_v8  ;;  %v4582_v46 = vld [vmem:[%s9823_s11 + $0x8] sm:$0xff] }
0x3566   :  { %v4276_v49 = vmul.f32 1.442695, %v4274_v44 }
0x3568   :  { %8202 = vpow2.f32 %v4276_v49 }
0x3575   :  { %v8203_v51 = vpop.eup %8202 }
0x3576   :  { %v4280_v54 = vsel %vm2873_vm12, %v8203_v51, 0.0 }
0x3577   :  { %4281 = vadd.xlane.f32.xlu0 %v4280_v54 }
0x359f   :  { %v7682_v56 = vpop.f32.mrf.mxu1 }
0x35a0   :  { %v4109_v58 = vadd.f32 %v7682_v56, %v3692_v55  ;;  %v7098_v56 = vld [vmem:[#allocation15] ss:$0 sm:$0xff] }
0x35a1   :  { %v4099_v59 = vpop.f32.mrf.mxu1 }
0x35a2   :  { %v4108_v60 = vadd.f32 %v4099_v59, %v3687_v57 }
0x35a3   :  { %v4262_v63 = vpop.f32.mrf.mxu1 }
0x35a4   :  { %v4267_v6 = vmul.f32 0.35355338, %v4262_v63  ;;  %v7099_v63 = vld [vmem:[#allocation17] ss:$0 sm:$0xff] }
0x35a5   :  { %v7692_v9 = vpop.f32.mrf.mxu1 }
0x35a6   :  { %v4271_v16 = vsel %vm2873_vm12, %v4267_v6, -inf }
0x35a7   :  { %4272 = vmax.xlane.f32.xlu1 %v4271_v16 }
0x35b8   :  { %4290 = vrot.lane.b32.xlu1 %v9334_v50, %s8563_s4  ;;  %v2869_v50 = vld [vmem:[%s9821_s9 + $0x18] sm:$0xff] }
0x3600   :  { %v4282_v18 = vpop.xlane.xlu0 %4281 }
0x3601   :  { %8204 = vrcp.f32 %v4282_v18  ;;  %v4678_v18 = vld [vmem:[%s9825_s13 + $0x18] sm:$0xff] }
0x360e   :  { %v8205_v21 = vpop.eup %8204 }
0x360f   :  { %v4287_v24 = vmul.f32 %v8205_v21, %v8203_v51  ;;  %v4676_v21 = vld [vmem:[%s9825_s13 + $0x8] sm:$0xff] }
0x3630   :  { %v4273_v12 = vpop.xlane.xlu1 %4272 }
0x3631   :  { %v4275_v10 = vsub.f32 %v4267_v6, %v4273_v12  ;;  %v4677_v12 = vld [vmem:[%s9825_s13 + $0x10] sm:$0xff] }
0x3633   :  { %v4278_v5 = vmul.f32 1.442695, %v4275_v10  ;;  %v4675_v10 = vld [vmem:[%s9825_s13] sm:$0xff] }
0x3634   :  { %v4291_v17 = vpop.permute.xlu1 %4290 }
0x3635   :  { %8206 = vpow2.f32 %v4278_v5  ;;  %7694 = vmatpush3.msra.mxu0 %v4291_v17  ;;  %v7100_v5 = vld [vmem:[#allocation12] ss:$0 sm:$0xff] }
0x3636   :  { %7696 = vmatmul.mubr.msk.f32.vlgmr.msra.gmra.mxu0 %vm2873_vm12, %v4287_v24  ;;  %7703 = vmatprep.subr.mxu0 %v2869_v50 }
0x3637   :  { %7704 = vmatpush3.msra.mxu0 %v2869_v50 }
0x3638   :  { %7719 = vmatprep.subr.mxu0 %v4682_v13 }
0x3642   :  { %v8207_v15 = vpop.eup %8206 }
0x3643   :  { %v4283_v11 = vsel %vm2873_vm12, %v8207_v15, 0.0 }
0x3644   :  { %4284 = vadd.xlane.f32.xlu0 %v4283_v11 }
0x365a   :  { %4366 = vrot.lane.b32.xlu0 %v9332_v48, %s8563_s4 }
0x36cd   :  { %v4285_v25 = vpop.xlane.xlu0 %4284 }
0x36ce   :  { %8208 = vrcp.f32 %v4285_v25 }
0x36d1   :  { %v4367_v26 = vpop.permute.xlu0 %4366 }
0x36d2   :  { %7699 = vmatpush3.msra.mxu1 %v4367_v26  ;;  %v7103_v26 = vld [vmem:[#allocation14] ss:$0 sm:$0xff] }
0x36db   :  { %v8209_v27 = vpop.eup %8208 }
0x36dc   :  { %v4289_v30 = vmul.f32 %v8209_v27, %v8207_v15 }
0x36de   :  { %7701 = vmatmul.mubr.msk.f32.vlgmr.msra.gmra.mxu1 %vm2873_vm12, %v4289_v30 }
0x36f6   :  { %v4362_v33 = vpop.f32.mrf.mxu0 }
0x36f7   :  { %7705 = vmatprep.mubr.msk.f32.mxu0 %vm2873_vm12, %v4362_v33 }
0x36f8   :  { %v7697_v34 = vpop.f32.mrf.mxu0 }
0x379e   :  { %v4438_v35 = vpop.f32.mrf.mxu1 }
0x379f   :  { %7706 = vmatmul.mubr.msk.f32.vlgmr.msra.gmra.mxu0 %vm2873_vm12, %v4438_v35 }
0x37a0   :  { %v7702_v48 = vpop.f32.mrf.mxu1  ;;  %7720 = vmatpush3.msra.mxu0 %v4682_v13 }
0x37a1   :  { %7721 = vmatprep.subr.mxu0 %v4681_v14 }
0x37a2   :  { %7722 = vmatpush3.msra.mxu0 %v4681_v14 }
0x37a3   :  { %7723 = vmatprep.subr.mxu0 %v4680_v40 }
0x37a4   :  { %7724 = vmatpush3.msra.mxu0 %v4680_v40 }
0x37a5   :  { %7725 = vmatprep.subr.mxu0 %v4679_v41 }
0x37a6   :  { %7726 = vmatpush3.msra.mxu0 %v4679_v41  ;;  %v7107_v41 = vld [vmem:[#allocation20] ss:$0 sm:$0xff] }
0x37a7   :  { %7727 = vmatprep.subr.mxu0 %v4678_v18 }
0x37a8   :  { %7728 = vmatpush3.msra.mxu0 %v4678_v18 }
0x37a9   :  { %7729 = vmatprep.subr.mxu0 %v4677_v12 }
0x37aa   :  { %7730 = vmatpush3.msra.mxu0 %v4677_v12 }
0x37ab   :  { %7731 = vmatprep.subr.mxu0 %v4676_v21 }
0x37ac   :  { %7732 = vmatpush3.msra.mxu0 %v4676_v21 }
0x37ad   :  { %7733 = vmatprep.subr.mxu0 %v4675_v10 }
0x37ae   :  { %7734 = vmatpush3.msra.mxu0 %v4675_v10 }
0x37af   :  { %7754 = vmatprep.subr.mxu0 %v8550_v0 }
0x385f   :  { %v7707_v36 = vpop.f32.mrf.mxu0 }
0x3860   :  { %v4524_v45 = vadd.f32 %v7707_v36, %v4109_v58 }
0x3861   :  { %v4514_v38 = vpop.f32.mrf.mxu0 }
0x3862   :  { %v4533_v47 = vadd.f32 %v7097_v37, %v4524_v45  ;;  %v4523_v42 = vadd.f32 %v4514_v38, %v4108_v60 }
0x3864   :  { %v4532_v19 = vadd.f32 %v7097_v37, %v4523_v42  ;;  %v4535_v20 = vadd.f32 %v4533_v47, %v9326_v7 }
0x3866   :  { %v4541_v52 = vsel %vm327_vm3, %v4535_v20, 0.0  ;;  %v4534_v53 = vadd.f32 %v4532_v19, %v9322_v43  ;;  %v4584_v43 = vld [vmem:[%s9823_s11 + $0x18] sm:$0xff] }
0x3867   :  { %4542 = vadd.xlane.f32.xlu0 %v4541_v52  ;;  %7708 = vmatprep.subr.mxu1 %v4584_v43 }
0x3868   :  { %v4538_v31 = vsel %vm327_vm3, %v4534_v53, 0.0  ;;  %7709 = vmatpush3.msra.mxu1 %v4584_v43 }
0x3869   :  { %4539 = vadd.xlane.f32.xlu1 %v4538_v31  ;;  %7710 = vmatprep.subr.mxu1 %v4583_v61 }
0x386a   :  { %7711 = vmatpush3.msra.mxu1 %v4583_v61 }
0x386b   :  { %7712 = vmatprep.subr.mxu1 %v4582_v46 }
0x386c   :  { %7713 = vmatpush3.msra.mxu1 %v4582_v46  ;;  %v7106_v46 = vld [vmem:[#allocation18] ss:$0 sm:$0xff] }
0x386d   :  { %7714 = vmatprep.subr.mxu1 %v4581_v62 }
0x386e   :  { %7715 = vmatpush3.msra.mxu1 %v4581_v62 }
0x38f0   :  { %v4543_v32 = vpop.xlane.xlu0 %4542 }
0x38f1   :  { %v4546_v28 = vmul.f32 0.03125, %v4543_v32 }
0x38f2   :  { %v4540_v29 = vpop.xlane.xlu1 %4539 }
0x38f3   :  { %v4548_v1 = vsub.f32 %v4535_v20, %v4546_v28  ;;  %v4545_v3 = vmul.f32 0.03125, %v4540_v29  ;;  %v7111_v28 = vld [vmem:[%s9819_s7 + $0x38] sm:$0xff]  ;;  %v7110_v29 = vld [vmem:[%s9819_s7 + $0x30] sm:$0xff] }
0x38f4   :  { %7738 = vmatprep.subr.mxu1 %v7111_v28 }
0x38f5   :  { %v4547_v2 = vsub.f32 %v4534_v53, %v4545_v3  ;;  %v4550_v39 = vmul.f32 %v4548_v1, %v4548_v1  ;;  %v7108_v3 = vld [vmem:[%s9819_s7 + $0x20] sm:$0xff] }
0x38f7   :  { %v4554_v22 = vsel %vm327_vm3, %v4550_v39, 0.0  ;;  %v4549_v23 = vmul.f32 %v4547_v2, %v4547_v2 }
0x38f8   :  { %4555 = vadd.xlane.f32.xlu0 %v4554_v22 }
0x38f9   :  { %v4551_v7 = vsel %vm327_vm3, %v4549_v23, 0.0 }
0x38fa   :  { %4552 = vadd.xlane.f32.xlu1 %v4551_v7 }
0x3981   :  { %v4556_v4 = vpop.xlane.xlu0 %4555 }
0x3982   :  { %v4558_v8 = vmul.f32 0.03125, %v4556_v4 }
0x3983   :  { %v4553_v44 = vpop.xlane.xlu1 %4552 }
0x3984   :  { %v4560_v49 = vadd.f32 1e-05, %v4558_v8  ;;  %v4557_v51 = vmul.f32 0.03125, %v4553_v44 }
0x3986   :  { %8210 = vrsqrt.f32 %v4560_v49  ;;  %v4559_v54 = vadd.f32 1e-05, %v4557_v51  ;;  %v7112_v49 = vld [vmem:[#allocation9 + $0x1] ss:$0 sm:$0xff] }
0x3988   :  { %8212 = vrsqrt.f32 %v4559_v54 }
0x3993   :  { %v8211_v55 = vpop.eup %8210 }
0x3994   :  { %v4564_v57 = vmul.f32 %v8211_v55, %v4548_v1  ;;  %v7109_v1 = vld [vmem:[%s9819_s7 + $0x28] sm:$0xff] }
0x3995   :  { %v8213_v58 = vpop.eup %8212 }
0x3996   :  { %v4563_v59 = vmul.f32 %v8213_v58, %v4547_v2  ;;  %v4572_v60 = vmul.f32 %v7098_v56, %v4564_v57 }
0x3998   :  { %v4571_v6 = vmul.f32 %v7098_v56, %v4563_v59  ;;  %v4580_v16 = vadd.f32 %v7099_v63, %v4572_v60 }
0x399a   :  { %v4579_v9 = vadd.f32 %v7099_v63, %v4571_v6 }
0x399c   :  { %7716 = vmatprep.mubr.msk.f32.mxu1 %vm327_vm3, %v4579_v9 }
0x399d   :  { %7717 = vmatmul.mubr.msk.f32.vlgmr.msra.gmra.mxu1 %vm327_vm3, %v4580_v16 }
0x399e   :  { %7739 = vmatpush3.msra.mxu1 %v7111_v28 }
0x399f   :  { %7740 = vmatprep.subr.mxu1 %v7110_v29 }
0x39a0   :  { %7741 = vmatpush3.msra.mxu1 %v7110_v29 }
0x39a1   :  { %7742 = vmatprep.subr.mxu1 %v7109_v1 }
0x39a2   :  { %7743 = vmatpush3.msra.mxu1 %v7109_v1 }
0x39a3   :  { %7744 = vmatprep.subr.mxu1 %v7108_v3 }
0x39a4   :  { %7745 = vmatpush3.msra.mxu1 %v7108_v3 }
0x39a5   :  { %7749 = vmatprep.subr.mxu1 %v8550_v0 }
0x3a5d   :  { %v7718_v17 = vpop.f32.mrf.mxu1 }
0x3a5e   :  { %v4670_v24 = vadd.f32 %v7718_v17, %v7100_v5 }
0x3a5f   :  { %v4664_v15 = vpop.f32.mrf.mxu1 }
0x3a60   :  { %v4665_v11 = vadd.f32 %v7100_v5, %v4664_v15  ;;  %v4674_v25 = vmax.f32 %v4670_v24, 0.0 }
0x3a62   :  { %v4673_v50 = vmax.f32 %v4665_v11, 0.0 }
0x3a64   :  { %7735 = vmatprep.mubr.msk.f32.mxu0 %vm4690_vm13, %v4673_v50 }
0x3a65   :  { %7736 = vmatmul.mubr.msk.f32.vlgmr.msra.gmra.mxu0 %vm4690_vm13, %v4674_v25 }
0x3a66   :  { %7756 = vmatprep.mubr.msk.f32.mxu0 %vm8551_vm0, %v8550_v0 }
0x3b25   :  { %v7737_v27 = vpop.f32.mrf.mxu0 }
0x3b26   :  { %v4769_v30 = vadd.f32 %v7737_v27, %v7103_v26 }
0x3b27   :  { %v4763_v33 = vpop.f32.mrf.mxu0 }
0x3b28   :  { %v4773_v34 = vadd.f32 %v4769_v30, %v4580_v16  ;;  %v4764_v35 = vadd.f32 %v7103_v26, %v4763_v33 }
0x3b2a   :  { %v4772_v48 = vadd.f32 %v4764_v35, %v4579_v9  ;;  %v4779_v36 = vsel %vm327_vm3, %v4773_v34, 0.0 }
0x3b2b   :  { %4780 = vadd.xlane.f32.xlu0 %v4779_v36 }
0x3b2c   :  { %v4776_v37 = vsel %vm327_vm3, %v4772_v48, 0.0 }
0x3b2d   :  { %4777 = vadd.xlane.f32.xlu1 %v4776_v37 }
0x3bb4   :  { %v4781_v45 = vpop.xlane.xlu0 %4780 }
0x3bb5   :  { %v4783_v38 = vmul.f32 0.03125, %v4781_v45 }
0x3bb6   :  { %v4778_v47 = vpop.xlane.xlu1 %4777 }
0x3bb7   :  { %v4785_v42 = vsub.f32 %v4773_v34, %v4783_v38  ;;  %v4782_v19 = vmul.f32 0.03125, %v4778_v47 }
0x3bb9   :  { %v4784_v20 = vsub.f32 %v4772_v48, %v4782_v19  ;;  %v4787_v52 = vmul.f32 %v4785_v42, %v4785_v42 }
0x3bbb   :  { %v4791_v53 = vsel %vm327_vm3, %v4787_v52, 0.0  ;;  %v4786_v31 = vmul.f32 %v4784_v20, %v4784_v20 }
0x3bbc   :  { %4792 = vadd.xlane.f32.xlu0 %v4791_v53 }
0x3bbd   :  { %v4788_v32 = vsel %vm327_vm3, %v4786_v31, 0.0 }
0x3bbe   :  { %4789 = vadd.xlane.f32.xlu1 %v4788_v32 }
0x3c45   :  { %v4793_v2 = vpop.xlane.xlu0 %4792 }
0x3c46   :  { %v4795_v39 = vmul.f32 0.03125, %v4793_v2 }
0x3c47   :  { %v4790_v22 = vpop.xlane.xlu1 %4789 }
0x3c48   :  { %v4797_v23 = vadd.f32 1e-05, %v4795_v39  ;;  %v4794_v7 = vmul.f32 0.03125, %v4790_v22 }
0x3c4a   :  { %8214 = vrsqrt.f32 %v4797_v23  ;;  %v4796_v43 = vadd.f32 1e-05, %v4794_v7 }
0x3c4c   :  { %8216 = vrsqrt.f32 %v4796_v43 }
0x3c57   :  { %v8215_v61 = vpop.eup %8214 }
0x3c58   :  { %v4801_v62 = vmul.f32 %v8215_v61, %v4785_v42 }
0x3c59   :  { %v8217_v13 = vpop.eup %8216 }
0x3c5a   :  { %v4800_v14 = vmul.f32 %v8217_v13, %v4784_v20  ;;  %v4809_v40 = vmul.f32 %v7106_v46, %v4801_v62 }
0x3c5c   :  { %v4808_v4 = vmul.f32 %v7106_v46, %v4800_v14  ;;  %v9564_v44 = vadd.f32 %v7107_v41, %v4809_v40 }
0x3c5e   :  { %v9562_v8 = vadd.f32 %v7107_v41, %v4808_v4 }
0x3c60   :  { %7746 = vmatprep.mubr.msk.f32.mxu1 %vm327_vm3, %v9562_v8 }
0x3c61   :  { %7747 = vmatmul.mubr.msk.f32.vlgmr.msra.gmra.mxu1 %vm327_vm3, %v9564_v44 }
0x3c62   :  { %7751 = vmatprep.mubr.msk.f32.mxu1 %vm8551_vm0, %v8550_v0 }
0x3d21   :  { %v7748_v51 = vpop.f32.mrf.mxu1 }
0x3d22   :  { %v9572_v54 = vadd.f32 %v7748_v51, %v7112_v49  ;;  %v7115_v51 = vld [vmem:[%s9821_s9 + $0x20] sm:$0xff] }
0x3d23   :  { %v4903_v55 = vpop.f32.mrf.mxu1 }
0x3d24   :  { %v9574_v56 = vadd.f32 %v7112_v49, %v4903_v55  ;;  %4995 = vrot.lane.b32.xlu0 %v9572_v54, %s8554_s5 }
0x3d26   :  { %4918 = vrot.lane.b32.xlu1 %v9574_v56, %s8554_s5 }
0x3d96   :  { %v4996_v57 = vpop.permute.xlu0 %4995 }
0x3d97   :  { %7755 = vmatpush3.xpose.msk.msra.mxu0 %vm2873_vm12, %v4996_v57 }
0x3d98   :  { %v4919_v58 = vpop.permute.xlu1 %4918  ;;  %7764 = vmatprep.subr.mxu0 %v8550_v0 }
0x3d99   :  { %7750 = vmatpush3.xpose.msk.msra.mxu1 %vm2873_vm12, %v4919_v58 }
0x3d9a   :  { %7757 = vmatmul.mubr.msk.f32.vlgmr.msra.gmra.mxu0 %vm2873_vm12, %v9572_v54  ;;  %7759 = vmatprep.subr.mxu1 %v8550_v0 }
0x3d9b   :  { %7766 = vmatprep.mubr.msk.f32.mxu0 %vm8551_vm0, %v8550_v0 }
0x3d9c   :  { %7752 = vmatmul.mubr.msk.f32.vlgmr.msra.gmra.mxu1 %vm2873_vm12, %v9574_v56 }
0x3d9d   :  { %7761 = vmatprep.mubr.msk.f32.mxu1 %vm8551_vm0, %v8550_v0 }
0x3e5a   :  { %v5067_v59 = vpop.f32.mrf.mxu0 }
0x3e5b   :  { %v5072_v60 = vmul.f32 0.35355338, %v5067_v59 }
0x3e5c   :  { %v4990_v63 = vpop.f32.mrf.mxu1  ;;  %v7758_v6 = vpop.f32.mrf.mxu0 }
0x3e5d   :  { %v5071_v9 = vmul.f32 0.35355338, %v4990_v63  ;;  %v5076_v16 = vsel %vm2873_vm12, %v5072_v60, -inf }
0x3e5e   :  { %5077 = vmax.xlane.f32.xlu0 %v5076_v16  ;;  %v7753_v18 = vpop.f32.mrf.mxu1  ;;  %v7116_v16 = vld [vmem:[%s9821_s9 + $0x28] sm:$0xff] }
0x3e5f   :  { %v5073_v12 = vsel %vm2873_vm12, %v5071_v9, -inf }
0x3e60   :  { %5074 = vmax.xlane.f32.xlu1 %v5073_v12 }
0x3e71   :  { %5095 = vrot.lane.b32.xlu1 %v9574_v56, %s8553_s24 }
0x3e74   :  { %5171 = vrot.lane.b32.xlu0 %v9572_v54, %s8553_s24 }
0x3e75   :  { %5249 = vrot.lane.b32.xlu1 %v9574_v56, %s8555_s1 }
0x3e79   :  { %5327 = vrot.lane.b32.xlu1 %v9572_v54, %s8555_s1 }
0x3ee7   :  { %v5078_v21 = vpop.xlane.xlu0 %5077 }
0x3ee8   :  { %v5080_v10 = vsub.f32 %v5072_v60, %v5078_v21 }
0x3ee9   :  { %v5075_v5 = vpop.xlane.xlu1 %5074 }
0x3eea   :  { %v5083_v17 = vmul.f32 1.442695, %v5080_v10  ;;  %v5079_v24 = vsub.f32 %v5071_v9, %v5075_v5 }
0x3eeb   :  { %v5172_v15 = vpop.permute.xlu0 %5171 }
0x3eec   :  { %8218 = vpow2.f32 %v5083_v17  ;;  %v5081_v11 = vmul.f32 1.442695, %v5079_v24  ;;  %7765 = vmatpush3.msra.mxu0 %v5172_v15 }
0x3eed   :  { %v5096_v50 = vpop.permute.xlu1 %5095  ;;  %7774 = vmatprep.subr.mxu0 %v8550_v0 }
0x3eee   :  { %8220 = vpow2.f32 %v5081_v11  ;;  %7760 = vmatpush3.msra.mxu1 %v5096_v50 }
0x3eef   :  { %7769 = vmatprep.subr.mxu1 %v8550_v0 }
0x3ef1   :  { %v5250_v33 = vpop.permute.xlu1 %5249 }
0x3ef5   :  { %v5328_v34 = vpop.permute.xlu1 %5327 }
0x3ef9   :  { %v8219_v25 = vpop.eup %8218 }
0x3efa   :  { %v5088_v26 = vsel %vm2873_vm12, %v8219_v25, 0.0 }
0x3efb   :  { %v8221_v27 = vpop.eup %8220  ;;  %5089 = vadd.xlane.f32.xlu0 %v5088_v26 }
0x3efc   :  { %v5085_v30 = vsel %vm2873_vm12, %v8221_v27, 0.0 }
0x3efd   :  { %5086 = vadd.xlane.f32.xlu1 %v5085_v30 }
0x3f0e   :  { %5325 = vrot.lane.b32.xlu1 %v9572_v54, %s8556_s17 }
0x3f11   :  { %5247 = vrot.lane.b32.xlu0 %v9574_v56, %s8556_s17 }
0x3f84   :  { %v5090_v35 = vpop.xlane.xlu0 %5089 }
0x3f85   :  { %8222 = vrcp.f32 %v5090_v35 }
0x3f86   :  { %v5087_v48 = vpop.xlane.xlu1 %5086 }
0x3f87   :  { %8224 = vrcp.f32 %v5087_v48 }
0x3f88   :  { %v5248_v42 = vpop.permute.xlu0 %5247 }
0x3f8a   :  { %v5326_v47 = vpop.permute.xlu1 %5325 }
0x3f92   :  { %v8223_v36 = vpop.eup %8222 }
0x3f93   :  { %v5094_v37 = vmul.f32 %v8223_v36, %v8219_v25 }
0x3f94   :  { %v8225_v45 = vpop.eup %8224 }
0x3f95   :  { %7767 = vmatmul.mubr.msk.f32.vlgmr.msra.gmra.mxu0 %vm2873_vm12, %v5094_v37  ;;  %v5092_v38 = vmul.f32 %v8225_v45, %v8221_v27 }
0x3f96   :  { %7775 = vmatpush3.xpose.msk.msra.mxu0 %vm2873_vm12, %v5328_v34  ;;  %7776 = vmatprep.mubr.msk.f32.mxu0 %vm8551_vm0, %v8550_v0 }
0x3f97   :  { %7762 = vmatmul.mubr.msk.f32.vlgmr.msra.gmra.mxu1 %vm2873_vm12, %v5092_v38  ;;  %7784 = vmatprep.subr.mxu0 %v8550_v0 }
0x3f98   :  { %7770 = vmatpush3.xpose.msk.msra.mxu1 %vm2873_vm12, %v5250_v33  ;;  %7771 = vmatprep.mubr.msk.f32.mxu1 %vm8551_vm0, %v8550_v0 }
0x3f99   :  { %7777 = vmatmul.mubr.msk.f32.vlgmr.msra.gmra.mxu0 %vm2873_vm12, %v5326_v47  ;;  %7779 = vmatprep.subr.mxu1 %v8550_v0 }
0x3f9a   :  { %7786 = vmatprep.mubr.msk.f32.mxu0 %vm8551_vm0, %v8550_v0 }
0x3f9b   :  { %7772 = vmatmul.mubr.msk.f32.vlgmr.msra.gmra.mxu1 %vm2873_vm12, %v5248_v42 }
0x3f9c   :  { %7781 = vmatprep.mubr.msk.f32.mxu1 %vm8551_vm0, %v8550_v0 }
0x4055   :  { %v5243_v19 = vpop.f32.mrf.mxu0 }
0x4057   :  { %v5167_v20 = vpop.f32.mrf.mxu1  ;;  %v7768_v52 = vpop.f32.mrf.mxu0 }
0x4059   :  { %v7763_v53 = vpop.f32.mrf.mxu1  ;;  %v5399_v31 = vpop.f32.mrf.mxu0 }
0x405a   :  { %v5404_v32 = vmul.f32 0.35355338, %v5399_v31 }
0x405b   :  { %v5321_v28 = vpop.f32.mrf.mxu1  ;;  %v7778_v29 = vpop.f32.mrf.mxu0 }
0x405c   :  { %v5403_v1 = vmul.f32 0.35355338, %v5321_v28  ;;  %v5408_v3 = vsel %vm2873_vm12, %v5404_v32, -inf }
0x405d   :  { %5409 = vmax.xlane.f32.xlu1 %v5408_v3  ;;  %v7773_v2 = vpop.f32.mrf.mxu1 }
0x405e   :  { %v5405_v39 = vsel %vm2873_vm12, %v5403_v1, -inf }
0x405f   :  { %5406 = vmax.xlane.f32.xlu0 %v5405_v39 }
0x406e   :  { %5427 = vrot.lane.b32.xlu1 %v9574_v56, %s8557_s2 }
0x4072   :  { %5743 = vrot.lane.b32.xlu1 %v9574_v56, %s8558_s14 }
0x4076   :  { %5821 = vrot.lane.b32.xlu1 %v9572_v54, %s8558_s14 }
0x407a   :  { %5819 = vrot.lane.b32.xlu1 %v9572_v54, %s8559_s12 }
0x40e6   :  { %v5410_v22 = vpop.xlane.xlu1 %5409 }
0x40e7   :  { %v5412_v23 = vsub.f32 %v5404_v32, %v5410_v22 }
0x40e8   :  { %v5407_v7 = vpop.xlane.xlu0 %5406 }
0x40e9   :  { %v5415_v43 = vmul.f32 1.442695, %v5412_v23  ;;  %v5411_v61 = vsub.f32 %v5403_v1, %v5407_v7  ;;  %v7117_v23 = vld [vmem:[%s9821_s9 + $0x30] sm:$0xff] }
0x40ea   :  { %v5428_v46 = vpop.permute.xlu1 %5427 }
0x40eb   :  { %8226 = vpow2.f32 %v5415_v43  ;;  %v5413_v62 = vmul.f32 1.442695, %v5411_v61  ;;  %7780 = vmatpush3.msra.mxu1 %v5428_v46 }
0x40ec   :  { %7789 = vmatprep.subr.mxu1 %v7116_v16 }
0x40ed   :  { %8228 = vpow2.f32 %v5413_v62 }
0x40ee   :  { %v5744_v57 = vpop.permute.xlu1 %5743 }
0x40f2   :  { %v5822_v63 = vpop.permute.xlu1 %5821 }
0x40f6   :  { %v5820_v9 = vpop.permute.xlu1 %5819 }
0x40f8   :  { %v8227_v13 = vpop.eup %8226 }
0x40f9   :  { %v5420_v14 = vsel %vm2873_vm12, %v8227_v13, 0.0 }
0x40fa   :  { %v8229_v40 = vpop.eup %8228  ;;  %5421 = vadd.xlane.f32.xlu0 %v5420_v14 }
0x40fb   :  { %v5417_v41 = vsel %vm2873_vm12, %v8229_v40, 0.0 }
0x40fe   :  { %5418 = vadd.xlane.f32.xlu0 %v5417_v41 }
0x4114   :  { %5503 = vrot.lane.b32.xlu0 %v9572_v54, %s8557_s2 }
0x4118   :  { %5741 = vrot.lane.b32.xlu0 %v9574_v56, %s8559_s12 }
0x4183   :  { %v5422_v4 = vpop.xlane.xlu0 %5421 }
0x4184   :  { %8230 = vrcp.f32 %v5422_v4 }
0x4187   :  { %v5419_v49 = vpop.xlane.xlu0 %5418 }
0x4188   :  { %8232 = vrcp.f32 %v5419_v49 }
0x418b   :  { %v5504_v55 = vpop.permute.xlu0 %5503 }
0x418c   :  { %7785 = vmatpush3.msra.mxu0 %v5504_v55 }
0x418d   :  { %7794 = vmatprep.subr.mxu0 %v7115_v51 }
0x418f   :  { %v5742_v15 = vpop.permute.xlu0 %5741 }
0x4191   :  { %v8231_v58 = vpop.eup %8230 }
0x4192   :  { %v5426_v59 = vmul.f32 %v8231_v58, %v8227_v13 }
0x4194   :  { %7787 = vmatmul.mubr.msk.f32.vlgmr.msra.gmra.mxu0 %vm2873_vm12, %v5426_v59 }
0x4195   :  { %v8233_v60 = vpop.eup %8232  ;;  %7796 = vmatprep.mubr.msk.f32.mxu0 %vm2873_vm12, %v5167_v20  ;;  %7795 = vmatpush3.msra.mxu0 %v7115_v51 }
0x4196   :  { %7804 = vmatprep.subr.mxu0 %v8550_v0  ;;  %v5424_v6 = vmul.f32 %v8233_v60, %v8229_v40 }
0x4198   :  { %7782 = vmatmul.mubr.msk.f32.vlgmr.msra.gmra.mxu1 %vm2873_vm12, %v5424_v6  ;;  %7797 = vmatmul.mubr.msk.f32.vlgmr.msra.gmra.mxu0 %vm2873_vm12, %v5243_v19 }
0x4199   :  { %7805 = vmatpush3.xpose.msk.msra.mxu0 %vm2873_vm12, %v5822_v63  ;;  %7806 = vmatprep.mubr.msk.f32.mxu0 %vm8551_vm0, %v8550_v0 }
0x419a   :  { %7814 = vmatprep.subr.mxu0 %v8550_v0  ;;  %7790 = vmatpush3.msra.mxu1 %v7116_v16 }
0x419b   :  { %7799 = vmatprep.subr.mxu1 %v8550_v0 }
0x419c   :  { %7807 = vmatmul.mubr.msk.f32.vlgmr.msra.gmra.mxu0 %vm2873_vm12, %v5820_v9 }
0x419d   :  { %7816 = vmatprep.mubr.msk.f32.mxu0 %vm8551_vm0, %v8550_v0 }
0x4254   :  { %v5575_v18 = vpop.f32.mrf.mxu0 }
0x4256   :  { %v7788_v12 = vpop.f32.mrf.mxu0 }
0x4258   :  { %v5499_v21 = vpop.f32.mrf.mxu1  ;;  %v9661_v10 = vpop.f32.mrf.mxu0 }
0x4259   :  { %7791 = vmatprep.mubr.msk.f32.mxu1 %vm2873_vm12, %v5499_v21 }
0x425a   :  { %v7783_v5 = vpop.f32.mrf.mxu1  ;;  %7792 = vmatmul.mubr.msk.f32.vlgmr.msra.gmra.mxu1 %vm2873_vm12, %v5575_v18  ;;  %v9665_v17 = vpop.f32.mrf.mxu0 }
0x425b   :  { %7800 = vmatpush3.xpose.msk.msra.mxu1 %vm2873_vm12, %v5744_v57  ;;  %7801 = vmatprep.mubr.msk.f32.mxu1 %vm8551_vm0, %v8550_v0 }
0x425c   :  { %v5893_v24 = vpop.f32.mrf.mxu0  ;;  %7809 = vmatprep.subr.mxu1 %v8550_v0 }
0x425d   :  { %v5898_v11 = vmul.f32 0.35355338, %v5893_v24 }
0x425e   :  { %7802 = vmatmul.mubr.msk.f32.vlgmr.msra.gmra.mxu1 %vm2873_vm12, %v5742_v15  ;;  %v7808_v50 = vpop.f32.mrf.mxu0 }
0x425f   :  { %v5902_v25 = vsel %vm2873_vm12, %v5898_v11, -inf  ;;  %7811 = vmatprep.mubr.msk.f32.mxu1 %vm8551_vm0, %v8550_v0 }
0x4260   :  { %5903 = vmax.xlane.f32.xlu1 %v5902_v25 }
0x4271   :  { %5921 = vrot.lane.b32.xlu1 %v9574_v56, %s8560_s15 }
0x4275   :  { %6158 = vrot.lane.b32.xlu1 %v9574_v56, %s8561_s18 }
0x4279   :  { %6236 = vrot.lane.b32.xlu1 %v9572_v54, %s8561_s18 }
0x427d   :  { %6234 = vrot.lane.b32.xlu1 %v9572_v54, %s8562_s20 }
0x42e9   :  { %v5904_v26 = vpop.xlane.xlu1 %5903 }
0x42ea   :  { %v5906_v30 = vsub.f32 %v5898_v11, %v5904_v26 }
0x42ec   :  { %v5909_v33 = vmul.f32 1.442695, %v5906_v30 }
0x42ed   :  { %v5922_v27 = vpop.permute.xlu1 %5921 }
0x42ee   :  { %7810 = vmatpush3.msra.mxu1 %v5922_v27  ;;  %8234 = vpow2.f32 %v5909_v33 }
0x42ef   :  { %7819 = vmatprep.subr.mxu1 %v7117_v23 }
0x42f1   :  { %v6159_v3 = vpop.permute.xlu1 %6158 }
0x42f5   :  { %v6237_v14 = vpop.permute.xlu1 %6236 }
0x42f9   :  { %v6235_v4 = vpop.permute.xlu1 %6234 }
0x42fb   :  { %v8235_v38 = vpop.eup %8234 }
0x42fc   :  { %v5914_v47 = vsel %vm2873_vm12, %v8235_v38, 0.0 }
0x431a   :  { %v9683_v34 = vpop.f32.mrf.mxu1 }
0x431b   :  { %v5738_v59 = vadd.f32 %v9661_v10, %v9683_v34 }
0x431c   :  { %v9685_v35 = vpop.f32.mrf.mxu1 }
0x431d   :  { %v5733_v63 = vadd.f32 %v9665_v17, %v9685_v35 }
0x431e   :  { %v5815_v48 = vpop.f32.mrf.mxu1 }
0x431f   :  { %v5897_v36 = vmul.f32 0.35355338, %v5815_v48 }
0x4320   :  { %v7803_v37 = vpop.f32.mrf.mxu1 }
0x4321   :  { %v5899_v45 = vsel %vm2873_vm12, %v5897_v36, -inf }
0x4322   :  { %5900 = vmax.xlane.f32.xlu0 %v5899_v45 }
0x4326   :  { %5915 = vadd.xlane.f32.xlu0 %v5914_v47 }
0x43ab   :  { %v5901_v42 = vpop.xlane.xlu0 %5900 }
0x43ac   :  { %v5905_v19 = vsub.f32 %v5897_v36, %v5901_v42 }
0x43ae   :  { %v5907_v20 = vmul.f32 1.442695, %v5905_v19 }
0x43af   :  { %v5916_v31 = vpop.xlane.xlu0 %5915 }
0x43b0   :  { %8236 = vpow2.f32 %v5907_v20 }
0x43b1   :  { %8238 = vrcp.f32 %v5916_v31 }
0x43bd   :  { %v8237_v52 = vpop.eup %8236 }
0x43be   :  { %v5911_v53 = vsel %vm2873_vm12, %v8237_v52, 0.0  ;;  %v8239_v28 = vpop.eup %8238 }
0x43bf   :  { %5912 = vadd.xlane.f32.xlu0 %v5911_v53  ;;  %v5920_v1 = vmul.f32 %v8239_v28, %v8235_v38  ;;  %v7151_v38 = vld [vmem:[#allocation11 + $0x1] ss:$0 sm:$0xff] }
0x43d5   :  { %5997 = vrot.lane.b32.xlu0 %v9572_v54, %s8560_s15 }
0x43d9   :  { %6156 = vrot.lane.b32.xlu0 %v9574_v56, %s8562_s20 }
0x4448   :  { %v5913_v32 = vpop.xlane.xlu0 %5912 }
0x4449   :  { %8240 = vrcp.f32 %v5913_v32 }
0x444c   :  { %v5998_v29 = vpop.permute.xlu0 %5997 }
0x444d   :  { %7815 = vmatpush3.msra.mxu0 %v5998_v29 }
0x444e   :  { %7817 = vmatmul.mubr.msk.f32.vlgmr.msra.gmra.mxu0 %vm2873_vm12, %v5920_v1  ;;  %7824 = vmatprep.subr.mxu0 %v8550_v0 }
0x444f   :  { %7825 = vmatpush3.xpose.msk.msra.mxu0 %vm2873_vm12, %v6159_v3  ;;  %7826 = vmatprep.mubr.msk.f32.mxu0 %vm8551_vm0, %v8550_v0 }
0x4450   :  { %v6157_v2 = vpop.permute.xlu0 %6156  ;;  %7834 = vmatprep.subr.mxu0 %v8550_v0 }
0x4452   :  { %7827 = vmatmul.mubr.msk.f32.vlgmr.msra.gmra.mxu0 %vm2873_vm12, %v6157_v2 }
0x4453   :  { %7836 = vmatprep.mubr.msk.f32.mxu0 %vm8551_vm0, %v8550_v0 }
0x4456   :  { %v8241_v39 = vpop.eup %8240 }
0x4457   :  { %v5918_v22 = vmul.f32 %v8241_v39, %v8237_v52 }
0x4459   :  { %7812 = vmatmul.mubr.msk.f32.vlgmr.msra.gmra.mxu1 %vm2873_vm12, %v5918_v22 }
0x445a   :  { %7820 = vmatpush3.msra.mxu1 %v7117_v23 }
0x445b   :  { %7829 = vmatprep.subr.mxu1 %v8550_v0 }
0x450e   :  { %v6069_v7 = vpop.f32.mrf.mxu0 }
0x4510   :  { %v7818_v43 = vpop.f32.mrf.mxu0 }
0x4512   :  { %v6230_v61 = vpop.f32.mrf.mxu0 }
0x4513   :  { %v6312_v46 = vmul.f32 0.35355338, %v6230_v61  ;;  %v7156_v61 = vld [vmem:[%s9823_s11 + $0x30] sm:$0xff] }
0x4514   :  { %v7828_v62 = vpop.f32.mrf.mxu0 }
0x4515   :  { %v6314_v13 = vsel %vm2873_vm12, %v6312_v46, -inf  ;;  %v7154_v62 = vld [vmem:[%s9823_s11 + $0x20] sm:$0xff] }
0x4516   :  { %6315 = vmax.xlane.f32.xlu0 %v6314_v13  ;;  %v7168_v13 = vld [vmem:[%s9825_s13 + $0x78] sm:$0xff] }
0x4519   :  { %v5993_v40 = vpop.f32.mrf.mxu1 }
0x451a   :  { %7821 = vmatprep.mubr.msk.f32.mxu1 %vm2873_vm12, %v5993_v40  ;;  %v7166_v40 = vld [vmem:[%s9825_s13 + $0x68] sm:$0xff] }
0x451b   :  { %v7813_v41 = vpop.f32.mrf.mxu1  ;;  %7822 = vmatmul.mubr.msk.f32.vlgmr.msra.gmra.mxu1 %vm2873_vm12, %v6069_v7 }
0x451c   :  { %7830 = vmatpush3.xpose.msk.msra.mxu1 %vm2873_vm12, %v6237_v14  ;;  %7831 = vmatprep.mubr.msk.f32.mxu1 %vm8551_vm0, %v8550_v0  ;;  %v7167_v14 = vld [vmem:[%s9825_s13 + $0x70] sm:$0xff]  ;;  %v7165_v41 = vld [vmem:[%s9825_s13 + $0x60] sm:$0xff] }
0x451d   :  { %7839 = vmatprep.subr.mxu1 %v8550_v0 }
0x451f   :  { %7832 = vmatmul.mubr.msk.f32.vlgmr.msra.gmra.mxu1 %vm2873_vm12, %v6235_v4 }
0x4520   :  { %7841 = vmatprep.mubr.msk.f32.mxu1 %vm8551_vm0, %v8550_v0 }
0x459f   :  { %v6316_v49 = vpop.xlane.xlu0 %6315 }
0x45a0   :  { %v6320_v51 = vsub.f32 %v6312_v46, %v6316_v49  ;;  %v7155_v46 = vld [vmem:[%s9823_s11 + $0x28] sm:$0xff] }
0x45a2   :  { %v6322_v55 = vmul.f32 1.442695, %v6320_v51 }
0x45a4   :  { %8242 = vpow2.f32 %v6322_v55 }
0x45b1   :  { %v8243_v57 = vpop.eup %8242 }
0x45b2   :  { %v6326_v58 = vsel %vm2873_vm12, %v8243_v57, 0.0 }
0x45b3   :  { %6327 = vadd.xlane.f32.xlu0 %v6326_v58 }
0x45db   :  { %v7823_v60 = vpop.f32.mrf.mxu1 }
0x45dc   :  { %v6155_v6 = vadd.f32 %v7823_v60, %v5738_v59  ;;  %v7152_v60 = vld [vmem:[#allocation15 + $0x1] ss:$0 sm:$0xff] }
0x45dd   :  { %v6145_v9 = vpop.f32.mrf.mxu1 }
0x45de   :  { %v6154_v16 = vadd.f32 %v6145_v9, %v5733_v63 }
0x45df   :  { %v6308_v18 = vpop.f32.mrf.mxu1 }
0x45e0   :  { %v6313_v12 = vmul.f32 0.35355338, %v6308_v18  ;;  %v7153_v18 = vld [vmem:[#allocation17 + $0x1] ss:$0 sm:$0xff] }
0x45e1   :  { %v7833_v21 = vpop.f32.mrf.mxu1 }
0x45e2   :  { %v6317_v5 = vsel %vm2873_vm12, %v6313_v12, -inf }
0x45e3   :  { %6318 = vmax.xlane.f32.xlu1 %v6317_v5 }
0x45f4   :  { %6336 = vrot.lane.b32.xlu1 %v9574_v56, %s8563_s4  ;;  %v7118_v56 = vld [vmem:[%s9821_s9 + $0x38] sm:$0xff] }
0x463c   :  { %v6328_v24 = vpop.xlane.xlu0 %6327 }
0x463d   :  { %8244 = vrcp.f32 %v6328_v24  ;;  %v7164_v24 = vld [vmem:[%s9825_s13 + $0x58] sm:$0xff] }
0x464a   :  { %v8245_v10 = vpop.eup %8244 }
0x464b   :  { %v6333_v17 = vmul.f32 %v8245_v10, %v8243_v57  ;;  %v7162_v10 = vld [vmem:[%s9825_s13 + $0x48] sm:$0xff] }
0x466c   :  { %v6319_v15 = vpop.xlane.xlu1 %6318 }
0x466d   :  { %v6321_v11 = vsub.f32 %v6313_v12, %v6319_v15  ;;  %v7163_v15 = vld [vmem:[%s9825_s13 + $0x50] sm:$0xff] }
0x466f   :  { %v6324_v50 = vmul.f32 1.442695, %v6321_v11  ;;  %v7161_v11 = vld [vmem:[%s9825_s13 + $0x40] sm:$0xff] }
0x4670   :  { %v6337_v25 = vpop.permute.xlu1 %6336 }
0x4671   :  { %8246 = vpow2.f32 %v6324_v50  ;;  %7835 = vmatpush3.msra.mxu0 %v6337_v25  ;;  %v7158_v50 = vld [vmem:[#allocation12 + $0x1] ss:$0 sm:$0xff] }
0x4672   :  { %7837 = vmatmul.mubr.msk.f32.vlgmr.msra.gmra.mxu0 %vm2873_vm12, %v6333_v17  ;;  %7844 = vmatprep.subr.mxu0 %v7118_v56 }
0x4673   :  { %7845 = vmatpush3.msra.mxu0 %v7118_v56 }
0x4674   :  { %7860 = vmatprep.subr.mxu0 %v7168_v13 }
0x467e   :  { %v8247_v26 = vpop.eup %8246 }
0x467f   :  { %v6329_v27 = vsel %vm2873_vm12, %v8247_v26, 0.0 }
0x4680   :  { %6330 = vadd.xlane.f32.xlu0 %v6329_v27 }
0x4696   :  { %6412 = vrot.lane.b32.xlu0 %v9572_v54, %s8563_s4 }
0x4709   :  { %v6331_v30 = vpop.xlane.xlu0 %6330 }
0x470a   :  { %8248 = vrcp.f32 %v6331_v30 }
0x470d   :  { %v6413_v33 = vpop.permute.xlu0 %6412 }
0x470e   :  { %7840 = vmatpush3.msra.mxu1 %v6413_v33  ;;  %v7169_v33 = vld [vmem:[#allocation14 + $0x1] ss:$0 sm:$0xff] }
0x4717   :  { %v8249_v34 = vpop.eup %8248 }
0x4718   :  { %v6335_v35 = vmul.f32 %v8249_v34, %v8247_v26 }
0x471a   :  { %7842 = vmatmul.mubr.msk.f32.vlgmr.msra.gmra.mxu1 %vm2873_vm12, %v6335_v35 }
0x4732   :  { %v6408_v48 = vpop.f32.mrf.mxu0 }
0x4733   :  { %7846 = vmatprep.mubr.msk.f32.mxu0 %vm2873_vm12, %v6408_v48 }
0x4734   :  { %v7838_v36 = vpop.f32.mrf.mxu0 }
0x47da   :  { %v6484_v37 = vpop.f32.mrf.mxu1 }
0x47db   :  { %7847 = vmatmul.mubr.msk.f32.vlgmr.msra.gmra.mxu0 %vm2873_vm12, %v6484_v37 }
0x47dc   :  { %v7843_v54 = vpop.f32.mrf.mxu1  ;;  %7861 = vmatpush3.msra.mxu0 %v7168_v13 }
0x47dd   :  { %7862 = vmatprep.subr.mxu0 %v7167_v14 }
0x47de   :  { %7863 = vmatpush3.msra.mxu0 %v7167_v14  ;;  %v7173_v14 = vld [vmem:[#allocation20 + $0x1] ss:$0 sm:$0xff] }
0x47df   :  { %7864 = vmatprep.subr.mxu0 %v7166_v40 }
0x47e0   :  { %7865 = vmatpush3.msra.mxu0 %v7166_v40 }
0x47e1   :  { %7866 = vmatprep.subr.mxu0 %v7165_v41 }
0x47e2   :  { %7867 = vmatpush3.msra.mxu0 %v7165_v41 }
0x47e3   :  { %7868 = vmatprep.subr.mxu0 %v7164_v24 }
0x47e4   :  { %7869 = vmatpush3.msra.mxu0 %v7164_v24 }
0x47e5   :  { %7870 = vmatprep.subr.mxu0 %v7163_v15 }
0x47e6   :  { %7871 = vmatpush3.msra.mxu0 %v7163_v15 }
0x47e7   :  { %7872 = vmatprep.subr.mxu0 %v7162_v10 }
0x47e8   :  { %7873 = vmatpush3.msra.mxu0 %v7162_v10 }
0x47e9   :  { %7874 = vmatprep.subr.mxu0 %v7161_v11 }
0x47ea   :  { %7875 = vmatpush3.msra.mxu0 %v7161_v11 }
0x489b   :  { %v7848_v45 = vpop.f32.mrf.mxu0 }
0x489c   :  { %v6570_v47 = vadd.f32 %v7848_v45, %v6155_v6 }
0x489d   :  { %v6560_v42 = vpop.f32.mrf.mxu0 }
0x489e   :  { %v6580_v19 = vadd.f32 %v7151_v38, %v6570_v47  ;;  %v6569_v20 = vadd.f32 %v6560_v42, %v6154_v16 }
0x48a0   :  { %v6579_v52 = vadd.f32 %v7151_v38, %v6569_v20  ;;  %v6582_v53 = vadd.f32 %v6580_v19, %v9564_v44 }
0x48a2   :  { %v6590_v31 = vsel %vm327_vm3, %v6582_v53, 0.0  ;;  %v6581_v32 = vadd.f32 %v6579_v52, %v9562_v8  ;;  %v7157_v8 = vld [vmem:[%s9823_s11 + $0x38] sm:$0xff] }
0x48a3   :  { %6591 = vadd.xlane.f32.xlu0 %v6590_v31  ;;  %7849 = vmatprep.subr.mxu1 %v7157_v8 }
0x48a4   :  { %v6587_v28 = vsel %vm327_vm3, %v6581_v32, 0.0  ;;  %7850 = vmatpush3.msra.mxu1 %v7157_v8 }
0x48a5   :  { %6588 = vadd.xlane.f32.xlu1 %v6587_v28  ;;  %7851 = vmatprep.subr.mxu1 %v7156_v61 }
0x48a6   :  { %7852 = vmatpush3.msra.mxu1 %v7156_v61 }
0x48a7   :  { %7853 = vmatprep.subr.mxu1 %v7155_v46 }
0x48a8   :  { %7854 = vmatpush3.msra.mxu1 %v7155_v46  ;;  %v7172_v46 = vld [vmem:[#allocation18 + $0x1] ss:$0 sm:$0xff] }
0x48a9   :  { %7855 = vmatprep.subr.mxu1 %v7154_v62 }
0x48aa   :  { %7856 = vmatpush3.msra.mxu1 %v7154_v62 }
0x48ab   :  { %7879 = vmatprep.subr.mxu1 %v8550_v0 }
0x492c   :  { %v6592_v29 = vpop.xlane.xlu0 %6591 }
0x492d   :  { %v6594_v1 = vmul.f32 0.03125, %v6592_v29 }
0x492e   :  { %v6589_v3 = vpop.xlane.xlu1 %6588 }
0x492f   :  { %v6596_v2 = vsub.f32 %v6582_v53, %v6594_v1  ;;  %v6593_v39 = vmul.f32 0.03125, %v6589_v3  ;;  %v6874_v1 = vld [vmem:[%s9831_s19 + $0x18] sm:$0xff]  ;;  %v6873_v3 = vld [vmem:[%s9831_s19 + $0x10] sm:$0xff] }
0x4931   :  { %v6595_v22 = vsub.f32 %v6581_v32, %v6593_v39  ;;  %v6598_v23 = vmul.f32 %v6596_v2, %v6596_v2  ;;  %v6871_v39 = vld [vmem:[%s9831_s19] sm:$0xff] }
0x4933   :  { %v6602_v7 = vsel %vm327_vm3, %v6598_v23, 0.0  ;;  %v6597_v43 = vmul.f32 %v6595_v22, %v6595_v22 }
0x4934   :  { %6603 = vadd.xlane.f32.xlu0 %v6602_v7 }
0x4935   :  { %v6599_v44 = vsel %vm327_vm3, %v6597_v43, 0.0 }
0x4936   :  { %6600 = vadd.xlane.f32.xlu1 %v6599_v44 }
0x49bd   :  { %v6604_v4 = vpop.xlane.xlu0 %6603 }
0x49be   :  { %v6606_v49 = vmul.f32 0.03125, %v6604_v4 }
0x49bf   :  { %v6601_v51 = vpop.xlane.xlu1 %6600 }
0x49c0   :  { %v6608_v55 = vadd.f32 1e-05, %v6606_v49  ;;  %v6605_v57 = vmul.f32 0.03125, %v6601_v51 }
0x49c2   :  { %8250 = vrsqrt.f32 %v6608_v55  ;;  %v6607_v58 = vadd.f32 1e-05, %v6605_v57 }
0x49c4   :  { %8252 = vrsqrt.f32 %v6607_v58  ;;  %v8564_v58 = vmov 1966171168  }
0x49cf   :  { %v8251_v59 = vpop.eup %8250 }
0x49d0   :  { %v6612_v63 = vmul.f32 %v8251_v59, %v6596_v2  ;;  %v6872_v2 = vld [vmem:[%s9831_s19 + $0x8] sm:$0xff]  ;;  %v6961_v59 = vunpack.c.l.s4 %v8564_v58  ;;  %s8565_s19 = smov [#allocation23]  }
0x49d1   :  { %v8253_v6 = vpop.eup %8252  ;;  %s6992_s25 = sshll.u32 %s8565_s19, 4  ;;  %s6993_s25 = int_to_ptr.vmem [resolvable:$true] %s6992_s25 }
0x49d2   :  { %v6611_v9 = vmul.f32 %v8253_v6, %v6595_v22  ;;  %v6620_v16 = vmul.f32 %v7152_v60, %v6612_v63  ;;  %v6962_v63 = vunpack.c.0.s8 %v6961_v59  ;;  %s8498_s6 = scalar_lea.vmem %s6993_s25, 32  ;;  %p8503_p5 = scmp.lt.s32.totalorder %s6993_s25, %s6993_s25 }
0x49d3   :  { %p8499_p4 = scmp.ne.s32.totalorder %s6993_s25, %s8498_s6  ;;  %p8504_p6 = scmp.lt.s32.totalorder %s8498_s6, %s8498_s6 }
0x49d4   :  { %v6619_v12 = vmul.f32 %v7152_v60, %v6611_v9  ;;  %v6628_v5 = vadd.f32 %v7153_v18, %v6620_v16  ;;  %v6963_v60 = vlaneseq  ;;  %v7174_v9 = vld [vmem:[#allocation21] ss:$0 sm:$0xff] }
0x49d5   :  { %p8505_p7 = por %p8504_p6, %p8503_p5 }
0x49d6   :  { %v6627_v21 = vadd.f32 %v7153_v18, %v6619_v12  ;;  %v6964_v6 = vshrl.u32 %v6963_v60, 7 }
0x49d7   :  { %p8506_p8 = pnand %p8505_p7, %p8499_p4 }
0x49d8   :  { %7857 = vmatprep.mubr.msk.f32.mxu1 %vm327_vm3, %v6627_v21  ;;  %v6965_v16 = vsub.s32 %v6962_v63, %v6964_v6 }
0x49d9   :  { %7858 = vmatmul.mubr.msk.f32.vlgmr.msra.gmra.mxu1 %vm327_vm3, %v6628_v5 }
0x49da   :  { %7887 = vmatprep.mubr.msk.f32.mxu1 %vm8551_vm0, %v8550_v0  ;;  %7880 = vmatpush3.msra.mxu1 %v6874_v1 }
0x49db   :  { %7881 = vmatprep.subr.mxu1 %v8550_v0 }
0x49dc   :  { %7882 = vmatpush3.msra.mxu1 %v6873_v3 }
0x49dd   :  { %7883 = vmatprep.subr.mxu1 %v8550_v0 }
0x49de   :  { %7884 = vmatpush3.msra.mxu1 %v6872_v2 }
0x49df   :  { %7885 = vmatprep.subr.mxu1 %v8550_v0 }
0x49e0   :  { %7886 = vmatpush3.msra.mxu1 %v6871_v39 }
0x4a99   :  { %v7859_v25 = vpop.f32.mrf.mxu1 }
0x4a9a   :  { %v6720_v17 = vadd.f32 %v7859_v25, %v7158_v50 }
0x4a9b   :  { %v6714_v26 = vpop.f32.mrf.mxu1 }
0x4a9c   :  { %v6715_v27 = vadd.f32 %v7158_v50, %v6714_v26  ;;  %v6724_v30 = vmax.f32 %v6720_v17, 0.0 }
0x4a9e   :  { %v6723_v56 = vmax.f32 %v6715_v27, 0.0 }
0x4aa0   :  { %7876 = vmatprep.mubr.msk.f32.mxu0 %vm4690_vm13, %v6723_v56 }
0x4aa1   :  { %7877 = vmatmul.mubr.msk.f32.vlgmr.msra.gmra.mxu0 %vm4690_vm13, %v6724_v30 }
0x4b61   :  { %v7878_v34 = vpop.f32.mrf.mxu0 }
0x4b62   :  { %v6820_v35 = vadd.f32 %v7878_v34, %v7169_v33 }
0x4b63   :  { %v6814_v48 = vpop.f32.mrf.mxu0 }
0x4b64   :  { %v6824_v36 = vadd.f32 %v6820_v35, %v6628_v5  ;;  %v6815_v37 = vadd.f32 %v7169_v33, %v6814_v48 }
0x4b66   :  { %v6823_v54 = vadd.f32 %v6815_v37, %v6627_v21  ;;  %v6832_v45 = vsel %vm327_vm3, %v6824_v36, 0.0 }
0x4b67   :  { %6833 = vadd.xlane.f32.xlu0 %v6832_v45 }
0x4b68   :  { %v6829_v38 = vsel %vm327_vm3, %v6823_v54, 0.0 }
0x4b69   :  { %6830 = vadd.xlane.f32.xlu1 %v6829_v38 }
0x4bf0   :  { %v6834_v47 = vpop.xlane.xlu0 %6833 }
0x4bf1   :  { %v6836_v42 = vmul.f32 0.03125, %v6834_v47 }
0x4bf2   :  { %v6831_v19 = vpop.xlane.xlu1 %6830 }
0x4bf3   :  { %v6838_v20 = vsub.f32 %v6824_v36, %v6836_v42  ;;  %v6835_v52 = vmul.f32 0.03125, %v6831_v19 }
0x4bf5   :  { %v6837_v53 = vsub.f32 %v6823_v54, %v6835_v52  ;;  %v6840_v31 = vmul.f32 %v6838_v20, %v6838_v20 }
0x4bf7   :  { %v6844_v32 = vsel %vm327_vm3, %v6840_v31, 0.0  ;;  %v6839_v28 = vmul.f32 %v6837_v53, %v6837_v53 }
0x4bf8   :  { %6845 = vadd.xlane.f32.xlu0 %v6844_v32 }
0x4bf9   :  { %v6841_v29 = vsel %vm327_vm3, %v6839_v28, 0.0 }
0x4bfa   :  { %6842 = vadd.xlane.f32.xlu1 %v6841_v29 }
0x4c81   :  { %v6846_v22 = vpop.xlane.xlu0 %6845 }
0x4c82   :  { %v6848_v23 = vmul.f32 0.03125, %v6846_v22 }
0x4c83   :  { %v6843_v7 = vpop.xlane.xlu1 %6842 }
0x4c84   :  { %v6850_v43 = vadd.f32 1e-05, %v6848_v23  ;;  %v6847_v44 = vmul.f32 0.03125, %v6843_v7 }
0x4c86   :  { %8254 = vrsqrt.f32 %v6850_v43  ;;  %v6849_v8 = vadd.f32 1e-05, %v6847_v44 }
0x4c88   :  { %8256 = vrsqrt.f32 %v6849_v8 }
0x4c93   :  { %v8255_v61 = vpop.eup %8254 }
0x4c94   :  { %v6854_v62 = vmul.f32 %v8255_v61, %v6838_v20 }
0x4c95   :  { %v8257_v13 = vpop.eup %8256 }
0x4c96   :  { %v6853_v40 = vmul.f32 %v8257_v13, %v6837_v53  ;;  %v6862_v41 = vmul.f32 %v7172_v46, %v6854_v62 }
0x4c98   :  { %v6861_v4 = vmul.f32 %v7172_v46, %v6853_v40  ;;  %v6870_v49 = vadd.f32 %v7173_v14, %v6862_v41 }
0x4c9a   :  { %v6869_v51 = vadd.f32 %v7173_v14, %v6861_v4  ;;  %v6885_v55 = vrot.slane %v6870_v49, 6 }
0x4c9c   :  { %v6884_v0 = vrot.slane %v6869_v51, 7 }
0x4c9e   :  { %v6886_v57 = vsel %vm467_vm2, %v6885_v55, %v6884_v0 }
0x4c9f   :  { %7888 = vmatmul.mubr.msk.f32.vlgmr.msra.gmra.mxu1 %vm327_vm3, %v6886_v57 }
0x4d5f   :  { %v6955_v18 = vpop.f32.mrf.mxu1 }
0x4d60   :  { %v6956_v12 = vadd.f32 %v7174_v9, %v6955_v18 }
0x4d61   :  { %v7889_v21 = vpop.f32.mrf.mxu1 }
0x4d62   :  { %v6966_v5 = vrot.slane %v6956_v12, %v6965_v16 }
0x4d64   :  { %v6967_v24 = vcombine.high %v6966_v5, %v6966_v5  ;;  %v6974_v15 = vrot.slane %v6966_v5, %v6965_v16 }
0x4d66   :  { %v6981_v10 = vrot.slane %v6967_v24, %v6965_v16  ;;  %6985 = vst.msk [vmem:[#allocation23] sm:$0x1] %vm6984_vm14, %v6974_v15 }
0x4d68   :  { %6986 = vst.msk [vmem:[#allocation23 + $0x1] sm:$0x1] %vm6984_vm14, %v6981_v10 }
0x4d69   :  { %8509 = shalt.err (!%p8506_p8)
}
0x4d6a   :  { %6998 = dma.vmem_to_hbm [thread:$0]  %s6993_s25, 32, %s9833_s21, [#allocation5], %s8538_s22, %s8538_s22, %s8539_s23  }
0x4d6b   :  { %8532 = dma.done.wait [#allocation5], 32  }
0x4d6c   :  { %8533 = vsyncadd [#allocation5], 4294967264 }
0x4d6d   :  { %7002 = vsyncpa [#allocation4], 1 }
0x4d6e   :  { %7003 = vsyncpa [#allocation7], 1 }
0x4d6f   :  { %7004 = vsyncpa [#allocation10], 1 }
0x4d70   :  { %7005 = vsyncpa [#allocation13], 1 }
0x4d71   :  { %7006 = vsyncpa [#allocation16], 1 }
0x4d72   :  { %7007 = vsyncpa [#allocation19], 1 }
0x4d73   :  { %7008 = vsyncpa [#allocation22], 1 }
0x4d74   :  { %7009 = vsyncpa [#allocation5], 1 }

</bundles_post_ra>
